<compile_context>
chip_gen: v6e
topology: v6e:2x2x1
jax: 0.10.0
libtpu: 0.0.40
codegen_flags: <defaults>
</compile_context>

<pallas_src>
import functools

import jax
import jax.numpy as jnp
from jax.experimental import pallas as pl
from jax.experimental.pallas import tpu as pltpu

_MAX_TILE = 8192                       # hard cap on the lane (column) tile
_TILE_VMEM_BUDGET = 20 * 1024 * 1024   # per-kernel working-set target (bytes)
_VMEM_LIMIT = 48 * 1024 * 1024         # scoped-VMEM permission (< v7x 64 MiB)
_PACK_TARGET = 256                     # spectral K~=N packing (v6e/v7x MXU tile)


# ----------------------------------------------------------------------------
# In-kernel exact GELU (erf via a f32 rational approximation), all f32
# ----------------------------------------------------------------------------
_KALPHA = (0.00022905065861350646, 0.0034082910107109506, 0.050955695062380861,
           0.18520832239976145, 1.128379143519084)
_KBETA = (-1.1791602954361697e-07, 2.3547966471313185e-05, 0.0010179625278914885,
          0.014070470171167667, 0.11098505178285362, 0.49746925110067538, 1.0)


def _erf_f32(x):
    x = jnp.clip(x, -4.0, 4.0)
    x2 = x * x
    p = jnp.float32(_KALPHA[0])
    for c in _KALPHA[1:]:
        p = p * x2 + jnp.float32(c)
    q = jnp.float32(_KBETA[0])
    for c in _KBETA[1:]:
        q = q * x2 + jnp.float32(c)
    return (x * p) / q


def _gelu_exact(x):
    # 0.5 * x * (1 + erf(x / sqrt(2)))  (PyTorch F.gelu default, exact)
    return 0.5 * x * (1.0 + _erf_f32(x * jnp.float32(0.7071067811865476)))


def _ifloor_div(x, d):
    # floor(x / d) for non-negative integer-valued f32 x (exact for x < 2**22).
    return jnp.floor((x + 0.5) / jnp.float32(d))


# ----------------------------------------------------------------------------
# Channels-first row kernels: activation blocks are (C, TILE), all f32
# ----------------------------------------------------------------------------
def _fc0_kernel(x_ref, w_ref, wg_ref, b_ref, o_ref, *, hh, ww, tile):
    # Lift: o = W_x @ x + w_gx * gridx + w_gy * gridy + b.  The two grid
    # channels are synthesized in-kernel from the flat column index (columns
    # are ordered (b, h, w)); out-of-range columns of a partial last block are
    # discarded by Pallas so their garbage grid values are harmless.
    col = (pl.program_id(0) * tile
           + jax.lax.broadcasted_iota(jnp.int32, (1, tile), 1)).astype(jnp.float32)
    hw = float(hh * ww)
    rem = col - _ifloor_div(col, hw) * hw          # col mod (H*W)
    hx = _ifloor_div(rem, float(ww))               # spatial row index in [0,H)
    wy = rem - hx * float(ww)                      # spatial col index in [0,W)
    gx = hx * jnp.float32(1.0 / max(hh - 1, 1))    # torch.linspace(0,1,H)[hx]
    gy = wy * jnp.float32(1.0 / max(ww - 1, 1))    # torch.linspace(0,1,W)[wy]
    y = jnp.dot(w_ref[...], x_ref[...], preferred_element_type=jnp.float32)
    y = y + wg_ref[:, 0:1] * gx + wg_ref[:, 1:2] * gy + b_ref[...]
    o_ref[...] = y.astype(o_ref.dtype)


def _combine_kernel(y1_ref, x_ref, w_ref, b_ref, o_ref, *, apply_gelu):
    # Fourier layer merge: (gelu)( spectral_out + W_1x1 @ x + b )
    y = jnp.dot(w_ref[...], x_ref[...], preferred_element_type=jnp.float32)
    y = y1_ref[...] + y + b_ref[...]
    if apply_gelu:
        y = _gelu_exact(y)
    o_ref[...] = y.astype(o_ref.dtype)


def _combine_proj_kernel(y1_ref, x_ref, w_ref, b_ref,
                         w1_ref, b1_ref, w2_ref, b2_ref, o_ref):
    # Layer-3 merge (no gelu) fused with fc1 -> gelu -> fc2: the (width, TILE)
    # and (128, TILE) intermediates never leave VMEM.
    z = jnp.dot(w_ref[...], x_ref[...], preferred_element_type=jnp.float32)
    z = y1_ref[...] + z + b_ref[...]
    h = jnp.dot(w1_ref[...], z, preferred_element_type=jnp.float32)
    h = _gelu_exact(h + b1_ref[...])
    y = jnp.dot(w2_ref[...], h, preferred_element_type=jnp.float32)
    o_ref[...] = (y + b2_ref[...]).astype(o_ref.dtype)


def _spectral_kernel(xr_ref, xi_ref, wr_ref, wi_ref, or_ref, oi_ref):
    # One grid step = one packed group of modes (one frequency half each).
    # Weights are block-diagonal over the packed modes so K = N = pack*width.
    # Plain 4-multiplication complex product (avoids Gauss-trick cancellation).
    xr = xr_ref[0]                   # (B, pack*Cin)
    xi = xi_ref[0]
    wr = wr_ref[0]                   # (pack*Cin, pack*Cout), block-diagonal
    wi = wi_ref[0]
    rr = jnp.dot(xr, wr, preferred_element_type=jnp.float32)
    ii = jnp.dot(xi, wi, preferred_element_type=jnp.float32)
    ri = jnp.dot(xr, wi, preferred_element_type=jnp.float32)
    ir = jnp.dot(xi, wr, preferred_element_type=jnp.float32)
    or_ref[0] = rr - ii
    oi_ref[0] = ri + ir


# ----------------------------------------------------------------------------
# Pallas wrappers
# ----------------------------------------------------------------------------
def _pick_tile(n, rows_per_col):
    """Lane (column) tile: multiple of 128, targets >= 4 grid steps when
    possible (2 per TensorCore on v7x so prefetch/writeback overlap), and is
    capped so double-buffered blocks + f32 temporaries (rows_per_col f32 rows
    per column, a rough per-kernel estimate) stay inside VMEM on v7x."""
    cap = _TILE_VMEM_BUDGET // max(4 * rows_per_col, 1)
    cap = max(512, min(_MAX_TILE, (cap // 128) * 128))
    quarter = -(-n // 4)
    tile = max(128, -(-quarter // 128) * 128)
    return int(min(cap, tile))


def _cf_call(kernel, act_inputs, const_inputs, cout, n, tile):
    """Run a channels-first kernel over (C, n) activations, tiled along n."""
    in_specs = [pl.BlockSpec((a.shape[0], tile), lambda i: (0, i))
                for a in act_inputs]
    in_specs += [pl.BlockSpec(c.shape, lambda i: (0, 0)) for c in const_inputs]
    return pl.pallas_call(
        kernel,
        out_shape=jax.ShapeDtypeStruct((cout, n), jnp.float32),
        grid_spec=pltpu.PrefetchScalarGridSpec(
            num_scalar_prefetch=0,
            grid=(pl.cdiv(n, tile),),
            in_specs=in_specs,
            out_specs=pl.BlockSpec((cout, tile), lambda i: (0, i)),
        ),
        compiler_params=pltpu.CompilerParams(
            dimension_semantics=("parallel",),
            vmem_limit_bytes=_VMEM_LIMIT),
    )(*act_inputs, *const_inputs)


def fc0_pallas(x_cf, w_x, w_g, b, hh, ww):
    # x_cf: (Cin, n); w_x: (width, Cin); w_g: (width, 2) [gridx, gridy cols]
    cin, n = x_cf.shape
    width = w_x.shape[0]
    tile = _pick_tile(n, 4 * cin + 4 * width)
    kern = functools.partial(_fc0_kernel, hh=hh, ww=ww, tile=tile)
    return _cf_call(kern, [x_cf],
                    [w_x.astype(jnp.float32), w_g.astype(jnp.float32),
                     b.reshape(width, 1).astype(jnp.float32)],
                    width, n, tile)


def combine_pallas(y1_cf, x_cf, w, b, apply_gelu):
    width, n = x_cf.shape
    cout = w.shape[0]
    tile = _pick_tile(n, 8 * max(width, cout))
    kern = functools.partial(_combine_kernel, apply_gelu=apply_gelu)
    return _cf_call(kern, [y1_cf, x_cf],
                    [w.astype(jnp.float32),
                     b.reshape(cout, 1).astype(jnp.float32)],
                    cout, n, tile)


def combine_proj_pallas(y1_cf, x_cf, w3, b3, w1_t, b1, w2_t, b2):
    width, n = x_cf.shape
    hidden = w1_t.shape[0]
    tile = _pick_tile(n, 6 * width + 3 * hidden)
    return _cf_call(_combine_proj_kernel, [y1_cf, x_cf],
                    [w3.astype(jnp.float32),
                     b3.reshape(-1, 1).astype(jnp.float32),
                     w1_t.astype(jnp.float32),
                     b1.reshape(-1, 1).astype(jnp.float32),
                     w2_t.astype(jnp.float32),
                     b2.reshape(1, 1).astype(jnp.float32)],
                    1, n, tile)


def spectral_mul_pallas(xr, xi, wr, wi):
    # xr, xi: (NG, B, K); wr, wi: (NG, K, N) block-diagonal over packed modes.
    ng, bsz, kdim = xr.shape
    ndim = wr.shape[-1]
    out_sh = jax.ShapeDtypeStruct((ng, bsz, ndim), jnp.float32)
    return pl.pallas_call(
        _spectral_kernel,
        out_shape=(out_sh, out_sh),
        grid_spec=pltpu.PrefetchScalarGridSpec(
            num_scalar_prefetch=0,
            grid=(ng,),
            in_specs=[
                pl.BlockSpec((1, bsz, kdim), lambda g: (g, 0, 0)),
                pl.BlockSpec((1, bsz, kdim), lambda g: (g, 0, 0)),
                pl.BlockSpec((1, kdim, ndim), lambda g: (g, 0, 0)),
                pl.BlockSpec((1, kdim, ndim), lambda g: (g, 0, 0)),
            ],
            out_specs=(
                pl.BlockSpec((1, bsz, ndim), lambda g: (g, 0, 0)),
                pl.BlockSpec((1, bsz, ndim), lambda g: (g, 0, 0)),
            ),
        ),
        compiler_params=pltpu.CompilerParams(
            dimension_semantics=("parallel",),
            vmem_limit_bytes=_VMEM_LIMIT),
    )(xr, xi, wr, wi)


# ----------------------------------------------------------------------------
# SpectralConv2d_fast equivalent (channels-first: x is (Cin, B, H, W))
# ----------------------------------------------------------------------------
def spectral_conv2d_cf(x_cf, w1r, w1i, w2r, w2i, m1, m2):
    cin, bsz, h, w = x_cf.shape
    cout = w1r.shape[1]
    wf = w // 2 + 1
    assert 2 * m1 <= h and m2 <= wf
    n_modes = m1 * m2
    pack = max(1, min(n_modes, _PACK_TARGET // max(cin, 1)))
    g = -(-n_modes // pack)
    n_pad = g * pack - n_modes

    # TODO(synk): rfft2/irfft2 have no Pallas TPU primitive; kept in plain JAX.
    x_ft = jnp.fft.rfft2(x_cf, axes=(2, 3))            # (Cin, B, H, Wf) c64
    top = x_ft[:, :, :m1, :m2]
    bot = x_ft[:, :, h - m1:, :m2]
    xs = jnp.stack([top, bot], axis=0)                 # (2, Cin, B, m1, m2)
    xs = xs.reshape(2, cin, bsz, n_modes)
    xs = jnp.transpose(xs, (0, 3, 2, 1))               # (2, M, B, Cin) — small
    if n_pad:
        xs = jnp.pad(xs, ((0, 0), (0, n_pad), (0, 0), (0, 0)))
    xs = xs.reshape(2, g, pack, bsz, cin)
    xs = jnp.transpose(xs, (0, 1, 3, 2, 4)).reshape(2 * g, bsz, pack * cin)
    xr = jnp.real(xs).astype(jnp.float32)
    xi = jnp.imag(xs).astype(jnp.float32)

    def _pack_w(wa, wb):
        # (Cin, Cout, m1, m2) x2 halves -> (2*g, pack*Cin, pack*Cout) block-diag.
        # (In deployment this is a one-time weight transform.)
        wt = jnp.stack([wa, wb], axis=0).astype(jnp.float32)  # (2,Cin,Cout,m1,m2)
        wt = wt.reshape(2, cin, cout, n_modes)
        wt = jnp.transpose(wt, (0, 3, 1, 2))                  # (2, M, Cin, Cout)
        if n_pad:
            wt = jnp.pad(wt, ((0, 0), (0, n_pad), (0, 0), (0, 0)))
        wt = wt.reshape(2, g, pack, cin, cout)
        eye = jnp.eye(pack, dtype=wt.dtype)
        wbd = jnp.einsum('hgpio,pq->hgpiqo', wt, eye)
        return wbd.reshape(2 * g, pack * cin, pack * cout)

    wr = _pack_w(w1r, w2r)          # weights1 -> top half, weights2 -> bottom
    wi = _pack_w(w1i, w2i)

    or_, oi_ = spectral_mul_pallas(xr, xi, wr, wi)      # (2g, B, pack*Cout)
    out = (or_ + 1j * oi_).astype(jnp.complex64)
    out = out.reshape(2, g, bsz, pack, cout)
    out = jnp.transpose(out, (0, 4, 2, 1, 3)).reshape(2, cout, bsz, g * pack)
    out = out[:, :, :, :n_modes].reshape(2, cout, bsz, m1, m2)

    # Assemble out_ft by concatenation with zero blocks (no zeros + scatter).
    zmid = jnp.zeros((cout, bsz, h - 2 * m1, m2), jnp.complex64)
    left = jnp.concatenate([out[0], zmid, out[1]], axis=2)   # (Cout, B, H, m2)
    out_ft = jnp.concatenate(
        [left, jnp.zeros((cout, bsz, h, wf - m2), jnp.complex64)], axis=3)
    return jnp.fft.irfft2(out_ft, s=(h, w), axes=(2, 3))     # (Cout,B,H,W) f32


# ----------------------------------------------------------------------------
# FNO2d forward
# ----------------------------------------------------------------------------
def fno2d_forward(x, params, modes1, modes2):
    # x: (B, C_in, H, W)  (NCHW, as in the PyTorch module)
    bsz, c_in, h, w = x.shape
    width = params["fc0_w"].shape[1]
    n = bsz * h * w

    # channels-first (C, B*H*W); only the tiny raw input is transposed in XLA.
    x_cf = jnp.transpose(x, (1, 0, 2, 3)).reshape(c_in, n)

    # fc0 (lift) — grid channels generated inside the kernel.
    fc0_w = params["fc0_w"]                       # (Cin+2, width): [data..,gx,gy]
    xh = fc0_pallas(x_cf, fc0_w[:c_in].T, fc0_w[c_in:].T, params["fc0_b"], h, w)
    xc = xh.reshape(width, bsz, h, w)

    # Fourier layers 0..2: x = gelu( SpectralConv(x) + Conv1x1(x) )
    for layer in range(3):
        x1 = spectral_conv2d_cf(
            xc,
            params[f"conv{layer}_w1_r"], params[f"conv{layer}_w1_i"],
            params[f"conv{layer}_w2_r"], params[f"conv{layer}_w2_i"],
            modes1, modes2)
        out = combine_pallas(x1.reshape(width, n), xc.reshape(width, n),
                             params[f"w{layer}_w"], params[f"w{layer}_b"],
                             apply_gelu=True)
        xc = out.reshape(width, bsz, h, w)

    # Fourier layer 3 (no gelu) fused with fc1 -> gelu -> fc2 projection.
    x1 = spectral_conv2d_cf(
        xc, params["conv3_w1_r"], params["conv3_w1_i"],
        params["conv3_w2_r"], params["conv3_w2_i"], modes1, modes2)
    out = combine_proj_pallas(
        x1.reshape(width, n), xc.reshape(width, n),
        params["w3_w"], params["w3_b"],
        params["fc1_w"].T, params["fc1_b"],
        params["fc2_w"].T, params["fc2_b"])
    return jnp.transpose(out.reshape(1, bsz, h, w), (1, 0, 2, 3))   # (B,1,H,W)


# ----------------------------------------------------------------------------
# Deterministic parameter init (shapes match the PyTorch module __init__)
# ----------------------------------------------------------------------------
def init_params(key, in_channels, width, modes1, modes2):
    keys = iter(jax.random.split(key, 32))
    nk = lambda: next(keys)
    p = {}
    # fc0: stored as (in_features+2, out_features); last two rows act on grid.
    p["fc0_w"] = 0.1 * jax.random.normal(nk(), (in_channels + 2, width), jnp.float32)
    p["fc0_b"] = 0.1 * jax.random.normal(nk(), (width,), jnp.float32)
    scale = 1.0 / (width * width)
    for layer in range(4):
        for wn in ("w1", "w2"):
            p[f"conv{layer}_{wn}_r"] = scale * jax.random.uniform(
                nk(), (width, width, modes1, modes2), jnp.float32)
            p[f"conv{layer}_{wn}_i"] = scale * jax.random.uniform(
                nk(), (width, width, modes1, modes2), jnp.float32)
        # 1x1 conv: stored as (out, in), applied as W @ x.
        p[f"w{layer}_w"] = 0.1 * jax.random.normal(nk(), (width, width), jnp.float32)
        p[f"w{layer}_b"] = 0.1 * jax.random.normal(nk(), (width,), jnp.float32)
    # fc1/fc2: stored as (in_features, out_features).
    p["fc1_w"] = 0.1 * jax.random.normal(nk(), (width, 128), jnp.float32)
    p["fc1_b"] = 0.1 * jax.random.normal(nk(), (128,), jnp.float32)
    p["fc2_w"] = 0.1 * jax.random.normal(nk(), (128, 1), jnp.float32)
    p["fc2_b"] = 0.1 * jax.random.normal(nk(), (1,), jnp.float32)
    return p


if __name__ == "__main__":
    B, C_IN, H, W = 2, 4, 16, 16     # input_channels=4, 16x16 grid
    WIDTH, MODES = 16, 4

    key = jax.random.PRNGKey(0)
    kx, kp = jax.random.split(key)
    x = jax.random.normal(kx, (B, C_IN, H, W), jnp.float32)
    params = init_params(kp, C_IN, WIDTH, MODES, MODES)

    fwd = jax.jit(functools.partial(fno2d_forward, modes1=MODES, modes2=MODES))
    out = fwd(x, params)
    out = jax.block_until_ready(out)
    assert out.shape == (B, 1, H, W), out.shape
    assert out.dtype == jnp.float32
    print("KERNEL_OK")
</pallas_src>

<mosaic_0001>
module attributes {stable_mosaic.version = 11 : i64} {
  func.func @_fc0_kernel(%arg0: i32, %arg1: memref<4x128xf32, #tpu.memory_space<vmem>>, %arg2: memref<16x4xf32, #tpu.memory_space<vmem>>, %arg3: memref<16x2xf32, #tpu.memory_space<vmem>>, %arg4: memref<16x1xf32, #tpu.memory_space<vmem>>, %arg5: memref<16x128xf32, #tpu.memory_space<vmem>>) attributes {dimension_semantics = [#tpu.dimension_semantics<parallel>], iteration_bounds = array<i64: 4>, scalar_prefetch = 0 : i64, scratch_operands = 0 : i64, tpu.core_type = #tpu.core_type<tc>, window_params = [{transform_indices = @transform_0, window_bounds = array<i64: 4, 128>}, {pipeline_mode = #tpu.pipeline_mode<synchronous>, transform_indices = @transform_1, window_bounds = array<i64: 16, 4>}, {pipeline_mode = #tpu.pipeline_mode<synchronous>, transform_indices = @transform_2, window_bounds = array<i64: 16, 2>}, {pipeline_mode = #tpu.pipeline_mode<synchronous>, transform_indices = @transform_3, window_bounds = array<i64: 16, 1>}, {transform_indices = @transform_4, window_bounds = array<i64: 16, 128>}]} {
    %c128_i32 = arith.constant 128 : i32
    %0 = arith.muli %arg0, %c128_i32 : i32
    %1 = tpu.iota {dimensions = array<i32: 1>} : vector<1x128xi32>
    %2 = vector.broadcast %0 : i32 to vector<1x128xi32>
    %3 = arith.addi %2, %1 : vector<1x128xi32>
    %4 = arith.sitofp %3 : vector<1x128xi32> to vector<1x128xf32>
    %cst = arith.constant 5.000000e-01 : f32
    %5 = vector.broadcast %cst : f32 to vector<1x128xf32>
    %6 = arith.addf %4, %5 : vector<1x128xf32>
    %cst_0 = arith.constant 2.560000e+02 : f32
    %7 = vector.broadcast %cst_0 : f32 to vector<1x128xf32>
    %8 = arith.divf %6, %7 : vector<1x128xf32>
    %9 = math.floor %8 : vector<1x128xf32>
    %cst_1 = arith.constant 2.560000e+02 : f32
    %10 = vector.broadcast %cst_1 : f32 to vector<1x128xf32>
    %11 = arith.mulf %9, %10 : vector<1x128xf32>
    %12 = arith.subf %4, %11 : vector<1x128xf32>
    %cst_2 = arith.constant 5.000000e-01 : f32
    %13 = vector.broadcast %cst_2 : f32 to vector<1x128xf32>
    %14 = arith.addf %12, %13 : vector<1x128xf32>
    %cst_3 = arith.constant 1.600000e+01 : f32
    %15 = vector.broadcast %cst_3 : f32 to vector<1x128xf32>
    %16 = arith.divf %14, %15 : vector<1x128xf32>
    %17 = math.floor %16 : vector<1x128xf32>
    %cst_4 = arith.constant 1.600000e+01 : f32
    %18 = vector.broadcast %cst_4 : f32 to vector<1x128xf32>
    %19 = arith.mulf %17, %18 : vector<1x128xf32>
    %20 = arith.subf %12, %19 : vector<1x128xf32>
    %cst_5 = arith.constant 0.0666666701 : f32
    %21 = vector.broadcast %cst_5 : f32 to vector<1x128xf32>
    %22 = arith.mulf %17, %21 : vector<1x128xf32>
    %cst_6 = arith.constant 0.0666666701 : f32
    %23 = vector.broadcast %cst_6 : f32 to vector<1x128xf32>
    %24 = arith.mulf %20, %23 : vector<1x128xf32>
    %c0 = arith.constant 0 : index
    %c0_7 = arith.constant 0 : index
    %25 = vector.load %arg2[%c0, %c0_7] : memref<16x4xf32, #tpu.memory_space<vmem>>, vector<16x4xf32>
    %c0_8 = arith.constant 0 : index
    %c0_9 = arith.constant 0 : index
    %26 = vector.load %arg1[%c0_8, %c0_9] : memref<4x128xf32, #tpu.memory_space<vmem>>, vector<4x128xf32>
    %cst_10 = arith.constant dense<0.000000e+00> : vector<16x128xf32>
    %27 = tpu.matmul %25, %26, %cst_10 {dimension_numbers = #tpu.dot_dimension_numbers<[1], [0], [0], [1], [0, 0, 1, 1], [], []>} : vector<16x4xf32>, vector<4x128xf32>, vector<16x128xf32> -> vector<16x128xf32>
    %c0_11 = arith.constant 0 : index
    %c0_12 = arith.constant 0 : index
    %28 = vector.load %arg3[%c0_11, %c0_12] : memref<16x2xf32, #tpu.memory_space<vmem>>, vector<16x1xf32>
    %29 = vector.broadcast %28 : vector<16x1xf32> to vector<16x128xf32>
    %30 = vector.broadcast %22 : vector<1x128xf32> to vector<16x128xf32>
    %31 = arith.mulf %29, %30 : vector<16x128xf32>
    %32 = arith.addf %27, %31 : vector<16x128xf32>
    %c0_13 = arith.constant 0 : index
    %c1 = arith.constant 1 : index
    %33 = vector.load %arg3[%c0_13, %c1] : memref<16x2xf32, #tpu.memory_space<vmem>>, vector<16x1xf32>
    %34 = vector.broadcast %33 : vector<16x1xf32> to vector<16x128xf32>
    %35 = vector.broadcast %24 : vector<1x128xf32> to vector<16x128xf32>
    %36 = arith.mulf %34, %35 : vector<16x128xf32>
    %37 = arith.addf %32, %36 : vector<16x128xf32>
    %c0_14 = arith.constant 0 : index
    %c0_15 = arith.constant 0 : index
    %38 = vector.load %arg4[%c0_14, %c0_15] : memref<16x1xf32, #tpu.memory_space<vmem>>, vector<16x1xf32>
    %39 = vector.broadcast %38 : vector<16x1xf32> to vector<16x128xf32>
    %40 = arith.addf %37, %39 : vector<16x128xf32>
    %c0_16 = arith.constant 0 : index
    %c0_17 = arith.constant 0 : index
    %41 = vector.load %arg5[%c0_16, %c0_17] : memref<16x128xf32, #tpu.memory_space<vmem>>, vector<16x128xf32>
    tpu.vector_store %arg5[%c0_16, %c0_17], %40 {strides = array<i32>} : memref<16x128xf32, #tpu.memory_space<vmem>>, vector<16x128xf32>,
    return
  }
  func.func @transform_0(%arg0: i32) -> (i32, i32) {
    %c0_i32 = arith.constant 0 : i32
    %c0_i32_0 = arith.constant 0 : i32
    return %c0_i32, %arg0 : i32, i32
  }
  func.func @transform_1(%arg0: i32) -> (i32, i32) {
    %c0_i32 = arith.constant 0 : i32
    %c0_i32_0 = arith.constant 0 : i32
    %c0_i32_1 = arith.constant 0 : i32
    return %c0_i32, %c0_i32_0 : i32, i32
  }
  func.func @transform_2(%arg0: i32) -> (i32, i32) {
    %c0_i32 = arith.constant 0 : i32
    %c0_i32_0 = arith.constant 0 : i32
    %c0_i32_1 = arith.constant 0 : i32
    return %c0_i32, %c0_i32_0 : i32, i32
  }
  func.func @transform_3(%arg0: i32) -> (i32, i32) {
    %c0_i32 = arith.constant 0 : i32
    %c0_i32_0 = arith.constant 0 : i32
    %c0_i32_1 = arith.constant 0 : i32
    return %c0_i32, %c0_i32_0 : i32, i32
  }
  func.func @transform_4(%arg0: i32) -> (i32, i32) {
    %c0_i32 = arith.constant 0 : i32
    %c0_i32_0 = arith.constant 0 : i32
    return %c0_i32, %arg0 : i32, i32
  }
}

module attributes {stable_mosaic.version = 11 : i64} {
  func.func @_spectral_kernel(%arg0: i32, %arg1: memref<1x2x256xf32, #tpu.memory_space<vmem>>, %arg2: memref<1x2x256xf32, #tpu.memory_space<vmem>>, %arg3: memref<1x256x256xf32, #tpu.memory_space<vmem>>, %arg4: memref<1x256x256xf32, #tpu.memory_space<vmem>>, %arg5: memref<1x2x256xf32, #tpu.memory_space<vmem>>, %arg6: memref<1x2x256xf32, #tpu.memory_space<vmem>>) attributes {dimension_semantics = [#tpu.dimension_semantics<parallel>], iteration_bounds = array<i64: 2>, scalar_prefetch = 0 : i64, scratch_operands = 0 : i64, tpu.core_type = #tpu.core_type<tc>, window_params = [{transform_indices = @transform_0, window_bounds = array<i64: 1, 2, 256>}, {transform_indices = @transform_1, window_bounds = array<i64: 1, 2, 256>}, {transform_indices = @transform_2, window_bounds = array<i64: 1, 256, 256>}, {transform_indices = @transform_3, window_bounds = array<i64: 1, 256, 256>}, {transform_indices = @transform_4, window_bounds = array<i64: 1, 2, 256>}, {transform_indices = @transform_5, window_bounds = array<i64: 1, 2, 256>}]} {
    %c0 = arith.constant 0 : index
    %c0_0 = arith.constant 0 : index
    %c0_1 = arith.constant 0 : index
    %0 = vector.load %arg1[%c0, %c0_0, %c0_1] : memref<1x2x256xf32, #tpu.memory_space<vmem>>, vector<1x2x256xf32>
    %1 = vector.shape_cast %0 : vector<1x2x256xf32> to vector<2x256xf32>
    %c0_2 = arith.constant 0 : index
    %c0_3 = arith.constant 0 : index
    %c0_4 = arith.constant 0 : index
    %2 = vector.load %arg2[%c0_2, %c0_3, %c0_4] : memref<1x2x256xf32, #tpu.memory_space<vmem>>, vector<1x2x256xf32>
    %3 = vector.shape_cast %2 : vector<1x2x256xf32> to vector<2x256xf32>
    %c0_5 = arith.constant 0 : index
    %c0_6 = arith.constant 0 : index
    %c0_7 = arith.constant 0 : index
    %4 = vector.load %arg3[%c0_5, %c0_6, %c0_7] : memref<1x256x256xf32, #tpu.memory_space<vmem>>, vector<1x256x256xf32>
    %5 = vector.shape_cast %4 : vector<1x256x256xf32> to vector<256x256xf32>
    %c0_8 = arith.constant 0 : index
    %c0_9 = arith.constant 0 : index
    %c0_10 = arith.constant 0 : index
    %6 = vector.load %arg4[%c0_8, %c0_9, %c0_10] : memref<1x256x256xf32, #tpu.memory_space<vmem>>, vector<1x256x256xf32>
    %7 = vector.shape_cast %6 : vector<1x256x256xf32> to vector<256x256xf32>
    %cst = arith.constant dense<0.000000e+00> : vector<2x256xf32>
    %8 = tpu.matmul %1, %5, %cst {dimension_numbers = #tpu.dot_dimension_numbers<[1], [0], [0], [1], [0, 0, 1, 1], [], []>} : vector<2x256xf32>, vector<256x256xf32>, vector<2x256xf32> -> vector<2x256xf32>
    %cst_11 = arith.constant dense<0.000000e+00> : vector<2x256xf32>
    %9 = tpu.matmul %3, %7, %cst_11 {dimension_numbers = #tpu.dot_dimension_numbers<[1], [0], [0], [1], [0, 0, 1, 1], [], []>} : vector<2x256xf32>, vector<256x256xf32>, vector<2x256xf32> -> vector<2x256xf32>
    %cst_12 = arith.constant dense<0.000000e+00> : vector<2x256xf32>
    %10 = tpu.matmul %1, %7, %cst_12 {dimension_numbers = #tpu.dot_dimension_numbers<[1], [0], [0], [1], [0, 0, 1, 1], [], []>} : vector<2x256xf32>, vector<256x256xf32>, vector<2x256xf32> -> vector<2x256xf32>
    %cst_13 = arith.constant dense<0.000000e+00> : vector<2x256xf32>
    %11 = tpu.matmul %3, %5, %cst_13 {dimension_numbers = #tpu.dot_dimension_numbers<[1], [0], [0], [1], [0, 0, 1, 1], [], []>} : vector<2x256xf32>, vector<256x256xf32>, vector<2x256xf32> -> vector<2x256xf32>
    %12 = arith.subf %8, %9 : vector<2x256xf32>
    %c0_14 = arith.constant 0 : index
    %c0_15 = arith.constant 0 : index
    %c0_16 = arith.constant 0 : index
    %13 = vector.load %arg5[%c0_14, %c0_15, %c0_16] : memref<1x2x256xf32, #tpu.memory_space<vmem>>, vector<1x2x256xf32>
    %14 = vector.shape_cast %13 : vector<1x2x256xf32> to vector<2x256xf32>
    %15 = vector.shape_cast %12 : vector<2x256xf32> to vector<1x2x256xf32>
    tpu.vector_store %arg5[%c0_14, %c0_15, %c0_16], %15 {strides = array<i32>} : memref<1x2x256xf32, #tpu.memory_space<vmem>>, vector<1x2x256xf32>,
    %16 = arith.addf %10, %11 : vector<2x256xf32>
    %c0_17 = arith.constant 0 : index
    %c0_18 = arith.constant 0 : index
    %c0_19 = arith.constant 0 : index
    %17 = vector.load %arg6[%c0_17, %c0_18, %c0_19] : memref<1x2x256xf32, #tpu.memory_space<vmem>>, vector<1x2x256xf32>
    %18 = vector.shape_cast %17 : vector<1x2x256xf32> to vector<2x256xf32>
    %19 = vector.shape_cast %16 : vector<2x256xf32> to vector<1x2x256xf32>
    tpu.vector_store %arg6[%c0_17, %c0_18, %c0_19], %19 {strides = array<i32>} : memref<1x2x256xf32, #tpu.memory_space<vmem>>, vector<1x2x256xf32>,
    return
  }
  func.func @transform_0(%arg0: i32) -> (i32, i32, i32) {
    %c0_i32 = arith.constant 0 : i32
    %c0_i32_0 = arith.constant 0 : i32
    %c0_i32_1 = arith.constant 0 : i32
    return %arg0, %c0_i32, %c0_i32_0 : i32, i32, i32
  }
  func.func @transform_1(%arg0: i32) -> (i32, i32, i32) {
    %c0_i32 = arith.constant 0 : i32
    %c0_i32_0 = arith.constant 0 : i32
    %c0_i32_1 = arith.constant 0 : i32
    return %arg0, %c0_i32, %c0_i32_0 : i32, i32, i32
  }
  func.func @transform_2(%arg0: i32) -> (i32, i32, i32) {
    %c0_i32 = arith.constant 0 : i32
    %c0_i32_0 = arith.constant 0 : i32
    %c0_i32_1 = arith.constant 0 : i32
    return %arg0, %c0_i32, %c0_i32_0 : i32, i32, i32
  }
  func.func @transform_3(%arg0: i32) -> (i32, i32, i32) {
    %c0_i32 = arith.constant 0 : i32
    %c0_i32_0 = arith.constant 0 : i32
    %c0_i32_1 = arith.constant 0 : i32
    return %arg0, %c0_i32, %c0_i32_0 : i32, i32, i32
  }
  func.func @transform_4(%arg0: i32) -> (i32, i32, i32) {
    %c0_i32 = arith.constant 0 : i32
    %c0_i32_0 = arith.constant 0 : i32
    %c0_i32_1 = arith.constant 0 : i32
    return %arg0, %c0_i32, %c0_i32_0 : i32, i32, i32
  }
  func.func @transform_5(%arg0: i32) -> (i32, i32, i32) {
    %c0_i32 = arith.constant 0 : i32
    %c0_i32_0 = arith.constant 0 : i32
    %c0_i32_1 = arith.constant 0 : i32
    return %arg0, %c0_i32, %c0_i32_0 : i32, i32, i32
  }
}

module attributes {stable_mosaic.version = 11 : i64} {
  func.func @_combine_kernel(%arg0: i32, %arg1: memref<16x128xf32, #tpu.memory_space<vmem>>, %arg2: memref<16x128xf32, #tpu.memory_space<vmem>>, %arg3: memref<16x16xf32, #tpu.memory_space<vmem>>, %arg4: memref<16x1xf32, #tpu.memory_space<vmem>>, %arg5: memref<16x128xf32, #tpu.memory_space<vmem>>) attributes {dimension_semantics = [#tpu.dimension_semantics<parallel>], iteration_bounds = array<i64: 4>, scalar_prefetch = 0 : i64, scratch_operands = 0 : i64, tpu.core_type = #tpu.core_type<tc>, window_params = [{transform_indices = @transform_0, window_bounds = array<i64: 16, 128>}, {transform_indices = @transform_1, window_bounds = array<i64: 16, 128>}, {pipeline_mode = #tpu.pipeline_mode<synchronous>, transform_indices = @transform_2, window_bounds = array<i64: 16, 16>}, {pipeline_mode = #tpu.pipeline_mode<synchronous>, transform_indices = @transform_3, window_bounds = array<i64: 16, 1>}, {transform_indices = @transform_4, window_bounds = array<i64: 16, 128>}]} {
    %c0 = arith.constant 0 : index
    %c0_0 = arith.constant 0 : index
    %0 = vector.load %arg3[%c0, %c0_0] : memref<16x16xf32, #tpu.memory_space<vmem>>, vector<16x16xf32>
    %c0_1 = arith.constant 0 : index
    %c0_2 = arith.constant 0 : index
    %1 = vector.load %arg2[%c0_1, %c0_2] : memref<16x128xf32, #tpu.memory_space<vmem>>, vector<16x128xf32>
    %cst = arith.constant dense<0.000000e+00> : vector<16x128xf32>
    %2 = tpu.matmul %0, %1, %cst {dimension_numbers = #tpu.dot_dimension_numbers<[1], [0], [0], [1], [0, 0, 1, 1], [], []>} : vector<16x16xf32>, vector<16x128xf32>, vector<16x128xf32> -> vector<16x128xf32>
    %c0_3 = arith.constant 0 : index
    %c0_4 = arith.constant 0 : index
    %3 = vector.load %arg1[%c0_3, %c0_4] : memref<16x128xf32, #tpu.memory_space<vmem>>, vector<16x128xf32>
    %4 = arith.addf %3, %2 : vector<16x128xf32>
    %c0_5 = arith.constant 0 : index
    %c0_6 = arith.constant 0 : index
    %5 = vector.load %arg4[%c0_5, %c0_6] : memref<16x1xf32, #tpu.memory_space<vmem>>, vector<16x1xf32>
    %6 = vector.broadcast %5 : vector<16x1xf32> to vector<16x128xf32>
    %7 = arith.addf %4, %6 : vector<16x128xf32>
    %cst_7 = arith.constant 5.000000e-01 : f32
    %8 = vector.broadcast %cst_7 : f32 to vector<16x128xf32>
    %9 = arith.mulf %8, %7 : vector<16x128xf32>
    %cst_8 = arith.constant 0.707106769 : f32
    %10 = vector.broadcast %cst_8 : f32 to vector<16x128xf32>
    %11 = arith.mulf %7, %10 : vector<16x128xf32>
    %cst_9 = arith.constant -4.000000e+00 : f32
    %cst_10 = arith.constant 4.000000e+00 : f32
    %12 = vector.broadcast %cst_9 : f32 to vector<16x128xf32>
    %13 = arith.maximumf %12, %11 : vector<16x128xf32>
    %14 = vector.broadcast %cst_10 : f32 to vector<16x128xf32>
    %15 = arith.minimumf %14, %13 : vector<16x128xf32>
    %16 = arith.mulf %15, %15 : vector<16x128xf32>
    %cst_11 = arith.constant 2.29050653E-4 : f32
    %17 = vector.broadcast %cst_11 : f32 to vector<16x128xf32>
    %18 = arith.mulf %17, %16 : vector<16x128xf32>
    %cst_12 = arith.constant 0.00340829091 : f32
    %19 = vector.broadcast %cst_12 : f32 to vector<16x128xf32>
    %20 = arith.addf %18, %19 : vector<16x128xf32>
    %21 = arith.mulf %20, %16 : vector<16x128xf32>
    %cst_13 = arith.constant 0.0509556942 : f32
    %22 = vector.broadcast %cst_13 : f32 to vector<16x128xf32>
    %23 = arith.addf %21, %22 : vector<16x128xf32>
    %24 = arith.mulf %23, %16 : vector<16x128xf32>
    %cst_14 = arith.constant 0.185208321 : f32
    %25 = vector.broadcast %cst_14 : f32 to vector<16x128xf32>
    %26 = arith.addf %24, %25 : vector<16x128xf32>
    %27 = arith.mulf %26, %16 : vector<16x128xf32>
    %cst_15 = arith.constant 1.12837911 : f32
    %28 = vector.broadcast %cst_15 : f32 to vector<16x128xf32>
    %29 = arith.addf %27, %28 : vector<16x128xf32>
    %cst_16 = arith.constant -1.17916031E-7 : f32
    %30 = vector.broadcast %cst_16 : f32 to vector<16x128xf32>
    %31 = arith.mulf %30, %16 : vector<16x128xf32>
    %cst_17 = arith.constant 2.35479656E-5 : f32
    %32 = vector.broadcast %cst_17 : f32 to vector<16x128xf32>
    %33 = arith.addf %31, %32 : vector<16x128xf32>
    %34 = arith.mulf %33, %16 : vector<16x128xf32>
    %cst_18 = arith.constant 0.00101796258 : f32
    %35 = vector.broadcast %cst_18 : f32 to vector<16x128xf32>
    %36 = arith.addf %34, %35 : vector<16x128xf32>
    %37 = arith.mulf %36, %16 : vector<16x128xf32>
    %cst_19 = arith.constant 0.0140704699 : f32
    %38 = vector.broadcast %cst_19 : f32 to vector<16x128xf32>
    %39 = arith.addf %37, %38 : vector<16x128xf32>
    %40 = arith.mulf %39, %16 : vector<16x128xf32>
    %cst_20 = arith.constant 0.110985048 : f32
    %41 = vector.broadcast %cst_20 : f32 to vector<16x128xf32>
    %42 = arith.addf %40, %41 : vector<16x128xf32>
    %43 = arith.mulf %42, %16 : vector<16x128xf32>
    %cst_21 = arith.constant 0.497469246 : f32
    %44 = vector.broadcast %cst_21 : f32 to vector<16x128xf32>
    %45 = arith.addf %43, %44 : vector<16x128xf32>
    %46 = arith.mulf %45, %16 : vector<16x128xf32>
    %cst_22 = arith.constant 1.000000e+00 : f32
    %47 = vector.broadcast %cst_22 : f32 to vector<16x128xf32>
    %48 = arith.addf %46, %47 : vector<16x128xf32>
    %49 = arith.mulf %15, %29 : vector<16x128xf32>
    %50 = arith.divf %49, %48 : vector<16x128xf32>
    %cst_23 = arith.constant 1.000000e+00 : f32
    %51 = vector.broadcast %cst_23 : f32 to vector<16x128xf32>
    %52 = arith.addf %51, %50 : vector<16x128xf32>
    %53 = arith.mulf %9, %52 : vector<16x128xf32>
    %c0_24 = arith.constant 0 : index
    %c0_25 = arith.constant 0 : index
    %54 = vector.load %arg5[%c0_24, %c0_25] : memref<16x128xf32, #tpu.memory_space<vmem>>, vector<16x128xf32>
    tpu.vector_store %arg5[%c0_24, %c0_25], %53 {strides = array<i32>} : memref<16x128xf32, #tpu.memory_space<vmem>>, vector<16x128xf32>,
    return
  }
  func.func @transform_0(%arg0: i32) -> (i32, i32) {
    %c0_i32 = arith.constant 0 : i32
    %c0_i32_0 = arith.constant 0 : i32
    return %c0_i32, %arg0 : i32, i32
  }
  func.func @transform_1(%arg0: i32) -> (i32, i32) {
    %c0_i32 = arith.constant 0 : i32
    %c0_i32_0 = arith.constant 0 : i32
    return %c0_i32, %arg0 : i32, i32
  }
  func.func @transform_2(%arg0: i32) -> (i32, i32) {
    %c0_i32 = arith.constant 0 : i32
    %c0_i32_0 = arith.constant 0 : i32
    %c0_i32_1 = arith.constant 0 : i32
    return %c0_i32, %c0_i32_0 : i32, i32
  }
  func.func @transform_3(%arg0: i32) -> (i32, i32) {
    %c0_i32 = arith.constant 0 : i32
    %c0_i32_0 = arith.constant 0 : i32
    %c0_i32_1 = arith.constant 0 : i32
    return %c0_i32, %c0_i32_0 : i32, i32
  }
  func.func @transform_4(%arg0: i32) -> (i32, i32) {
    %c0_i32 = arith.constant 0 : i32
    %c0_i32_0 = arith.constant 0 : i32
    return %c0_i32, %arg0 : i32, i32
  }
}

module attributes {stable_mosaic.version = 11 : i64} {
  func.func @_combine_proj_kernel(%arg0: i32, %arg1: memref<16x128xf32, #tpu.memory_space<vmem>>, %arg2: memref<16x128xf32, #tpu.memory_space<vmem>>, %arg3: memref<16x16xf32, #tpu.memory_space<vmem>>, %arg4: memref<16x1xf32, #tpu.memory_space<vmem>>, %arg5: memref<128x16xf32, #tpu.memory_space<vmem>>, %arg6: memref<128x1xf32, #tpu.memory_space<vmem>>, %arg7: memref<1x128xf32, #tpu.memory_space<vmem>>, %arg8: memref<1x1xf32, #tpu.memory_space<vmem>>, %arg9: memref<1x128xf32, #tpu.memory_space<vmem>>) attributes {dimension_semantics = [#tpu.dimension_semantics<parallel>], iteration_bounds = array<i64: 4>, scalar_prefetch = 0 : i64, scratch_operands = 0 : i64, tpu.core_type = #tpu.core_type<tc>, window_params = [{transform_indices = @transform_0, window_bounds = array<i64: 16, 128>}, {transform_indices = @transform_1, window_bounds = array<i64: 16, 128>}, {pipeline_mode = #tpu.pipeline_mode<synchronous>, transform_indices = @transform_2, window_bounds = array<i64: 16, 16>}, {pipeline_mode = #tpu.pipeline_mode<synchronous>, transform_indices = @transform_3, window_bounds = array<i64: 16, 1>}, {pipeline_mode = #tpu.pipeline_mode<synchronous>, transform_indices = @transform_4, window_bounds = array<i64: 128, 16>}, {pipeline_mode = #tpu.pipeline_mode<synchronous>, transform_indices = @transform_5, window_bounds = array<i64: 128, 1>}, {pipeline_mode = #tpu.pipeline_mode<synchronous>, transform_indices = @transform_6, window_bounds = array<i64: 1, 128>}, {pipeline_mode = #tpu.pipeline_mode<synchronous>, transform_indices = @transform_7, window_bounds = array<i64: 1, 1>}, {transform_indices = @transform_8, window_bounds = array<i64: 1, 128>}]} {
    %c0 = arith.constant 0 : index
    %c0_0 = arith.constant 0 : index
    %0 = vector.load %arg3[%c0, %c0_0] : memref<16x16xf32, #tpu.memory_space<vmem>>, vector<16x16xf32>
    %c0_1 = arith.constant 0 : index
    %c0_2 = arith.constant 0 : index
    %1 = vector.load %arg2[%c0_1, %c0_2] : memref<16x128xf32, #tpu.memory_space<vmem>>, vector<16x128xf32>
    %cst = arith.constant dense<0.000000e+00> : vector<16x128xf32>
    %2 = tpu.matmul %0, %1, %cst {dimension_numbers = #tpu.dot_dimension_numbers<[1], [0], [0], [1], [0, 0, 1, 1], [], []>} : vector<16x16xf32>, vector<16x128xf32>, vector<16x128xf32> -> vector<16x128xf32>
    %c0_3 = arith.constant 0 : index
    %c0_4 = arith.constant 0 : index
    %3 = vector.load %arg1[%c0_3, %c0_4] : memref<16x128xf32, #tpu.memory_space<vmem>>, vector<16x128xf32>
    %4 = arith.addf %3, %2 : vector<16x128xf32>
    %c0_5 = arith.constant 0 : index
    %c0_6 = arith.constant 0 : index
    %5 = vector.load %arg4[%c0_5, %c0_6] : memref<16x1xf32, #tpu.memory_space<vmem>>, vector<16x1xf32>
    %6 = vector.broadcast %5 : vector<16x1xf32> to vector<16x128xf32>
    %7 = arith.addf %4, %6 : vector<16x128xf32>
    %c0_7 = arith.constant 0 : index
    %c0_8 = arith.constant 0 : index
    %8 = vector.load %arg5[%c0_7, %c0_8] : memref<128x16xf32, #tpu.memory_space<vmem>>, vector<128x16xf32>
    %cst_9 = arith.constant dense<0.000000e+00> : vector<128x128xf32>
    %9 = tpu.matmul %8, %7, %cst_9 {dimension_numbers = #tpu.dot_dimension_numbers<[1], [0], [0], [1], [0, 0, 1, 1], [], []>} : vector<128x16xf32>, vector<16x128xf32>, vector<128x128xf32> -> vector<128x128xf32>
    %c0_10 = arith.constant 0 : index
    %c0_11 = arith.constant 0 : index
    %10 = vector.load %arg6[%c0_10, %c0_11] : memref<128x1xf32, #tpu.memory_space<vmem>>, vector<128x1xf32>
    %11 = vector.broadcast %10 : vector<128x1xf32> to vector<128x128xf32>
    %12 = arith.addf %9, %11 : vector<128x128xf32>
    %cst_12 = arith.constant 5.000000e-01 : f32
    %13 = vector.broadcast %cst_12 : f32 to vector<128x128xf32>
    %14 = arith.mulf %13, %12 : vector<128x128xf32>
    %cst_13 = arith.constant 0.707106769 : f32
    %15 = vector.broadcast %cst_13 : f32 to vector<128x128xf32>
    %16 = arith.mulf %12, %15 : vector<128x128xf32>
    %cst_14 = arith.constant -4.000000e+00 : f32
    %cst_15 = arith.constant 4.000000e+00 : f32
    %17 = vector.broadcast %cst_14 : f32 to vector<128x128xf32>
    %18 = arith.maximumf %17, %16 : vector<128x128xf32>
    %19 = vector.broadcast %cst_15 : f32 to vector<128x128xf32>
    %20 = arith.minimumf %19, %18 : vector<128x128xf32>
    %21 = arith.mulf %20, %20 : vector<128x128xf32>
    %cst_16 = arith.constant 2.29050653E-4 : f32
    %22 = vector.broadcast %cst_16 : f32 to vector<128x128xf32>
    %23 = arith.mulf %22, %21 : vector<128x128xf32>
    %cst_17 = arith.constant 0.00340829091 : f32
    %24 = vector.broadcast %cst_17 : f32 to vector<128x128xf32>
    %25 = arith.addf %23, %24 : vector<128x128xf32>
    %26 = arith.mulf %25, %21 : vector<128x128xf32>
    %cst_18 = arith.constant 0.0509556942 : f32
    %27 = vector.broadcast %cst_18 : f32 to vector<128x128xf32>
    %28 = arith.addf %26, %27 : vector<128x128xf32>
    %29 = arith.mulf %28, %21 : vector<128x128xf32>
    %cst_19 = arith.constant 0.185208321 : f32
    %30 = vector.broadcast %cst_19 : f32 to vector<128x128xf32>
    %31 = arith.addf %29, %30 : vector<128x128xf32>
    %32 = arith.mulf %31, %21 : vector<128x128xf32>
    %cst_20 = arith.constant 1.12837911 : f32
    %33 = vector.broadcast %cst_20 : f32 to vector<128x128xf32>
    %34 = arith.addf %32, %33 : vector<128x128xf32>
    %cst_21 = arith.constant -1.17916031E-7 : f32
    %35 = vector.broadcast %cst_21 : f32 to vector<128x128xf32>
    %36 = arith.mulf %35, %21 : vector<128x128xf32>
    %cst_22 = arith.constant 2.35479656E-5 : f32
    %37 = vector.broadcast %cst_22 : f32 to vector<128x128xf32>
    %38 = arith.addf %36, %37 : vector<128x128xf32>
    %39 = arith.mulf %38, %21 : vector<128x128xf32>
    %cst_23 = arith.constant 0.00101796258 : f32
    %40 = vector.broadcast %cst_23 : f32 to vector<128x128xf32>
    %41 = arith.addf %39, %40 : vector<128x128xf32>
    %42 = arith.mulf %41, %21 : vector<128x128xf32>
    %cst_24 = arith.constant 0.0140704699 : f32
    %43 = vector.broadcast %cst_24 : f32 to vector<128x128xf32>
    %44 = arith.addf %42, %43 : vector<128x128xf32>
    %45 = arith.mulf %44, %21 : vector<128x128xf32>
    %cst_25 = arith.constant 0.110985048 : f32
    %46 = vector.broadcast %cst_25 : f32 to vector<128x128xf32>
    %47 = arith.addf %45, %46 : vector<128x128xf32>
    %48 = arith.mulf %47, %21 : vector<128x128xf32>
    %cst_26 = arith.constant 0.497469246 : f32
    %49 = vector.broadcast %cst_26 : f32 to vector<128x128xf32>
    %50 = arith.addf %48, %49 : vector<128x128xf32>
    %51 = arith.mulf %50, %21 : vector<128x128xf32>
    %cst_27 = arith.constant 1.000000e+00 : f32
    %52 = vector.broadcast %cst_27 : f32 to vector<128x128xf32>
    %53 = arith.addf %51, %52 : vector<128x128xf32>
    %54 = arith.mulf %20, %34 : vector<128x128xf32>
    %55 = arith.divf %54, %53 : vector<128x128xf32>
    %cst_28 = arith.constant 1.000000e+00 : f32
    %56 = vector.broadcast %cst_28 : f32 to vector<128x128xf32>
    %57 = arith.addf %56, %55 : vector<128x128xf32>
    %58 = arith.mulf %14, %57 : vector<128x128xf32>
    %c0_29 = arith.constant 0 : index
    %c0_30 = arith.constant 0 : index
    %59 = vector.load %arg7[%c0_29, %c0_30] : memref<1x128xf32, #tpu.memory_space<vmem>>, vector<1x128xf32>
    %cst_31 = arith.constant dense<0.000000e+00> : vector<1x128xf32>
    %60 = tpu.matmul %59, %58, %cst_31 {dimension_numbers = #tpu.dot_dimension_numbers<[1], [0], [0], [1], [0, 0, 1, 1], [], []>} : vector<1x128xf32>, vector<128x128xf32>, vector<1x128xf32> -> vector<1x128xf32>
    %c0_32 = arith.constant 0 : index
    %c0_33 = arith.constant 0 : index
    %61 = vector.load %arg8[%c0_32, %c0_33] : memref<1x1xf32, #tpu.memory_space<vmem>>, vector<1x1xf32>
    %62 = vector.broadcast %61 : vector<1x1xf32> to vector<1x128xf32>
    %63 = arith.addf %60, %62 : vector<1x128xf32>
    %c0_34 = arith.constant 0 : index
    %c0_35 = arith.constant 0 : index
    %64 = vector.load %arg9[%c0_34, %c0_35] : memref<1x128xf32, #tpu.memory_space<vmem>>, vector<1x128xf32>
    tpu.vector_store %arg9[%c0_34, %c0_35], %63 {strides = array<i32>} : memref<1x128xf32, #tpu.memory_space<vmem>>, vector<1x128xf32>,
    return
  }
  func.func @transform_0(%arg0: i32) -> (i32, i32) {
    %c0_i32 = arith.constant 0 : i32
    %c0_i32_0 = arith.constant 0 : i32
    return %c0_i32, %arg0 : i32, i32
  }
  func.func @transform_1(%arg0: i32) -> (i32, i32) {
    %c0_i32 = arith.constant 0 : i32
    %c0_i32_0 = arith.constant 0 : i32
    return %c0_i32, %arg0 : i32, i32
  }
  func.func @transform_2(%arg0: i32) -> (i32, i32) {
    %c0_i32 = arith.constant 0 : i32
    %c0_i32_0 = arith.constant 0 : i32
    %c0_i32_1 = arith.constant 0 : i32
    return %c0_i32, %c0_i32_0 : i32, i32
  }
  func.func @transform_3(%arg0: i32) -> (i32, i32) {
    %c0_i32 = arith.constant 0 : i32
    %c0_i32_0 = arith.constant 0 : i32
    %c0_i32_1 = arith.constant 0 : i32
    return %c0_i32, %c0_i32_0 : i32, i32
  }
  func.func @transform_4(%arg0: i32) -> (i32, i32) {
    %c0_i32 = arith.constant 0 : i32
    %c0_i32_0 = arith.constant 0 : i32
    %c0_i32_1 = arith.constant 0 : i32
    return %c0_i32, %c0_i32_0 : i32, i32
  }
  func.func @transform_5(%arg0: i32) -> (i32, i32) {
    %c0_i32 = arith.constant 0 : i32
    %c0_i32_0 = arith.constant 0 : i32
    %c0_i32_1 = arith.constant 0 : i32
    return %c0_i32, %c0_i32_0 : i32, i32
  }
  func.func @transform_6(%arg0: i32) -> (i32, i32) {
    %c0_i32 = arith.constant 0 : i32
    %c0_i32_0 = arith.constant 0 : i32
    %c0_i32_1 = arith.constant 0 : i32
    return %c0_i32, %c0_i32_0 : i32, i32
  }
  func.func @transform_7(%arg0: i32) -> (i32, i32) {
    %c0_i32 = arith.constant 0 : i32
    %c0_i32_0 = arith.constant 0 : i32
    %c0_i32_1 = arith.constant 0 : i32
    return %c0_i32, %c0_i32_0 : i32, i32
  }
  func.func @transform_8(%arg0: i32) -> (i32, i32) {
    %c0_i32 = arith.constant 0 : i32
    %c0_i32_0 = arith.constant 0 : i32
    return %c0_i32, %arg0 : i32, i32
  }
}

</mosaic_0001>

<bundles_post_ra>
// kernel: fno2d_forward.9
= control target key start
LH: loop header
LB: loop body
LE: loop exit
PB: predicated region body
PF: predicated region fallthrough
CT: control target
= control target key end

     0   :  { %s539_s15 = smov 0   ;;  %s541_s16 = smov 0   ;;  %s611_s0 = inlined_call_operand.vmem [shape: f32[4,512], index: 0, kind: input, shape index: {}]   ;;  %s612_s1 = inlined_call_operand.vmem [shape: f32[16,4], index: 1, kind: input, shape index: {}]   ;;  %s613_s2 = inlined_call_operand.vmem [shape: f32[16,2], index: 2, kind: input, shape index: {}]   ;;  %s614_s3 = inlined_call_operand.vmem [shape: f32[16,1], index: 3, kind: input, shape index: {}]   ;;  %s615_s4 = inlined_call_operand.vmem [shape: f32[16,512], index: 4, kind: output, shape index: {}]  }
   0x1   :  { %s543_s17 = smov 0  }
   0x2 LB: > { %s552_s18 = sadd.s32 4294967295, %s510_s17   ;;  %s554_s19 = sadd.s32 1, %s510_s17   ;;  %s510_s17 = sphi %s543_s17, %s619_s17   ;;  %s506_s16 = sphi %s541_s16, %s618_s16   ;;  %s502_s15 = sphi %s539_s15, %s617_s15  }
   0x3   : > { %s107_s20 = ssub.s32 %s510_s17, %s554_s19  ;;  %s110_s21 = sadd.s32 1, %s506_s16 }
   0x4   : > { %p108_p0 = scmp.eq.s32.totalorder %s107_s20, 0  ;;  %p120_p1 = scmp.ne.s32.totalorder %s506_s16, %s502_s15 }
   0x5   : > { %p121_p2 = scmp.eq.s32.totalorder %s552_s18, 3  ;;  %p440_p3 = scmp.ge.s32.totalorder %s510_s17, 1 }
   0x6   : > { %s562_s22 = scalar_select %p108_p0, %s506_s16, %s110_s21  }
   0x7   : > { %p564_p4 = por %p121_p2, %p120_p1  ;;  %p161_p5 = scmp.lt.s32.totalorder %s510_s17, 5 }
   0x9   : > { %p162_p6 = pnand %p440_p3, %p161_p5 }
   0xa   : > { %p185_p7 = scmp.lt.s32.totalorder (!%p162_p6), %s552_s18, 3  ;;  %s443_s17 = sshll.u32 (!%p162_p6), %s552_s18, 7 }
   0xb   : > { %165 = sbr.rel (%p162_p6) target bundleno = 233 (0xe9), region = 36  ;;  %s182_s20 = sand.u32 (!%p162_p6), 1, %s502_s15  }
   0xc   : > { %s441_s21 = sshll.u32 (!%p162_p6), %s182_s20, 4 }
   0xd   : > { %s184_s24 = scalar_lea.vmem (!%p162_p6), [#allocation2], %s441_s21 }
  0x10   : > { %v209_v0 = vld [vmem:[%s612_s1] sm:$0xff]  ;;  %vm226_vm0 = vcmask 31744   ;;  %v512_v1 = vmov 0   ;;  %s186_s28 = scalar_select %p185_p7, %s552_s18, 3  ;;  %v513_v3 = vmov 1   ;;  %v213_v4 = vld [vmem:[%s613_s2 + $0x8] sm:$0xff]  ;;  %v190_v9 = vlaneseq }
  0x11   : > { %456 = vmatprep.mubr.msk.f32.mxu0 %vm226_vm0, %v209_v0  ;;  %485 = vset.pattern.permute.xlu0 %v512_v1  ;;  %v212_v2 = vld [vmem:[%s613_s2] sm:$0xff]  ;;  %vm233_vm1 = vcmask 1043456   ;;  %v210_v6 = vld [vmem:[%s612_s1 + $0x8] sm:$0xff]  ;;  %v192_v11 = vstv %s443_s17  ;;  %s448_s15 = sshll.u32 (%p564_p4), %s552_s18, 3 }
  0x12   : > { %216 = vperm.xlu0 %485, %v212_v2   ;;  %486 = vset.pattern.permute.xlu1 %v513_v3  ;;  %s442_s5 = sshll.u32 %s186_s28, 2  ;;  %v324_v7 = vld [vmem:[%s614_s3] sm:$0xff]  ;;  %v325_v8 = vld [vmem:[%s614_s3 + $0x8] sm:$0xff]  ;;  %v191_v10 = vand.u32 127, %v190_v9  ;;  %s348_s27 = scalar_lea.vmem (%p564_p4), %s615_s4, %s448_s15 }
  0x13   : > { %313 = vperm.xlu1 %486, %v212_v2   ;;  %s188_s8 = scalar_lea.vmem %s611_s0, %s442_s5 }
  0x14   : > { %v211_v5 = vld [vmem:[%s188_s8] sm:$0xf]  ;;  %v193_v12 = vadd.s32 %v192_v11, %v191_v10 }
  0x15   : > { %454 = vmatprep.subr.msk.mxu0 %vm233_vm1, %v211_v5 }
  0x16   : > { %221 = vperm.xlu0 %485, %v213_v4   ;;  %455 = vmatpush3.msk.msra.mxu0 %vm233_vm1, %v211_v5  ;;  %v194_v13 = vcvt.s32.f32 %v193_v12 }
  0x17   : > { %317 = vperm.xlu1 %486, %v213_v4   ;;  %457 = vmatmul.mubr.msk.f32.vlgmr.msra.gmra.mxu0 %vm226_vm0, %v210_v6 }
  0x18   : > { %v195_v14 = vadd.f32 0.5, %v194_v13 }
  0x1a   : > { %328 = vperm.xlu0 %485, %v324_v7   ;;  %v197_v15 = vmul.f32 0.00390625, %v195_v14 }
  0x1b   : > { %487 = vset.pattern.permute.xlu1 %v512_v1 }
  0x1c   : > { %333 = vperm.xlu1 %487, %v325_v8   ;;  %v198_v16 = vfloor.f32 %v197_v15 }
  0x1e   : > { %v199_v17 = vmul.f32 256.0, %v198_v16 }
  0x20   : > { %v200_v18 = vsub.f32 %v194_v13, %v199_v17 }
  0x22   : > { %v201_v19 = vadd.f32 0.5, %v200_v18 }
  0x24   : > { %v203_v20 = vmul.f32 0.0625, %v201_v19 }
  0x26   : > { %v204_v21 = vfloor.f32 %v203_v20 }
  0x28   : > { %v205_v22 = vmul.f32 16.0, %v204_v21  ;;  %v207_v26 = vmul.f32 0.06666667, %v204_v21 }
  0x2a   : > { %v206_v25 = vsub.f32 %v200_v18, %v205_v22 }
  0x2c   : > { %v208_v27 = vmul.f32 0.06666667, %v206_v25 }
  0x8d   : > { %v217_v23 = vpop.permute.xlu0 %216 }
  0x8e   : > { %v314_v24 = vpop.permute.xlu1 %313  ;;  %v224_v32 = vmul.f32 %v217_v23, %v207_v26 }
  0x8f   : > { %v320_v37 = vmul.f32 %v314_v24, %v208_v27 }
  0x91   : > { %v222_v28 = vpop.permute.xlu0 %221 }
  0x92   : > { %v318_v29 = vpop.permute.xlu1 %317  ;;  %v225_v30 = vmul.f32 %v222_v28, %v207_v26 }
  0x93   : > { %v321_v33 = vmul.f32 %v318_v29, %v208_v27 }
  0x95   : > { %v329_v42 = vpop.permute.xlu0 %328 }
  0x97   : > { %v334_v36 = vpop.permute.xlu1 %333 }
  0xd7   : > { %v458_v31 = vpop.f32.mrf.mxu0 }
  0xd8   : > { %v309_v34 = vadd.f32 %v458_v31, %v225_v30 }
  0xd9   : > { %v303_v35 = vpop.f32.mrf.mxu0 }
  0xda   : > { %v304_v38 = vadd.f32 %v303_v35, %v224_v32  ;;  %v323_v39 = vadd.f32 %v321_v33, %v309_v34 }
  0xdc   : > { %v322_v40 = vadd.f32 %v320_v37, %v304_v38  ;;  %v337_v41 = vadd.f32 %v334_v36, %v323_v39  ;;  %346 = sbr.rel (!%p564_p4) target bundleno = 233 (0xe9), region = 40 }
  0xde   : > { %v336_v43 = vadd.f32 %v329_v42, %v322_v40  ;;  %339 = vst [vmem:[%s184_s24 + $0x8] sm:$0xff] %v337_v41 }
  0xe0   : > { %338 = vst [vmem:[%s184_s24] sm:$0xff] %v336_v43 }
  0xe5   : > { %v381_v45 = vld [vmem:[%s184_s24 + $0x8] sm:$0xff] }
  0xe6   : > { %382 = vst [vmem:[%s348_s27 + $0x20] sm:$0xff] %v381_v45 }
  0xe7   : > { %v379_v44 = vld [vmem:[%s184_s24] sm:$0xff] }
  0xe8   : > { %380 = vst [vmem:[%s348_s27] sm:$0xff] %v379_v44 }
  0xe9 PF: > { %p11_p8 = scmp.ge.s32.totalorder %s554_s19, 6   ;;  %s617_s15 = smov %s506_s16 }
  0xea   : > { %s618_s16 = smov %s562_s22  ;;  %s619_s17 = smov %s554_s19 }
  0xeb   :  { %13 = sbr.rel (!%p11_p8) target bundleno = 2 (0x2), region = 104 }

// kernel: fno2d_forward.10
= control target key start
LH: loop header
LB: loop body
LE: loop exit
PB: predicated region body
PF: predicated region fallthrough
CT: control target
= control target key end

     0   :  { %s959_s18 = smov 0   ;;  %s1662_s0 = inlined_call_operand.vmem [shape: f32[2,2,256], index: 0, kind: input, shape index: {}]   ;;  %s1663_s1 = inlined_call_operand.vmem [shape: f32[2,2,256], index: 1, kind: input, shape index: {}]   ;;  %s1664_s2 = inlined_call_operand.vmem [shape: f32[2,256,256], index: 2, kind: input, shape index: {}]   ;;  %s1665_s3 = inlined_call_operand.vmem [shape: f32[2,256,256], index: 3, kind: input, shape index: {}]   ;;  %s1666_s4 = inlined_call_operand.vmem [shape: f32[2,2,256], index: 4, kind: output, shape index: {0}]   ;;  %s1667_s5 = inlined_call_operand.vmem [shape: f32[2,2,256], index: 5, kind: output, shape index: {1}]  }
   0x1 LB: > { %s884_s19 = sadd.s32 4294967295, %s927_s18   ;;  %p888_p0 = scmp.ge.s32.totalorder %s927_s18, 1  ;;  %s927_s18 = sphi %s959_s18, %s16_s18  }
   0x2   : > { %p220_p1 = scmp.lt.s32.totalorder %s927_s18, 3 }
   0x4   : > { %p221_p2 = pnand %p888_p0, %p220_p1 }
   0x6   : > { %224 = sbr.rel (%p221_p2) target bundleno = 349 (0x15d), region = 36 }
   0xb   : > { %p268_p3 = scmp.lt.s32.totalorder %s884_s19, 1 }
   0xd   : > { %s1873_s19 = smov (!%p268_p3, %s884_s19), 1 }
   0xe   : > { %s909_s20 = sshll.u32 %s1873_s19, 9  ;;  %s1407_s27 = sshll.u32 %s1873_s19, 2 }
   0xf   : > { %s973_s23 = scalar_lea.vmem %s1664_s2, %s909_s20  ;;  %s978_s26 = scalar_lea.vmem %s1665_s3, %s909_s20 }
  0x10   : > { %v981_v0 = vld [vmem:[%s973_s23 + $0xf8] sm:$0xff]  ;;  %v987_v2 = vld [vmem:[%s973_s23 + $0xf0] sm:$0xff]  ;;  %v995_v4 = vld [vmem:[%s973_s23 + $0xe8] sm:$0xff]  ;;  %s272_s30 = scalar_lea.vmem %s1662_s0, %s1407_s27  ;;  %s277_s8 = scalar_lea.vmem %s1663_s1, %s1407_s27 }
  0x11   : > { %v984_v1 = vld [vmem:[%s978_s26 + $0xf8] sm:$0xff]  ;;  %439 = vmatprep.subr.mxu0 %v981_v0  ;;  %v992_v3 = vld [vmem:[%s978_s26 + $0xf0] sm:$0xff]  ;;  %v998_v5 = vld [vmem:[%s978_s26 + $0xe8] sm:$0xff]  ;;  %s292_s11 = scalar_lea.vmem %s1666_s4, %s1407_s27  ;;  %s297_s14 = scalar_lea.vmem %s1667_s5, %s1407_s27 }
  0x12   : > { %521 = vmatprep.subr.mxu1 %v984_v1  ;;  %440 = vmatpush1.msra.mxu0 %v987_v2  ;;  %v1003_v6 = vld [vmem:[%s973_s23 + $0xe0] sm:$0xff]  ;;  %v1009_v8 = vld [vmem:[%s973_s23 + $0xd8] sm:$0xff]  ;;  %v1017_v10 = vld [vmem:[%s973_s23 + $0xd0] sm:$0xff] }
  0x13   : > { %522 = vmatpush1.msra.mxu1 %v992_v3  ;;  %v1006_v7 = vld [vmem:[%s978_s26 + $0xe0] sm:$0xff]  ;;  %441 = vmatprep.subr.mxu0 %v995_v4  ;;  %v1014_v9 = vld [vmem:[%s978_s26 + $0xd8] sm:$0xff]  ;;  %v1020_v11 = vld [vmem:[%s978_s26 + $0xd0] sm:$0xff] }
  0x14   : > { %523 = vmatprep.subr.mxu1 %v998_v5  ;;  %442 = vmatpush1.msra.mxu0 %v1003_v6  ;;  %v1025_v12 = vld [vmem:[%s973_s23 + $0xc8] sm:$0xff]  ;;  %v1033_v14 = vld [vmem:[%s973_s23 + $0xc0] sm:$0xff]  ;;  %v1041_v16 = vld [vmem:[%s973_s23 + $0xb8] sm:$0xff] }
  0x15   : > { %524 = vmatpush1.msra.mxu1 %v1006_v7  ;;  %v1028_v13 = vld [vmem:[%s978_s26 + $0xc8] sm:$0xff]  ;;  %443 = vmatprep.subr.mxu0 %v1009_v8  ;;  %v1036_v15 = vld [vmem:[%s978_s26 + $0xc0] sm:$0xff]  ;;  %v1044_v17 = vld [vmem:[%s978_s26 + $0xb8] sm:$0xff] }
  0x16   : > { %525 = vmatprep.subr.mxu1 %v1014_v9  ;;  %444 = vmatpush1.msra.mxu0 %v1017_v10  ;;  %v1049_v18 = vld [vmem:[%s973_s23 + $0xb0] sm:$0xff]  ;;  %v1057_v20 = vld [vmem:[%s973_s23 + $0xa8] sm:$0xff]  ;;  %v1065_v22 = vld [vmem:[%s973_s23 + $0xa0] sm:$0xff] }
  0x17   : > { %526 = vmatpush1.msra.mxu1 %v1020_v11  ;;  %445 = vmatprep.subr.mxu0 %v1025_v12  ;;  %v1052_v19 = vld [vmem:[%s978_s26 + $0xb0] sm:$0xff]  ;;  %v1060_v21 = vld [vmem:[%s978_s26 + $0xa8] sm:$0xff]  ;;  %v1068_v23 = vld [vmem:[%s978_s26 + $0xa0] sm:$0xff] }
  0x18   : > { %527 = vmatprep.subr.mxu1 %v1028_v13  ;;  %446 = vmatpush1.msra.mxu0 %v1033_v14  ;;  %v1073_v24 = vld [vmem:[%s973_s23 + $0x98] sm:$0xff]  ;;  %v1081_v26 = vld [vmem:[%s973_s23 + $0x90] sm:$0xff]  ;;  %v1089_v28 = vld [vmem:[%s973_s23 + $0x88] sm:$0xff] }
  0x19   : > { %528 = vmatpush1.msra.mxu1 %v1036_v15  ;;  %447 = vmatprep.subr.mxu0 %v1041_v16  ;;  %v1076_v25 = vld [vmem:[%s978_s26 + $0x98] sm:$0xff]  ;;  %v1084_v27 = vld [vmem:[%s978_s26 + $0x90] sm:$0xff]  ;;  %v1092_v29 = vld [vmem:[%s978_s26 + $0x88] sm:$0xff] }
  0x1a   : > { %529 = vmatprep.subr.mxu1 %v1044_v17  ;;  %448 = vmatpush1.msra.mxu0 %v1049_v18  ;;  %v1097_v30 = vld [vmem:[%s973_s23 + $0x80] sm:$0xff]  ;;  %v1105_v32 = vld [vmem:[%s973_s23 + $0x78] sm:$0xff]  ;;  %v1113_v34 = vld [vmem:[%s973_s23 + $0x70] sm:$0xff] }
  0x1b   : > { %530 = vmatpush1.msra.mxu1 %v1052_v19  ;;  %449 = vmatprep.subr.mxu0 %v1057_v20  ;;  %v1100_v31 = vld [vmem:[%s978_s26 + $0x80] sm:$0xff]  ;;  %v1108_v33 = vld [vmem:[%s978_s26 + $0x78] sm:$0xff]  ;;  %v1116_v35 = vld [vmem:[%s978_s26 + $0x70] sm:$0xff] }
  0x1c   : > { %531 = vmatprep.subr.mxu1 %v1060_v21  ;;  %450 = vmatpush1.msra.mxu0 %v1065_v22  ;;  %v1121_v36 = vld [vmem:[%s973_s23 + $0x68] sm:$0xff]  ;;  %v1129_v38 = vld [vmem:[%s973_s23 + $0x60] sm:$0xff]  ;;  %v1137_v40 = vld [vmem:[%s973_s23 + $0x58] sm:$0xff] }
  0x1d   : > { %532 = vmatpush1.msra.mxu1 %v1068_v23  ;;  %451 = vmatprep.subr.mxu0 %v1073_v24  ;;  %v1124_v37 = vld [vmem:[%s978_s26 + $0x68] sm:$0xff]  ;;  %v1132_v39 = vld [vmem:[%s978_s26 + $0x60] sm:$0xff]  ;;  %v1140_v41 = vld [vmem:[%s978_s26 + $0x58] sm:$0xff] }
  0x1e   : > { %533 = vmatprep.subr.mxu1 %v1076_v25  ;;  %452 = vmatpush1.msra.mxu0 %v1081_v26  ;;  %v1145_v42 = vld [vmem:[%s973_s23 + $0x50] sm:$0xff]  ;;  %v1153_v44 = vld [vmem:[%s973_s23 + $0x48] sm:$0xff]  ;;  %v1161_v46 = vld [vmem:[%s973_s23 + $0x40] sm:$0xff] }
  0x1f   : > { %534 = vmatpush1.msra.mxu1 %v1084_v27  ;;  %453 = vmatprep.subr.mxu0 %v1089_v28  ;;  %v1148_v43 = vld [vmem:[%s978_s26 + $0x50] sm:$0xff]  ;;  %v1156_v45 = vld [vmem:[%s978_s26 + $0x48] sm:$0xff]  ;;  %v1164_v47 = vld [vmem:[%s978_s26 + $0x40] sm:$0xff] }
  0x20   : > { %535 = vmatprep.subr.mxu1 %v1092_v29  ;;  %454 = vmatpush1.msra.mxu0 %v1097_v30  ;;  %v1169_v48 = vld [vmem:[%s973_s23 + $0x38] sm:$0xff]  ;;  %v1177_v50 = vld [vmem:[%s973_s23 + $0x30] sm:$0xff]  ;;  %v1185_v52 = vld [vmem:[%s973_s23 + $0x28] sm:$0xff] }
  0x21   : > { %536 = vmatpush1.msra.mxu1 %v1100_v31  ;;  %455 = vmatprep.subr.mxu0 %v1105_v32  ;;  %v1172_v49 = vld [vmem:[%s978_s26 + $0x38] sm:$0xff]  ;;  %v1180_v51 = vld [vmem:[%s978_s26 + $0x30] sm:$0xff]  ;;  %1737 = vst [vmem:[#allocation3_spill] sm:$0xff] %v1185_v52  ;;  %v1188_v53 = vld [vmem:[%s978_s26 + $0x28] sm:$0xff] }
  0x22   : > { %537 = vmatprep.subr.mxu1 %v1108_v33  ;;  %456 = vmatpush1.msra.mxu0 %v1113_v34  ;;  %1736 = vst [vmem:[#allocation2_spill] sm:$0xff] %v1180_v51  ;;  %1738 = vst [vmem:[#allocation4_spill] sm:$0xff] %v1188_v53  ;;  %v1193_v54 = vld [vmem:[%s973_s23 + $0x20] sm:$0xff]  ;;  %v1201_v56 = vld [vmem:[%s973_s23 + $0x18] sm:$0xff] }
  0x23   : > { %538 = vmatpush1.msra.mxu1 %v1116_v35  ;;  %457 = vmatprep.subr.mxu0 %v1121_v36  ;;  %1739 = vst [vmem:[#allocation5_spill] sm:$0xff] %v1193_v54  ;;  %v1196_v55 = vld [vmem:[%s978_s26 + $0x20] sm:$0xff]  ;;  %1741 = vst [vmem:[#allocation7_spill] sm:$0xff] %v1201_v56  ;;  %v1204_v57 = vld [vmem:[%s978_s26 + $0x18] sm:$0xff] }
  0x24   : > { %539 = vmatprep.subr.mxu1 %v1124_v37  ;;  %458 = vmatpush1.msra.mxu0 %v1129_v38  ;;  %1740 = vst [vmem:[#allocation6_spill] sm:$0xff] %v1196_v55  ;;  %1742 = vst [vmem:[#allocation8_spill] sm:$0xff] %v1204_v57  ;;  %v1209_v58 = vld [vmem:[%s973_s23 + $0x10] sm:$0xff]  ;;  %v1217_v60 = vld [vmem:[%s973_s23 + $0x8] sm:$0xff] }
  0x25   : > { %540 = vmatpush1.msra.mxu1 %v1132_v39  ;;  %459 = vmatprep.subr.mxu0 %v1137_v40  ;;  %1743 = vst [vmem:[#allocation9_spill] sm:$0xff] %v1209_v58  ;;  %v1212_v59 = vld [vmem:[%s978_s26 + $0x10] sm:$0xff]  ;;  %1745 = vst [vmem:[#allocation11_spill] sm:$0xff] %v1217_v60  ;;  %v1220_v61 = vld [vmem:[%s978_s26 + $0x8] sm:$0xff] }
  0x26   : > { %541 = vmatprep.subr.mxu1 %v1140_v41  ;;  %460 = vmatpush1.msra.mxu0 %v1145_v42  ;;  %1744 = vst [vmem:[#allocation10_spill] sm:$0xff] %v1212_v59  ;;  %1746 = vst [vmem:[#allocation12_spill] sm:$0xff] %v1220_v61  ;;  %v1225_v62 = vld [vmem:[%s973_s23] sm:$0xff] }
  0x27   : > { %542 = vmatpush1.msra.mxu1 %v1148_v43  ;;  %461 = vmatprep.subr.mxu0 %v1153_v44  ;;  %1747 = vst [vmem:[#allocation13_spill] sm:$0xff] %v1225_v62  ;;  %v1228_v63 = vld [vmem:[%s978_s26] sm:$0xff] }
  0x28   : > { %543 = vmatprep.subr.mxu1 %v1156_v45  ;;  %462 = vmatpush1.msra.mxu0 %v1161_v46  ;;  %1748 = vst [vmem:[#allocation14_spill] sm:$0xff] %v1228_v63 }
  0x29   : > { %544 = vmatpush1.msra.mxu1 %v1164_v47  ;;  %463 = vmatprep.subr.mxu0 %v1169_v48 }
  0x2a   : > { %545 = vmatprep.subr.mxu1 %v1172_v49  ;;  %464 = vmatpush1.msra.mxu0 %v1177_v50 }
  0x2b   : > { %546 = vmatpush1.msra.mxu1 %v1180_v51  ;;  %465 = vmatprep.subr.mxu0 %v1185_v52  ;;  %v1483_v52 = vld [vmem:[%s978_s26 + $0x110] sm:$0xff] }
  0x2c   : > { %547 = vmatprep.subr.mxu1 %v1188_v53  ;;  %466 = vmatpush1.msra.mxu0 %v1193_v54  ;;  %v1236_v54 = vld [vmem:[%s978_s26 + $0x1f8] sm:$0xff]  ;;  %v1465_v53 = vld.sshfl [vmem:[%s272_s30] sm:$0x33 pattern:$0x76325410] }
  0x2d   : > { %548 = vmatpush1.msra.mxu1 %v1196_v55  ;;  %467 = vmatprep.subr.mxu0 %v1201_v56  ;;  %v1233_v55 = vld [vmem:[%s973_s23 + $0x1f8] sm:$0xff]  ;;  %1750 = vst [vmem:[#allocation16_spill] sm:$0xff] %v1236_v54  ;;  %v1244_v56 = vld [vmem:[%s978_s26 + $0x1f0] sm:$0xff]  ;;  %v1495_v51 = vcombine.high %v1465_v53, %v1465_v53 }
  0x2e   : > { %549 = vmatprep.subr.mxu1 %v1204_v57  ;;  %468 = vmatpush1.msra.mxu0 %v1209_v58  ;;  %1749 = vst [vmem:[#allocation15_spill] sm:$0xff] %v1233_v55  ;;  %v1241_v57 = vld [vmem:[%s973_s23 + $0x1f0] sm:$0xff]  ;;  %1752 = vst [vmem:[#allocation18_spill] sm:$0xff] %v1244_v56  ;;  %v1252_v58 = vld [vmem:[%s978_s26 + $0x1e8] sm:$0xff] }
  0x2f   : > { %550 = vmatpush1.msra.mxu1 %v1212_v59  ;;  %469 = vmatprep.subr.mxu0 %v1217_v60  ;;  %1751 = vst [vmem:[#allocation17_spill] sm:$0xff] %v1241_v57  ;;  %v1249_v59 = vld [vmem:[%s973_s23 + $0x1e8] sm:$0xff]  ;;  %1754 = vst [vmem:[#allocation20_spill] sm:$0xff] %v1252_v58  ;;  %v1260_v60 = vld [vmem:[%s978_s26 + $0x1e0] sm:$0xff] }
  0x30   : > { %551 = vmatprep.subr.mxu1 %v1220_v61  ;;  %470 = vmatpush1.msra.mxu0 %v1225_v62  ;;  %1753 = vst [vmem:[#allocation19_spill] sm:$0xff] %v1249_v59  ;;  %v1257_v61 = vld [vmem:[%s973_s23 + $0x1e0] sm:$0xff]  ;;  %1756 = vst [vmem:[#allocation22_spill] sm:$0xff] %v1260_v60  ;;  %v1268_v62 = vld [vmem:[%s978_s26 + $0x1d8] sm:$0xff] }
  0x31   : > { %552 = vmatpush1.msra.mxu1 %v1228_v63  ;;  %471 = vmatprep.subr.mxu0 %v1233_v55  ;;  %1755 = vst [vmem:[#allocation21_spill] sm:$0xff] %v1257_v61  ;;  %v1265_v63 = vld [vmem:[%s973_s23 + $0x1d8] sm:$0xff]  ;;  %1758 = vst [vmem:[#allocation24_spill] sm:$0xff] %v1268_v62  ;;  %v1276_v55 = vld [vmem:[%s978_s26 + $0x1d0] sm:$0xff] }
  0x32   : > { %553 = vmatprep.subr.mxu1 %v1236_v54  ;;  %472 = vmatpush2.msra.mxu0 %v1241_v57  ;;  %1757 = vst [vmem:[#allocation23_spill] sm:$0xff] %v1265_v63  ;;  %v1273_v54 = vld [vmem:[%s973_s23 + $0x1d0] sm:$0xff]  ;;  %1760 = vst [vmem:[#allocation26_spill] sm:$0xff] %v1276_v55  ;;  %v1284_v57 = vld [vmem:[%s978_s26 + $0x1c8] sm:$0xff] }
  0x33   : > { %554 = vmatpush2.msra.mxu1 %v1244_v56  ;;  %473 = vmatprep.subr.mxu0 %v1249_v59  ;;  %1759 = vst [vmem:[#allocation25_spill] sm:$0xff] %v1273_v54  ;;  %v1281_v56 = vld [vmem:[%s973_s23 + $0x1c8] sm:$0xff]  ;;  %1762 = vst [vmem:[#allocation28_spill] sm:$0xff] %v1284_v57  ;;  %v1292_v59 = vld [vmem:[%s978_s26 + $0x1c0] sm:$0xff] }
  0x34   : > { %555 = vmatprep.subr.mxu1 %v1252_v58  ;;  %474 = vmatpush2.msra.mxu0 %v1257_v61  ;;  %1761 = vst [vmem:[#allocation27_spill] sm:$0xff] %v1281_v56  ;;  %v1289_v58 = vld [vmem:[%s973_s23 + $0x1c0] sm:$0xff]  ;;  %1764 = vst [vmem:[#allocation30_spill] sm:$0xff] %v1292_v59  ;;  %v1300_v61 = vld [vmem:[%s978_s26 + $0x1b8] sm:$0xff] }
  0x35   : > { %556 = vmatpush2.msra.mxu1 %v1260_v60  ;;  %475 = vmatprep.subr.mxu0 %v1265_v63  ;;  %1763 = vst [vmem:[#allocation29_spill] sm:$0xff] %v1289_v58  ;;  %v1297_v60 = vld [vmem:[%s973_s23 + $0x1b8] sm:$0xff]  ;;  %1766 = vst [vmem:[#allocation32_spill] sm:$0xff] %v1300_v61  ;;  %v1308_v63 = vld [vmem:[%s978_s26 + $0x1b0] sm:$0xff] }
  0x36   : > { %557 = vmatprep.subr.mxu1 %v1268_v62  ;;  %476 = vmatpush2.msra.mxu0 %v1273_v54  ;;  %1765 = vst [vmem:[#allocation31_spill] sm:$0xff] %v1297_v60  ;;  %v1305_v62 = vld [vmem:[%s973_s23 + $0x1b0] sm:$0xff]  ;;  %1768 = vst [vmem:[#allocation34_spill] sm:$0xff] %v1308_v63  ;;  %v1316_v54 = vld [vmem:[%s978_s26 + $0x1a8] sm:$0xff] }
  0x37   : > { %558 = vmatpush2.msra.mxu1 %v1276_v55  ;;  %477 = vmatprep.subr.mxu0 %v1281_v56  ;;  %1767 = vst [vmem:[#allocation33_spill] sm:$0xff] %v1305_v62  ;;  %v1313_v55 = vld [vmem:[%s973_s23 + $0x1a8] sm:$0xff]  ;;  %1770 = vst [vmem:[#allocation36_spill] sm:$0xff] %v1316_v54  ;;  %v1324_v56 = vld [vmem:[%s978_s26 + $0x1a0] sm:$0xff] }
  0x38   : > { %559 = vmatprep.subr.mxu1 %v1284_v57  ;;  %478 = vmatpush2.msra.mxu0 %v1289_v58  ;;  %1769 = vst [vmem:[#allocation35_spill] sm:$0xff] %v1313_v55  ;;  %v1321_v57 = vld [vmem:[%s973_s23 + $0x1a0] sm:$0xff]  ;;  %1772 = vst [vmem:[#allocation38_spill] sm:$0xff] %v1324_v56  ;;  %v1332_v58 = vld [vmem:[%s978_s26 + $0x198] sm:$0xff] }
  0x39   : > { %560 = vmatpush2.msra.mxu1 %v1292_v59  ;;  %479 = vmatprep.subr.mxu0 %v1297_v60  ;;  %1771 = vst [vmem:[#allocation37_spill] sm:$0xff] %v1321_v57  ;;  %v1329_v59 = vld [vmem:[%s973_s23 + $0x198] sm:$0xff]  ;;  %1774 = vst [vmem:[#allocation40_spill] sm:$0xff] %v1332_v58  ;;  %v1340_v60 = vld [vmem:[%s978_s26 + $0x190] sm:$0xff] }
  0x3a   : > { %561 = vmatprep.subr.mxu1 %v1300_v61  ;;  %480 = vmatpush2.msra.mxu0 %v1305_v62  ;;  %1773 = vst [vmem:[#allocation39_spill] sm:$0xff] %v1329_v59  ;;  %v1337_v61 = vld [vmem:[%s973_s23 + $0x190] sm:$0xff]  ;;  %1776 = vst [vmem:[#allocation42_spill] sm:$0xff] %v1340_v60  ;;  %v1348_v62 = vld [vmem:[%s978_s26 + $0x188] sm:$0xff] }
  0x3b   : > { %562 = vmatpush2.msra.mxu1 %v1308_v63  ;;  %481 = vmatprep.subr.mxu0 %v1313_v55  ;;  %1775 = vst [vmem:[#allocation41_spill] sm:$0xff] %v1337_v61  ;;  %v1345_v63 = vld [vmem:[%s973_s23 + $0x188] sm:$0xff]  ;;  %1778 = vst [vmem:[#allocation44_spill] sm:$0xff] %v1348_v62  ;;  %v1356_v55 = vld [vmem:[%s978_s26 + $0x180] sm:$0xff] }
  0x3c   : > { %563 = vmatprep.subr.mxu1 %v1316_v54  ;;  %482 = vmatpush2.msra.mxu0 %v1321_v57  ;;  %1777 = vst [vmem:[#allocation43_spill] sm:$0xff] %v1345_v63  ;;  %v1353_v54 = vld [vmem:[%s973_s23 + $0x180] sm:$0xff]  ;;  %1780 = vst [vmem:[#allocation46_spill] sm:$0xff] %v1356_v55  ;;  %v1364_v57 = vld [vmem:[%s978_s26 + $0x178] sm:$0xff] }
  0x3d   : > { %564 = vmatpush2.msra.mxu1 %v1324_v56  ;;  %483 = vmatprep.subr.mxu0 %v1329_v59  ;;  %1779 = vst [vmem:[#allocation45_spill] sm:$0xff] %v1353_v54  ;;  %v1361_v56 = vld [vmem:[%s973_s23 + $0x178] sm:$0xff]  ;;  %1782 = vst [vmem:[#allocation48_spill] sm:$0xff] %v1364_v57  ;;  %v1372_v59 = vld [vmem:[%s978_s26 + $0x170] sm:$0xff] }
  0x3e   : > { %565 = vmatprep.subr.mxu1 %v1332_v58  ;;  %484 = vmatpush2.msra.mxu0 %v1337_v61  ;;  %1781 = vst [vmem:[#allocation47_spill] sm:$0xff] %v1361_v56  ;;  %v1369_v58 = vld [vmem:[%s973_s23 + $0x170] sm:$0xff]  ;;  %1784 = vst [vmem:[#allocation50_spill] sm:$0xff] %v1372_v59  ;;  %v1380_v61 = vld [vmem:[%s978_s26 + $0x168] sm:$0xff] }
  0x3f   : > { %566 = vmatpush2.msra.mxu1 %v1340_v60  ;;  %485 = vmatprep.subr.mxu0 %v1345_v63  ;;  %1783 = vst [vmem:[#allocation49_spill] sm:$0xff] %v1369_v58  ;;  %v1377_v60 = vld [vmem:[%s973_s23 + $0x168] sm:$0xff]  ;;  %1786 = vst [vmem:[#allocation52_spill] sm:$0xff] %v1380_v61  ;;  %v1388_v63 = vld [vmem:[%s978_s26 + $0x160] sm:$0xff] }
  0x40   : > { %567 = vmatprep.subr.mxu1 %v1348_v62  ;;  %486 = vmatpush2.msra.mxu0 %v1353_v54  ;;  %1785 = vst [vmem:[#allocation51_spill] sm:$0xff] %v1377_v60  ;;  %v1385_v62 = vld [vmem:[%s973_s23 + $0x160] sm:$0xff]  ;;  %1788 = vst [vmem:[#allocation54_spill] sm:$0xff] %v1388_v63  ;;  %v1396_v54 = vld [vmem:[%s978_s26 + $0x158] sm:$0xff] }
  0x41   : > { %568 = vmatpush2.msra.mxu1 %v1356_v55  ;;  %487 = vmatprep.subr.mxu0 %v1361_v56  ;;  %1787 = vst [vmem:[#allocation53_spill] sm:$0xff] %v1385_v62  ;;  %v1393_v55 = vld [vmem:[%s973_s23 + $0x158] sm:$0xff]  ;;  %1790 = vst [vmem:[#allocation56_spill] sm:$0xff] %v1396_v54  ;;  %v1404_v56 = vld [vmem:[%s978_s26 + $0x150] sm:$0xff] }
  0x42   : > { %569 = vmatprep.subr.mxu1 %v1364_v57  ;;  %488 = vmatpush2.msra.mxu0 %v1369_v58  ;;  %1789 = vst [vmem:[#allocation55_spill] sm:$0xff] %v1393_v55  ;;  %v1401_v57 = vld [vmem:[%s973_s23 + $0x150] sm:$0xff]  ;;  %1792 = vst [vmem:[#allocation58_spill] sm:$0xff] %v1404_v56  ;;  %v1423_v58 = vld [vmem:[%s978_s26 + $0x140] sm:$0xff] }
  0x43   : > { %570 = vmatpush2.msra.mxu1 %v1372_v59  ;;  %489 = vmatprep.subr.mxu0 %v1377_v60  ;;  %1791 = vst [vmem:[#allocation57_spill] sm:$0xff] %v1401_v57  ;;  %v1412_v59 = vld [vmem:[%s973_s23 + $0x148] sm:$0xff]  ;;  %1796 = vst [vmem:[#allocation62_spill] sm:$0xff] %v1423_v58 }
  0x44   : > { %571 = vmatprep.subr.mxu1 %v1380_v61  ;;  %490 = vmatpush2.msra.mxu0 %v1385_v62  ;;  %1793 = vst [vmem:[#allocation59_spill] sm:$0xff] %v1412_v59  ;;  %v1415_v60 = vld [vmem:[%s978_s26 + $0x148] sm:$0xff]  ;;  %v1420_v61 = vld [vmem:[%s973_s23 + $0x140] sm:$0xff]  ;;  %v1431_v62 = vld [vmem:[%s978_s26 + $0x138] sm:$0xff] }
  0x45   : > { %572 = vmatpush2.msra.mxu1 %v1388_v63  ;;  %1794 = vst [vmem:[#allocation60_spill] sm:$0xff] %v1415_v60  ;;  %491 = vmatprep.subr.mxu0 %v1393_v55  ;;  %1795 = vst [vmem:[#allocation61_spill] sm:$0xff] %v1420_v61  ;;  %v1428_v63 = vld [vmem:[%s973_s23 + $0x138] sm:$0xff]  ;;  %v1463_v55 = vld [vmem:[%s978_s26 + $0x120] sm:$0xff] }
  0x46   : > { %573 = vmatprep.subr.mxu1 %v1396_v54  ;;  %492 = vmatpush2.msra.mxu0 %v1401_v57  ;;  %1797 = vst [vmem:[#allocation63_spill] sm:$0xff] %v1428_v63  ;;  %1798 = vst [vmem:[#allocation64_spill] sm:$0xff] %v1431_v62  ;;  %v1440_v54 = vld [vmem:[%s973_s23 + $0x130] sm:$0xff] }
  0x47   : > { %574 = vmatpush2.msra.mxu1 %v1404_v56  ;;  %493 = vmatprep.subr.mxu0 %v1412_v59  ;;  %1799 = vst [vmem:[#allocation65_spill] sm:$0xff] %v1440_v54  ;;  %v1443_v57 = vld [vmem:[%s978_s26 + $0x130] sm:$0xff]  ;;  %v1452_v56 = vld [vmem:[%s973_s23 + $0x128] sm:$0xff]  ;;  %1803 = vst [vmem:[#allocation69_spill] sm:$0xff] %v1463_v55 }
  0x48   : > { %575 = vmatprep.subr.mxu1 %v1415_v60  ;;  %1800 = vst [vmem:[#allocation66_spill] sm:$0xff] %v1443_v57  ;;  %494 = vmatpush2.msra.mxu0 %v1420_v61  ;;  %1801 = vst [vmem:[#allocation67_spill] sm:$0xff] %v1452_v56  ;;  %v1455_v59 = vld [vmem:[%s978_s26 + $0x128] sm:$0xff]  ;;  %v1460_v60 = vld [vmem:[%s973_s23 + $0x120] sm:$0xff] }
  0x49   : > { %576 = vmatpush2.msra.mxu1 %v1423_v58  ;;  %1802 = vst [vmem:[#allocation68_spill] sm:$0xff] %v1455_v59  ;;  %495 = vmatprep.subr.mxu0 %v1428_v63  ;;  %v1470_v58 = vld [vmem:[%s973_s23 + $0x118] sm:$0xff]  ;;  %v1475_v63 = vld.sshfl [vmem:[%s277_s8] sm:$0x33 pattern:$0x76325410] }
  0x4a   : > { %577 = vmatprep.subr.mxu1 %v1431_v62  ;;  %496 = vmatpush2.msra.mxu0 %v1440_v54  ;;  %v1473_v61 = vld [vmem:[%s978_s26 + $0x118] sm:$0xff]  ;;  %v1480_v62 = vld [vmem:[%s973_s23 + $0x110] sm:$0xff]  ;;  %v1491_v54 = vld [vmem:[%s978_s26 + $0x108] sm:$0xff] }
  0x4b   : > { %578 = vmatpush2.msra.mxu1 %v1443_v57  ;;  %497 = vmatprep.subr.mxu0 %v1452_v56  ;;  %v1488_v57 = vld [vmem:[%s973_s23 + $0x108] sm:$0xff]  ;;  %v1504_v56 = vcombine.high %v1475_v63, %v1475_v63 }
  0x4c   : > { %579 = vmatprep.subr.mxu1 %v1455_v59  ;;  %498 = vmatpush2.msra.mxu0 %v1460_v60  ;;  %v1500_v59 = vld [vmem:[%s973_s23 + $0x100] sm:$0xff] }
  0x4d   : > { %580 = vmatpush2.msra.mxu1 %v1463_v55  ;;  %499 = vmatprep.subr.mxu0 %v1470_v58  ;;  %v1509_v55 = vld [vmem:[%s978_s26 + $0x100] sm:$0xff] }
  0x4e   : > { %581 = vmatprep.subr.mxu1 %v1473_v61  ;;  %500 = vmatpush2.msra.mxu0 %v1480_v62 }
  0x4f   : > { %582 = vmatpush2.msra.mxu1 %v1483_v52  ;;  %501 = vmatprep.subr.mxu0 %v1488_v57 }
  0x50   : > { %583 = vmatprep.subr.mxu1 %v1491_v54  ;;  %502 = vmatpush2.msra.mxu0 %v1500_v59 }
  0x51   : > { %503 = vmatprep.mubr.f32.mxu0 %v1495_v51  ;;  %584 = vmatpush2.msra.mxu1 %v1509_v55 }
  0x52   : > { %585 = vmatprep.mubr.f32.mxu1 %v1504_v56  ;;  %504 = vmatmul.mubr.f32.vlgmr.msra.gmra.mxu0 %v1465_v53 }
  0x53   : > { %586 = vmatmul.mubr.f32.vlgmr.msra.gmra.mxu1 %v1475_v63  ;;  %592 = vmatprep.subr.mxu0 %v981_v0  ;;  %v1804_v0 = vld [vmem:[#allocation2_spill] sm:$0xff] }
  0x54   : > { %677 = vmatprep.subr.mxu1 %v984_v1  ;;  %593 = vmatpush1.msra.mxu0 %v987_v2  ;;  %v1805_v1 = vld [vmem:[#allocation3_spill] sm:$0xff]  ;;  %v1806_v2 = vld [vmem:[#allocation4_spill] sm:$0xff] }
  0x55   : > { %678 = vmatpush1.msra.mxu1 %v992_v3  ;;  %594 = vmatprep.subr.mxu0 %v995_v4  ;;  %v1807_v3 = vld [vmem:[#allocation5_spill] sm:$0xff]  ;;  %v1808_v4 = vld [vmem:[#allocation6_spill] sm:$0xff] }
  0x56   : > { %679 = vmatprep.subr.mxu1 %v998_v5  ;;  %595 = vmatpush1.msra.mxu0 %v1003_v6  ;;  %v1809_v5 = vld [vmem:[#allocation7_spill] sm:$0xff]  ;;  %v1810_v6 = vld [vmem:[#allocation8_spill] sm:$0xff] }
  0x57   : > { %680 = vmatpush1.msra.mxu1 %v1006_v7  ;;  %596 = vmatprep.subr.mxu0 %v1009_v8  ;;  %v1811_v7 = vld [vmem:[#allocation9_spill] sm:$0xff]  ;;  %v1812_v8 = vld [vmem:[#allocation10_spill] sm:$0xff] }
  0x58   : > { %681 = vmatprep.subr.mxu1 %v1014_v9  ;;  %597 = vmatpush1.msra.mxu0 %v1017_v10  ;;  %v1813_v9 = vld [vmem:[#allocation11_spill] sm:$0xff]  ;;  %v1814_v10 = vld [vmem:[#allocation12_spill] sm:$0xff] }
  0x59   : > { %682 = vmatpush1.msra.mxu1 %v1020_v11  ;;  %598 = vmatprep.subr.mxu0 %v1025_v12  ;;  %v1815_v11 = vld [vmem:[#allocation13_spill] sm:$0xff]  ;;  %v1816_v12 = vld [vmem:[#allocation14_spill] sm:$0xff] }
  0x5a   : > { %683 = vmatprep.subr.mxu1 %v1028_v13  ;;  %599 = vmatpush1.msra.mxu0 %v1033_v14  ;;  %v1817_v13 = vld [vmem:[#allocation15_spill] sm:$0xff]  ;;  %v1818_v14 = vld [vmem:[#allocation16_spill] sm:$0xff] }
  0x5b   : > { %684 = vmatpush1.msra.mxu1 %v1036_v15  ;;  %600 = vmatprep.subr.mxu0 %v1041_v16  ;;  %v1819_v15 = vld [vmem:[#allocation17_spill] sm:$0xff]  ;;  %v1820_v16 = vld [vmem:[#allocation18_spill] sm:$0xff] }
  0x5c   : > { %685 = vmatprep.subr.mxu1 %v1044_v17  ;;  %601 = vmatpush1.msra.mxu0 %v1049_v18  ;;  %v1821_v17 = vld [vmem:[#allocation19_spill] sm:$0xff]  ;;  %v1822_v18 = vld [vmem:[#allocation20_spill] sm:$0xff] }
  0x5d   : > { %686 = vmatpush1.msra.mxu1 %v1052_v19  ;;  %602 = vmatprep.subr.mxu0 %v1057_v20  ;;  %v1823_v19 = vld [vmem:[#allocation21_spill] sm:$0xff]  ;;  %v1824_v20 = vld [vmem:[#allocation22_spill] sm:$0xff] }
  0x5e   : > { %687 = vmatprep.subr.mxu1 %v1060_v21  ;;  %603 = vmatpush1.msra.mxu0 %v1065_v22  ;;  %v1825_v21 = vld [vmem:[#allocation23_spill] sm:$0xff]  ;;  %v1826_v22 = vld [vmem:[#allocation24_spill] sm:$0xff] }
  0x5f   : > { %688 = vmatpush1.msra.mxu1 %v1068_v23  ;;  %604 = vmatprep.subr.mxu0 %v1073_v24  ;;  %v1827_v23 = vld [vmem:[#allocation25_spill] sm:$0xff]  ;;  %v1828_v24 = vld [vmem:[#allocation26_spill] sm:$0xff] }
  0x60   : > { %689 = vmatprep.subr.mxu1 %v1076_v25  ;;  %605 = vmatpush1.msra.mxu0 %v1081_v26  ;;  %v1829_v25 = vld [vmem:[#allocation27_spill] sm:$0xff]  ;;  %v1830_v26 = vld [vmem:[#allocation28_spill] sm:$0xff] }
  0x61   : > { %690 = vmatpush1.msra.mxu1 %v1084_v27  ;;  %606 = vmatprep.subr.mxu0 %v1089_v28  ;;  %v1831_v27 = vld [vmem:[#allocation29_spill] sm:$0xff]  ;;  %v1832_v28 = vld [vmem:[#allocation30_spill] sm:$0xff] }
  0x62   : > { %691 = vmatprep.subr.mxu1 %v1092_v29  ;;  %607 = vmatpush1.msra.mxu0 %v1097_v30  ;;  %v1833_v29 = vld [vmem:[#allocation31_spill] sm:$0xff]  ;;  %v1834_v30 = vld [vmem:[#allocation32_spill] sm:$0xff] }
  0x63   : > { %692 = vmatpush1.msra.mxu1 %v1100_v31  ;;  %608 = vmatprep.subr.mxu0 %v1105_v32  ;;  %v1835_v31 = vld [vmem:[#allocation33_spill] sm:$0xff]  ;;  %v1836_v32 = vld [vmem:[#allocation34_spill] sm:$0xff] }
  0x64   : > { %693 = vmatprep.subr.mxu1 %v1108_v33  ;;  %609 = vmatpush1.msra.mxu0 %v1113_v34  ;;  %v1837_v33 = vld [vmem:[#allocation35_spill] sm:$0xff]  ;;  %v1838_v34 = vld [vmem:[#allocation36_spill] sm:$0xff] }
  0x65   : > { %694 = vmatpush1.msra.mxu1 %v1116_v35  ;;  %610 = vmatprep.subr.mxu0 %v1121_v36  ;;  %v1839_v35 = vld [vmem:[#allocation37_spill] sm:$0xff]  ;;  %v1840_v36 = vld [vmem:[#allocation38_spill] sm:$0xff] }
  0x66   : > { %695 = vmatprep.subr.mxu1 %v1124_v37  ;;  %611 = vmatpush1.msra.mxu0 %v1129_v38  ;;  %v1841_v37 = vld [vmem:[#allocation39_spill] sm:$0xff]  ;;  %v1842_v38 = vld [vmem:[#allocation40_spill] sm:$0xff] }
  0x67   : > { %696 = vmatpush1.msra.mxu1 %v1132_v39  ;;  %612 = vmatprep.subr.mxu0 %v1137_v40  ;;  %v1843_v39 = vld [vmem:[#allocation41_spill] sm:$0xff]  ;;  %v1844_v40 = vld [vmem:[#allocation42_spill] sm:$0xff] }
  0x68   : > { %697 = vmatprep.subr.mxu1 %v1140_v41  ;;  %613 = vmatpush1.msra.mxu0 %v1145_v42  ;;  %v1845_v41 = vld [vmem:[#allocation43_spill] sm:$0xff]  ;;  %v1846_v42 = vld [vmem:[#allocation44_spill] sm:$0xff] }
  0x69   : > { %698 = vmatpush1.msra.mxu1 %v1148_v43  ;;  %614 = vmatprep.subr.mxu0 %v1153_v44  ;;  %v1847_v43 = vld [vmem:[#allocation45_spill] sm:$0xff]  ;;  %v1848_v44 = vld [vmem:[#allocation46_spill] sm:$0xff] }
  0x6a   : > { %699 = vmatprep.subr.mxu1 %v1156_v45  ;;  %615 = vmatpush1.msra.mxu0 %v1161_v46  ;;  %v1849_v45 = vld [vmem:[#allocation47_spill] sm:$0xff]  ;;  %v1850_v46 = vld [vmem:[#allocation48_spill] sm:$0xff] }
  0x6b   : > { %700 = vmatpush1.msra.mxu1 %v1164_v47  ;;  %616 = vmatprep.subr.mxu0 %v1169_v48  ;;  %v1851_v47 = vld [vmem:[#allocation49_spill] sm:$0xff]  ;;  %v1852_v48 = vld [vmem:[#allocation50_spill] sm:$0xff] }
  0x6c   : > { %701 = vmatprep.subr.mxu1 %v1172_v49  ;;  %617 = vmatpush1.msra.mxu0 %v1177_v50  ;;  %v1853_v49 = vld [vmem:[#allocation51_spill] sm:$0xff]  ;;  %v1854_v50 = vld [vmem:[#allocation52_spill] sm:$0xff] }
  0x6d   : > { %702 = vmatpush1.msra.mxu1 %v1804_v0  ;;  %618 = vmatprep.subr.mxu0 %v1805_v1  ;;  %v1855_v0 = vld [vmem:[#allocation53_spill] sm:$0xff]  ;;  %v1856_v1 = vld [vmem:[#allocation54_spill] sm:$0xff] }
  0x6e   : > { %703 = vmatprep.subr.mxu1 %v1806_v2  ;;  %619 = vmatpush1.msra.mxu0 %v1807_v3  ;;  %v1857_v2 = vld [vmem:[#allocation55_spill] sm:$0xff]  ;;  %v1858_v3 = vld [vmem:[#allocation56_spill] sm:$0xff] }
  0x6f   : > { %704 = vmatpush1.msra.mxu1 %v1808_v4  ;;  %620 = vmatprep.subr.mxu0 %v1809_v5  ;;  %v1859_v4 = vld [vmem:[#allocation57_spill] sm:$0xff]  ;;  %v1860_v5 = vld [vmem:[#allocation58_spill] sm:$0xff] }
  0x70   : > { %705 = vmatprep.subr.mxu1 %v1810_v6  ;;  %621 = vmatpush1.msra.mxu0 %v1811_v7  ;;  %v1861_v6 = vld [vmem:[#allocation59_spill] sm:$0xff]  ;;  %v1862_v7 = vld [vmem:[#allocation60_spill] sm:$0xff] }
  0x71   : > { %706 = vmatpush1.msra.mxu1 %v1812_v8  ;;  %622 = vmatprep.subr.mxu0 %v1813_v9  ;;  %v1863_v8 = vld [vmem:[#allocation61_spill] sm:$0xff]  ;;  %v1864_v9 = vld [vmem:[#allocation62_spill] sm:$0xff] }
  0x72   : > { %707 = vmatprep.subr.mxu1 %v1814_v10  ;;  %623 = vmatpush1.msra.mxu0 %v1815_v11  ;;  %v1865_v10 = vld [vmem:[#allocation63_spill] sm:$0xff]  ;;  %v1866_v11 = vld [vmem:[#allocation64_spill] sm:$0xff] }
  0x73   : > { %708 = vmatpush1.msra.mxu1 %v1816_v12  ;;  %624 = vmatprep.subr.mxu0 %v1817_v13  ;;  %v1867_v12 = vld [vmem:[#allocation65_spill] sm:$0xff]  ;;  %v1868_v13 = vld [vmem:[#allocation66_spill] sm:$0xff] }
  0x74   : > { %709 = vmatprep.subr.mxu1 %v1818_v14  ;;  %625 = vmatpush2.msra.mxu0 %v1819_v15  ;;  %v1869_v14 = vld [vmem:[#allocation67_spill] sm:$0xff]  ;;  %v1870_v15 = vld [vmem:[#allocation68_spill] sm:$0xff] }
  0x75   : > { %710 = vmatpush2.msra.mxu1 %v1820_v16  ;;  %626 = vmatprep.subr.mxu0 %v1821_v17  ;;  %v1871_v16 = vld [vmem:[#allocation69_spill] sm:$0xff] }
  0x76   : > { %711 = vmatprep.subr.mxu1 %v1822_v18  ;;  %627 = vmatpush2.msra.mxu0 %v1823_v19 }
  0x77   : > { %712 = vmatpush2.msra.mxu1 %v1824_v20  ;;  %628 = vmatprep.subr.mxu0 %v1825_v21 }
  0x78   : > { %713 = vmatprep.subr.mxu1 %v1826_v22  ;;  %629 = vmatpush2.msra.mxu0 %v1827_v23 }
  0x79   : > { %714 = vmatpush2.msra.mxu1 %v1828_v24  ;;  %630 = vmatprep.subr.mxu0 %v1829_v25 }
  0x7a   : > { %715 = vmatprep.subr.mxu1 %v1830_v26  ;;  %631 = vmatpush2.msra.mxu0 %v1831_v27 }
  0x7b   : > { %716 = vmatpush2.msra.mxu1 %v1832_v28  ;;  %632 = vmatprep.subr.mxu0 %v1833_v29 }
  0x7c   : > { %717 = vmatprep.subr.mxu1 %v1834_v30  ;;  %633 = vmatpush2.msra.mxu0 %v1835_v31 }
  0x7d   : > { %718 = vmatpush2.msra.mxu1 %v1836_v32  ;;  %634 = vmatprep.subr.mxu0 %v1837_v33 }
  0x7e   : > { %719 = vmatprep.subr.mxu1 %v1838_v34  ;;  %635 = vmatpush2.msra.mxu0 %v1839_v35 }
  0x7f   : > { %720 = vmatpush2.msra.mxu1 %v1840_v36  ;;  %636 = vmatprep.subr.mxu0 %v1841_v37 }
  0x80   : > { %721 = vmatprep.subr.mxu1 %v1842_v38  ;;  %637 = vmatpush2.msra.mxu0 %v1843_v39 }
  0x81   : > { %722 = vmatpush2.msra.mxu1 %v1844_v40  ;;  %638 = vmatprep.subr.mxu0 %v1845_v41 }
  0x82   : > { %723 = vmatprep.subr.mxu1 %v1846_v42  ;;  %639 = vmatpush2.msra.mxu0 %v1847_v43 }
  0x83   : > { %724 = vmatpush2.msra.mxu1 %v1848_v44  ;;  %640 = vmatprep.subr.mxu0 %v1849_v45 }
  0x84   : > { %725 = vmatprep.subr.mxu1 %v1850_v46  ;;  %641 = vmatpush2.msra.mxu0 %v1851_v47 }
  0x85   : > { %726 = vmatpush2.msra.mxu1 %v1852_v48  ;;  %642 = vmatprep.subr.mxu0 %v1853_v49 }
  0x86   : > { %727 = vmatprep.subr.mxu1 %v1854_v50  ;;  %643 = vmatpush2.msra.mxu0 %v1855_v0 }
  0x87   : > { %728 = vmatpush2.msra.mxu1 %v1856_v1  ;;  %644 = vmatprep.subr.mxu0 %v1857_v2 }
  0x88   : > { %729 = vmatprep.subr.mxu1 %v1858_v3  ;;  %645 = vmatpush2.msra.mxu0 %v1859_v4 }
  0x89   : > { %730 = vmatpush2.msra.mxu1 %v1860_v5  ;;  %646 = vmatprep.subr.mxu0 %v1861_v6 }
  0x8a   : > { %731 = vmatprep.subr.mxu1 %v1862_v7  ;;  %647 = vmatpush2.msra.mxu0 %v1863_v8 }
  0x8b   : > { %732 = vmatpush2.msra.mxu1 %v1864_v9  ;;  %648 = vmatprep.subr.mxu0 %v1865_v10 }
  0x8c   : > { %733 = vmatprep.subr.mxu1 %v1866_v11  ;;  %649 = vmatpush2.msra.mxu0 %v1867_v12 }
  0x8d   : > { %734 = vmatpush2.msra.mxu1 %v1868_v13  ;;  %650 = vmatprep.subr.mxu0 %v1869_v14 }
  0x8e   : > { %735 = vmatprep.subr.mxu1 %v1870_v15  ;;  %651 = vmatpush2.msra.mxu0 %v1460_v60 }
  0x8f   : > { %736 = vmatpush2.msra.mxu1 %v1871_v16  ;;  %652 = vmatprep.subr.mxu0 %v1470_v58 }
  0x90   : > { %737 = vmatprep.subr.mxu1 %v1473_v61  ;;  %653 = vmatpush2.msra.mxu0 %v1480_v62 }
  0x91   : > { %738 = vmatpush2.msra.mxu1 %v1483_v52  ;;  %654 = vmatprep.subr.mxu0 %v1488_v57 }
  0x92   : > { %739 = vmatprep.subr.mxu1 %v1491_v54  ;;  %655 = vmatpush2.msra.mxu0 %v1500_v59 }
  0x93   : > { %656 = vmatprep.mubr.f32.mxu0 %v1504_v56  ;;  %740 = vmatpush2.msra.mxu1 %v1509_v55 }
  0x94   : > { %741 = vmatprep.mubr.f32.mxu1 %v1495_v51  ;;  %657 = vmatmul.mubr.f32.vlgmr.msra.gmra.mxu0 %v1475_v63 }
  0x95   : > { %742 = vmatmul.mubr.f32.vlgmr.msra.gmra.mxu1 %v1465_v53 }
 0x112   : > { %v505_v58 = vpop.f32.mrf.mxu0 }
 0x113   : > { %v587_v60 = vpop.f32.mrf.mxu1 }
 0x114   : > { %v663_v52 = vsub.f32 %v505_v58, %v587_v60  ;;  %v507_v61 = vpop.f32.mrf.mxu0 }
 0x115   : > { %v589_v57 = vpop.f32.mrf.mxu1 }
 0x116   : > { %v664_v62 = vsub.f32 %v507_v61, %v589_v57 }
 0x118   : > { %v667_v54 = vcombine.low %v663_v52, %v664_v62 }
 0x11a   : > { %903 = vst.sshfl [vmem:[%s292_s11] sm:$0x33 pattern:$0x76325410] %v667_v54 }
 0x154   : > { %v658_v55 = vpop.f32.mrf.mxu0 }
 0x155   : > { %v743_v56 = vpop.f32.mrf.mxu1 }
 0x156   : > { %v660_v51 = vpop.f32.mrf.mxu0  ;;  %v744_v63 = vadd.f32 %v743_v56, %v658_v55 }
 0x157   : > { %v745_v59 = vpop.f32.mrf.mxu1 }
 0x158   : > { %v746_v17 = vadd.f32 %v745_v59, %v660_v51 }
 0x15a   : > { %v750_v53 = vcombine.low %v744_v63, %v746_v17 }
 0x15c   : > { %904 = vst.sshfl [vmem:[%s297_s14] sm:$0x33 pattern:$0x76325410] %v750_v53 }
 0x15d PF: > { %s16_s18 = sadd.s32 1, %s927_s18  }
 0x15e   : > { %p13_p4 = scmp.ge.s32.totalorder %s16_s18, 4  }
 0x160   :  { %15 = sbr.rel (!%p13_p4) target bundleno = 1 (0x1), region = 87 }

// kernel: reverse.8
= control target key start
LH: loop header
LB: loop body
LE: loop exit
PB: predicated region body
PF: predicated region fallthrough
CT: control target
= control target key end

     0   :  { %s344_s0 = inlined_call_operand.vmem [shape: f32[16,2,16,7], index: 0, kind: input, shape index: {}]   ;;  %s345_s1 = inlined_call_operand.vmem [shape: f32[16,2,16,7], index: 1, kind: output, shape index: {}]  }
   0x1   :  { %v112_v0 = vld [vmem:[%s344_s0 + $0x60] sm:$0xff]  ;;  %v113_v1 = vld [vmem:[%s344_s0 + $0xd0] sm:$0xff]  ;;  %v138_v14 = vld [vmem:[%s344_s0 + $0x68] sm:$0xff] }
   0x2   :  { %v115_v2 = vld [vmem:[%s344_s0 + $0x50] sm:$0xff]  ;;  %4 = vst [vmem:[%s345_s1] sm:$0xff] %v112_v0  ;;  %114 = vst [vmem:[%s345_s1 + $0x70] sm:$0xff] %v113_v1  ;;  %v117_v3 = vld [vmem:[%s344_s0 + $0xc0] sm:$0xff] }
   0x3   :  { %116 = vst [vmem:[%s345_s1 + $0x10] sm:$0xff] %v115_v2  ;;  %v119_v4 = vld [vmem:[%s344_s0 + $0x40] sm:$0xff]  ;;  %v121_v5 = vld [vmem:[%s344_s0 + $0xb0] sm:$0xff]  ;;  %118 = vst [vmem:[%s345_s1 + $0x80] sm:$0xff] %v117_v3 }
   0x4   :  { %120 = vst [vmem:[%s345_s1 + $0x20] sm:$0xff] %v119_v4  ;;  %122 = vst [vmem:[%s345_s1 + $0x90] sm:$0xff] %v121_v5  ;;  %v123_v6 = vld [vmem:[%s344_s0 + $0x30] sm:$0xff]  ;;  %v125_v7 = vld [vmem:[%s344_s0 + $0xa0] sm:$0xff] }
   0x5   :  { %v127_v8 = vld [vmem:[%s344_s0 + $0x20] sm:$0xff]  ;;  %124 = vst [vmem:[%s345_s1 + $0x30] sm:$0xff] %v123_v6  ;;  %126 = vst [vmem:[%s345_s1 + $0xa0] sm:$0xff] %v125_v7  ;;  %v129_v9 = vld [vmem:[%s344_s0 + $0x90] sm:$0xff] }
   0x6   :  { %128 = vst [vmem:[%s345_s1 + $0x40] sm:$0xff] %v127_v8  ;;  %v131_v10 = vld [vmem:[%s344_s0 + $0x10] sm:$0xff]  ;;  %v133_v11 = vld [vmem:[%s344_s0 + $0x80] sm:$0xff]  ;;  %130 = vst [vmem:[%s345_s1 + $0xb0] sm:$0xff] %v129_v9 }
   0x7   :  { %132 = vst [vmem:[%s345_s1 + $0x50] sm:$0xff] %v131_v10  ;;  %134 = vst [vmem:[%s345_s1 + $0xc0] sm:$0xff] %v133_v11  ;;  %v49_v12 = vld [vmem:[%s344_s0] sm:$0xff]  ;;  %v136_v13 = vld [vmem:[%s344_s0 + $0x70] sm:$0xff] }
   0x8   :  { %135 = vst [vmem:[%s345_s1 + $0x60] sm:$0xff] %v49_v12  ;;  %137 = vst [vmem:[%s345_s1 + $0xd0] sm:$0xff] %v136_v13  ;;  %v140_v15 = vld [vmem:[%s344_s0 + $0xd8] sm:$0xff]  ;;  %v144_v17 = vld [vmem:[%s344_s0 + $0xc8] sm:$0xff] }
   0x9   :  { %139 = vst [vmem:[%s345_s1 + $0x8] sm:$0xff] %v138_v14  ;;  %v142_v16 = vld [vmem:[%s344_s0 + $0x58] sm:$0xff]  ;;  %141 = vst [vmem:[%s345_s1 + $0x78] sm:$0xff] %v140_v15  ;;  %v146_v18 = vld [vmem:[%s344_s0 + $0x48] sm:$0xff] }
   0xa   :  { %143 = vst [vmem:[%s345_s1 + $0x18] sm:$0xff] %v142_v16  ;;  %145 = vst [vmem:[%s345_s1 + $0x88] sm:$0xff] %v144_v17  ;;  %v148_v19 = vld [vmem:[%s344_s0 + $0xb8] sm:$0xff]  ;;  %v152_v21 = vld [vmem:[%s344_s0 + $0xa8] sm:$0xff] }
   0xb   :  { %v150_v20 = vld [vmem:[%s344_s0 + $0x38] sm:$0xff]  ;;  %147 = vst [vmem:[%s345_s1 + $0x28] sm:$0xff] %v146_v18  ;;  %149 = vst [vmem:[%s345_s1 + $0x98] sm:$0xff] %v148_v19  ;;  %v154_v22 = vld [vmem:[%s344_s0 + $0x28] sm:$0xff] }
   0xc   :  { %151 = vst [vmem:[%s345_s1 + $0x38] sm:$0xff] %v150_v20  ;;  %v156_v23 = vld [vmem:[%s344_s0 + $0x98] sm:$0xff]  ;;  %153 = vst [vmem:[%s345_s1 + $0xa8] sm:$0xff] %v152_v21  ;;  %v160_v25 = vld [vmem:[%s344_s0 + $0x88] sm:$0xff] }
   0xd   :  { %155 = vst [vmem:[%s345_s1 + $0x48] sm:$0xff] %v154_v22  ;;  %157 = vst [vmem:[%s345_s1 + $0xb8] sm:$0xff] %v156_v23  ;;  %v158_v24 = vld [vmem:[%s344_s0 + $0x18] sm:$0xff]  ;;  %v162_v26 = vld [vmem:[%s344_s0 + $0x8] sm:$0xff] }
   0xe   :  { %159 = vst [vmem:[%s345_s1 + $0x58] sm:$0xff] %v158_v24  ;;  %161 = vst [vmem:[%s345_s1 + $0xc8] sm:$0xff] %v160_v25  ;;  %v164_v27 = vld [vmem:[%s344_s0 + $0x78] sm:$0xff] }
   0xf   :  { %163 = vst [vmem:[%s345_s1 + $0x68] sm:$0xff] %v162_v26  ;;  %165 = vst [vmem:[%s345_s1 + $0xd8] sm:$0xff] %v164_v27 }

// kernel: fno2d_forward.11
= control target key start
LH: loop header
LB: loop body
LE: loop exit
PB: predicated region body
PF: predicated region fallthrough
CT: control target
= control target key end

     0   :  { %s687_s15 = smov 0   ;;  %s689_s16 = smov 0   ;;  %s779_s0 = inlined_call_operand.vmem [shape: f32[16,512], index: 0, kind: input, shape index: {}]   ;;  %s780_s1 = inlined_call_operand.vmem [shape: f32[16,512], index: 1, kind: input, shape index: {}]   ;;  %s781_s2 = inlined_call_operand.vmem [shape: f32[16,16], index: 2, kind: input, shape index: {}]   ;;  %s782_s3 = inlined_call_operand.vmem [shape: f32[16,1], index: 3, kind: input, shape index: {}]   ;;  %s783_s4 = inlined_call_operand.vmem [shape: f32[16,512], index: 4, kind: output, shape index: {}]  }
   0x1   :  { %s691_s17 = smov 0  }
   0x2 LB: > { %s576_s18 = sadd.s32 4294967295, %s659_s17   ;;  %s704_s19 = sadd.s32 1, %s659_s17   ;;  %s659_s17 = sphi %s691_s17, %s788_s17   ;;  %s655_s16 = sphi %s689_s16, %s787_s16   ;;  %s651_s15 = sphi %s687_s15, %s786_s15  }
   0x3   : > { %s18_s20 = ssub.s32 %s659_s17, %s704_s19  ;;  %s21_s21 = sadd.s32 1, %s655_s16 }
   0x4   : > { %p19_p0 = scmp.eq.s32.totalorder %s18_s20, 0  ;;  %p28_p1 = scmp.ne.s32.totalorder %s655_s16, %s651_s15 }
   0x5   : > { %p29_p2 = scmp.eq.s32.totalorder %s659_s17, 0  ;;  %p126_p3 = scmp.eq.s32.totalorder %s576_s18, 3 }
   0x6   : > { %s715_s22 = scalar_select %p19_p0, %s655_s16, %s21_s21  }
   0x7   : > { %p717_p4 = por %p29_p2, %p28_p1  ;;  %p721_p5 = por %p126_p3, %p28_p1 }
   0x8   : > { %p579_p6 = scmp.ge.s32.totalorder %s659_s17, 4 }
   0xa   : > { %154 = sbr.rel (%p579_p6) target bundleno = 27 (0x1b), region = 24 }
   0xf   : > { %157 = sbr.rel (!%p717_p4) target bundleno = 21 (0x15), region = 28  ;;  %s159_s25 = sand.u32 (%p717_p4), 1, %s655_s16  }
  0x10   : > { %s581_s26 = sshll.u32 (%p717_p4), %s659_s17, 3  ;;  %s580_s27 = sshll.u32 (%p717_p4), %s159_s25, 4 }
  0x11   : > { %s163_s30 = scalar_lea.vmem (%p717_p4), %s779_s0, %s581_s26  ;;  %s161_s5 = scalar_lea.vmem (%p717_p4), [#allocation2], %s580_s27 }
  0x12   : > { %v194_v0 = vld [vmem:[%s163_s30] sm:$0xff] (%p717_p4) }
  0x13   : > { %v196_v1 = vld [vmem:[%s163_s30 + $0x20] sm:$0xff] (%p717_p4)  ;;  %195 = vst [vmem:[%s161_s5] sm:$0xff] (%p717_p4), %v194_v0 }
  0x14   : > { %197 = vst [vmem:[%s161_s5 + $0x8] sm:$0xff] %v196_v1 }
  0x15 PF: > { %203 = sbr.rel (!%p717_p4) target bundleno = 27 (0x1b), region = 66  ;;  %s205_s6 = sand.u32 (%p717_p4), 1, %s655_s16  }
  0x16   : > { %s583_s7 = sshll.u32 (%p717_p4), %s659_s17, 3  ;;  %s582_s8 = sshll.u32 (%p717_p4), %s205_s6, 4 }
  0x17   : > { %s209_s11 = scalar_lea.vmem (%p717_p4), %s780_s1, %s583_s7  ;;  %s207_s12 = scalar_lea.vmem (%p717_p4), [#allocation3], %s582_s8 }
  0x18   : > { %v240_v2 = vld [vmem:[%s209_s11] sm:$0xff] (%p717_p4) }
  0x19   : > { %v242_v3 = vld [vmem:[%s209_s11 + $0x20] sm:$0xff] (%p717_p4)  ;;  %241 = vst [vmem:[%s207_s12] sm:$0xff] (%p717_p4), %v240_v2 }
  0x1a   : > { %243 = vst [vmem:[%s207_s12 + $0x8] sm:$0xff] %v242_v3 }
  0x1b PF: > { %p584_p7 = scmp.ge.s32.totalorder %s659_s17, 1  ;;  %p248_p8 = scmp.lt.s32.totalorder %s659_s17, 5 }
  0x1d   : > { %p249_p9 = pnand %p584_p7, %p248_p8 }
  0x1e   : > { %s255_s13 = sand.u32 (!%p249_p9), 1, %s651_s15  }
  0x1f   : > { %252 = sbr.rel (%p249_p9) target bundleno = 300 (0x12c), region = 104  ;;  %s749_s25 = sshll.u32 (!%p249_p9), %s255_s13, 4 }
  0x20   : > { %s264_s26 = scalar_lea.vmem (!%p249_p9), [#allocation3], %s749_s25  ;;  %s257_s30 = scalar_lea.vmem (!%p249_p9), [#allocation2], %s749_s25 }
  0x21   : > { %s289_s5 = scalar_lea.vmem (!%p249_p9), [#allocation4], %s749_s25 }
  0x24   : > { %v290_v4 = vld [vmem:[%s781_s2] sm:$0xff]  ;;  %vm294_vm0 = vcmask 130048   ;;  %v661_v6 = vmov 0   ;;  %v293_v7 = vld [vmem:[%s264_s26 + $0x8] sm:$0xff]  ;;  %s593_s6 = sshll.u32 (%p721_p5), %s576_s18, 3 }
  0x25   : > { %v380_v5 = vld [vmem:[%s782_s3] sm:$0xff]  ;;  %604 = vmatprep.mubr.msk.f32.mxu0 %vm294_vm0, %v290_v4  ;;  %632 = vset.pattern.permute.xlu0 %v661_v6  ;;  %v381_v9 = vld [vmem:[%s782_s3 + $0x8] sm:$0xff]  ;;  %s464_s9 = scalar_lea.vmem (%p721_p5), %s783_s4, %s593_s6 }
  0x26   : > { %384 = vperm.xlu0 %632, %v380_v5   ;;  %v292_v8 = vld [vmem:[%s264_s26] sm:$0xff]  ;;  %600 = vmatprep.subr.mxu0 %v293_v7  ;;  %v291_v10 = vld [vmem:[%s781_s2 + $0x8] sm:$0xff] }
  0x27   : > { %601 = vmatpush3.msra.mxu0 %v293_v7  ;;  %v377_v12 = vld [vmem:[%s257_s30 + $0x8] sm:$0xff]  ;;  %v376_v14 = vld [vmem:[%s257_s30] sm:$0xff] }
  0x28   : > { %602 = vmatprep.subr.mxu0 %v292_v8 }
  0x29   : > { %603 = vmatpush3.msra.mxu0 %v292_v8 }
  0x2a   : > { %389 = vperm.xlu0 %632, %v381_v9   ;;  %605 = vmatmul.mubr.msk.f32.vlgmr.msra.gmra.mxu0 %vm294_vm0, %v291_v10 }
  0xa1   : > { %v385_v11 = vpop.permute.xlu0 %384 }
  0xa5   : > { %v390_v16 = vpop.permute.xlu0 %389 }
  0xea   : > { %v606_v13 = vpop.f32.mrf.mxu0 }
  0xeb   : > { %v379_v15 = vadd.f32 %v606_v13, %v377_v12 }
  0xec   : > { %v367_v17 = vpop.f32.mrf.mxu0 }
  0xed   : > { %v393_v18 = vadd.f32 %v390_v16, %v379_v15  ;;  %v378_v19 = vadd.f32 %v376_v14, %v367_v17 }
  0xef   : > { %v397_v20 = vmul.f32 0.70710677, %v393_v18  ;;  %v392_v21 = vadd.f32 %v385_v11, %v378_v19  ;;  %v395_v8 = vmul.f32 0.5, %v393_v18 }
  0xf1   : > { %v591_v22 = vclamps-f32 %v397_v20, 4.0  ;;  %v396_v23 = vmul.f32 0.70710677, %v392_v21  ;;  %v394_v12 = vmul.f32 0.5, %v392_v21 }
  0xf3   : > { %v403_v24 = vmul.f32 %v591_v22, %v591_v22  ;;  %v590_v25 = vclamps-f32 %v396_v23, 4.0 }
  0xf5   : > { %v421_v26 = vmul.f32 -1.1791603e-07, %v403_v24  ;;  %v402_v27 = vmul.f32 %v590_v25, %v590_v25  ;;  %v405_v30 = vmul.f32 0.00022905065, %v403_v24 }
  0xf7   : > { %v423_v28 = vadd.f32 2.3547966e-05, %v421_v26  ;;  %v420_v29 = vmul.f32 -1.1791603e-07, %v402_v27  ;;  %v404_v34 = vmul.f32 0.00022905065, %v402_v27 }
  0xf8   : > { %v407_v36 = vadd.f32 0.003408291, %v405_v30 }
  0xf9   : > { %v425_v31 = vmul.f32 %v423_v28, %v403_v24  ;;  %v422_v32 = vadd.f32 2.3547966e-05, %v420_v29  ;;  %v406_v40 = vadd.f32 0.003408291, %v404_v34 }
  0xfa   : > { %v409_v42 = vmul.f32 %v407_v36, %v403_v24 }
  0xfb   : > { %v427_v33 = vadd.f32 0.0010179626, %v425_v31  ;;  %v424_v35 = vmul.f32 %v422_v32, %v402_v27  ;;  %v408_v46 = vmul.f32 %v406_v40, %v402_v27 }
  0xfc   : > { %v411_v48 = vadd.f32 0.050955694, %v409_v42 }
  0xfd   : > { %v429_v37 = vmul.f32 %v427_v33, %v403_v24  ;;  %v426_v38 = vadd.f32 0.0010179626, %v424_v35  ;;  %v410_v52 = vadd.f32 0.050955694, %v408_v46 }
  0xfe   : > { %v413_v54 = vmul.f32 %v411_v48, %v403_v24 }
  0xff   : > { %v431_v39 = vadd.f32 0.01407047, %v429_v37  ;;  %v428_v41 = vmul.f32 %v426_v38, %v402_v27  ;;  %v412_v58 = vmul.f32 %v410_v52, %v402_v27 }
 0x100   : > { %v415_v60 = vadd.f32 0.18520832, %v413_v54 }
 0x101   : > { %v433_v43 = vmul.f32 %v431_v39, %v403_v24  ;;  %v430_v44 = vadd.f32 0.01407047, %v428_v41  ;;  %v414_v62 = vadd.f32 0.18520832, %v412_v58 }
 0x102   : > { %v417_v63 = vmul.f32 %v415_v60, %v403_v24 }
 0x103   : > { %v435_v45 = vadd.f32 0.11098505, %v433_v43  ;;  %v432_v47 = vmul.f32 %v430_v44, %v402_v27  ;;  %v416_v0 = vmul.f32 %v414_v62, %v402_v27 }
 0x104   : > { %v419_v1 = vadd.f32 1.1283791, %v417_v63 }
 0x105   : > { %v437_v49 = vmul.f32 %v435_v45, %v403_v24  ;;  %v434_v50 = vadd.f32 0.11098505, %v432_v47  ;;  %v418_v2 = vadd.f32 1.1283791, %v416_v0 }
 0x106   : > { %v445_v3 = vmul.f32 %v591_v22, %v419_v1 }
 0x107   : > { %v439_v51 = vadd.f32 0.49746925, %v437_v49  ;;  %v436_v53 = vmul.f32 %v434_v50, %v402_v27  ;;  %v444_v6 = vmul.f32 %v590_v25, %v418_v2 }
 0x109   : > { %v441_v55 = vmul.f32 %v439_v51, %v403_v24  ;;  %v438_v56 = vadd.f32 0.49746925, %v436_v53 }
 0x10b   : > { %v443_v57 = vadd.f32 1.0, %v441_v55  ;;  %v440_v59 = vmul.f32 %v438_v56, %v402_v27 }
 0x10d   : > { %633 = vrcp.f32 %v443_v57  ;;  %v442_v61 = vadd.f32 1.0, %v440_v59 }
 0x10f   : > { %635 = vrcp.f32 %v442_v61 }
 0x11a   : > { %v634_v4 = vpop.eup %633 }
 0x11b   : > { %v449_v5 = vmul.f32 %v634_v4, %v445_v3 }
 0x11c   : > { %v636_v7 = vpop.eup %635 }
 0x11d   : > { %v451_v9 = vadd.f32 1.0, %v449_v5  ;;  %v447_v10 = vmul.f32 %v636_v7, %v444_v6 }
 0x11f   : > { %v453_v11 = vmul.f32 %v451_v9, %v395_v8  ;;  %v450_v13 = vadd.f32 1.0, %v447_v10  ;;  %462 = sbr.rel (!%p721_p5) target bundleno = 300 (0x12c), region = 116 }
 0x121   : > { %455 = vst [vmem:[%s289_s5 + $0x8] sm:$0xff] %v453_v11  ;;  %v452_v14 = vmul.f32 %v450_v13, %v394_v12 }
 0x123   : > { %454 = vst [vmem:[%s289_s5] sm:$0xff] %v452_v14 }
 0x128   : > { %v497_v16 = vld [vmem:[%s289_s5 + $0x8] sm:$0xff] }
 0x129   : > { %498 = vst [vmem:[%s464_s9 + $0x20] sm:$0xff] %v497_v16 }
 0x12a   : > { %v495_v15 = vld [vmem:[%s289_s5] sm:$0xff] }
 0x12b   : > { %496 = vst [vmem:[%s464_s9] sm:$0xff] %v495_v15 }
 0x12c PF: > { %p11_p10 = scmp.ge.s32.totalorder %s704_s19, 6   ;;  %s786_s15 = smov %s655_s16 }
 0x12d   : > { %s787_s16 = smov %s715_s22  ;;  %s788_s17 = smov %s704_s19 }
 0x12e   :  { %13 = sbr.rel (!%p11_p10) target bundleno = 2 (0x2), region = 193 }

// kernel: fno2d_forward.17
= control target key start
LH: loop header
LB: loop body
LE: loop exit
PB: predicated region body
PF: predicated region fallthrough
CT: control target
= control target key end

     0   :  { %s2364_s0 = inlined_call_operand.vmem [shape: f32[16,512], index: 0, kind: input, shape index: {}]   ;;  %s2365_s1 = inlined_call_operand.vmem [shape: f32[16,512], index: 1, kind: input, shape index: {}]   ;;  %s2366_s2 = inlined_call_operand.vmem [shape: f32[16,16], index: 2, kind: input, shape index: {}]   ;;  %s2367_s3 = inlined_call_operand.vmem [shape: f32[16,1], index: 3, kind: input, shape index: {}]   ;;  %s2368_s4 = inlined_call_operand.vmem [shape: f32[128,16], index: 4, kind: input, shape index: {}]   ;;  %s2369_s5 = inlined_call_operand.vmem [shape: f32[128,1], index: 5, kind: input, shape index: {}]   ;;  %s2370_s6 = inlined_call_operand.vmem [shape: f32[1,128], index: 6, kind: input, shape index: {}]   ;;  %s2371_s7 = inlined_call_operand.<no memory space> [shape: f32[1,1], index: 7, kind: input, shape index: {}]   ;;  %s2372_s8 = inlined_call_operand.vmem [shape: f32[1,512], index: 8, kind: output, shape index: {}]  }
   0x1   :  { %v13_v0 = vstv %s2371_s7 }
   0x2   :  { %14 = vst [vmem:[#allocation2] sm:$0x1] %v13_v0 }
   0x3   :  { %s1736_s29 = smov 0   ;;  %s1738_s30 = smov 0  }
   0x4   :  { %s1740_s9 = smov 0  }
   0x5 LB: > { %s1444_s7 = sadd.s32 4294967295, %s1683_s9   ;;  %s1753_s10 = sadd.s32 1, %s1683_s9   ;;  %s1683_s9 = sphi %s1740_s9, %s2466_s9   ;;  %s1679_s30 = sphi %s1738_s30, %s2465_s30   ;;  %s1675_s29 = sphi %s1736_s29, %s2464_s29  }
   0x6   : > { %s24_s11 = ssub.s32 %s1683_s9, %s1753_s10  ;;  %s27_s12 = sadd.s32 1, %s1679_s30 }
   0x7   : > { %p25_p0 = scmp.eq.s32.totalorder %s24_s11, 0  ;;  %p34_p1 = scmp.ne.s32.totalorder %s1679_s30, %s1675_s29 }
   0x8   : > { %p35_p2 = scmp.eq.s32.totalorder %s1683_s9, 0  ;;  %p1447_p4 = scmp.ge.s32.totalorder %s1683_s9, 4 }
   0x9   : > { %s1762_s13 = scalar_select %p25_p0, %s1679_s30, %s27_s12  }
   0xa   : > { %p1764_p3 = por %p35_p2, %p34_p1  ;;  %256 = sbr.rel (%p1447_p4) target bundleno = 27 (0x1b), region = 40 }
   0xf   : > { %259 = sbr.rel (!%p1764_p3) target bundleno = 21 (0x15), region = 44  ;;  %s261_s15 = sand.u32 (%p1764_p3), 1, %s1679_s30  }
  0x10   : > { %s1449_s16 = sshll.u32 (%p1764_p3), %s1683_s9, 3  ;;  %s1448_s17 = sshll.u32 (%p1764_p3), %s261_s15, 4 }
  0x11   : > { %s265_s20 = scalar_lea.vmem (%p1764_p3), %s2364_s0, %s1449_s16  ;;  %s263_s21 = scalar_lea.vmem (%p1764_p3), [#allocation3], %s1448_s17 }
  0x12   : > { %v296_v1 = vld [vmem:[%s265_s20] sm:$0xff] (%p1764_p3) }
  0x13   : > { %v298_v2 = vld [vmem:[%s265_s20 + $0x20] sm:$0xff] (%p1764_p3)  ;;  %297 = vst [vmem:[%s263_s21] sm:$0xff] (%p1764_p3), %v296_v1 }
  0x14   : > { %299 = vst [vmem:[%s263_s21 + $0x8] sm:$0xff] %v298_v2 }
  0x15 PF: > { %305 = sbr.rel (!%p1764_p3) target bundleno = 27 (0x1b), region = 82  ;;  %s307_s22 = sand.u32 (%p1764_p3), 1, %s1679_s30  }
  0x16   : > { %s1451_s23 = sshll.u32 (%p1764_p3), %s1683_s9, 3  ;;  %s1450_s24 = sshll.u32 (%p1764_p3), %s307_s22, 4 }
  0x17   : > { %s311_s27 = scalar_lea.vmem (%p1764_p3), %s2365_s1, %s1451_s23  ;;  %s309_s28 = scalar_lea.vmem (%p1764_p3), [#allocation4], %s1450_s24 }
  0x18   : > { %v342_v3 = vld [vmem:[%s311_s27] sm:$0xff] (%p1764_p3) }
  0x19   : > { %v344_v4 = vld [vmem:[%s311_s27 + $0x20] sm:$0xff] (%p1764_p3)  ;;  %343 = vst [vmem:[%s309_s28] sm:$0xff] (%p1764_p3), %v342_v3 }
  0x1a   : > { %345 = vst [vmem:[%s309_s28 + $0x8] sm:$0xff] %v344_v4 }
  0x1b PF: > { %p1452_p5 = scmp.ge.s32.totalorder %s1683_s9, 1  ;;  %p350_p6 = scmp.lt.s32.totalorder %s1683_s9, 5 }
  0x1d   : > { %p351_p7 = pnand %p1452_p5, %p350_p6 }
  0x1f   : > { %354 = sbr.rel (%p351_p7) target bundleno = 773 (0x305), region = 120 }
  0x24   : > { %s357_s11 = sand.u32 1, %s1675_s29   ;;  %v402_v5 = vld [vmem:[%s2366_s2] sm:$0xff]  ;;  %vm406_vm0 = vcmask 130048   ;;  %v493_v6 = vld [vmem:[%s2367_s3 + $0x8] sm:$0xff]  ;;  %v1685_v7 = vmov 0   ;;  %v533_v13 = vld [vmem:[%s2369_s5 + $0x58] sm:$0xff] }
  0x25   : > { %s1792_s17 = sshll.u32 %s357_s11, 4  ;;  %1534 = vmatprep.mubr.msk.f32.mxu0 %vm406_vm0, %v402_v5  ;;  %1627 = vset.pattern.permute.xlu0 %v1685_v7  ;;  %v492_v10 = vld [vmem:[%s2367_s3] sm:$0xff]  ;;  %v403_v11 = vld [vmem:[%s2366_s2 + $0x8] sm:$0xff]  ;;  %v529_v15 = vld [vmem:[%s2369_s5 + $0x38] sm:$0xff]  ;;  %vm1687_vm1 = vmmov 0   ;;  %p399_p8 = scmp.lt.s32.totalorder %s1444_s7, 3 }
  0x26   : > { %501 = vperm.xlu0 %1627, %v493_v6   ;;  %1628 = vset.pattern.permute.xlu1 %v1685_v7  ;;  %s366_s18 = scalar_lea.vmem [#allocation4], %s1792_s17  ;;  %v535_v12 = vld [vmem:[%s2369_s5 + $0x68] sm:$0xff]  ;;  %v525_v17 = vld [vmem:[%s2369_s5 + $0x18] sm:$0xff]  ;;  %v1292_v19 = vld [vmem:[#allocation2] sm:$0x1]  ;;  %s359_s22 = scalar_lea.vmem [#allocation3], %s1792_s17 }
  0x27   : > { %v405_v8 = vld [vmem:[%s366_s18 + $0x8] sm:$0xff]  ;;  %v404_v9 = vld [vmem:[%s366_s18] sm:$0xff]  ;;  %s2468_s7 = smov (!%p399_p8, %s1444_s7), 3 }
  0x28   : > { %1530 = vmatprep.subr.mxu0 %v405_v8  ;;  %v531_v14 = vld [vmem:[%s2369_s5 + $0x48] sm:$0xff]  ;;  %v506_v20 = vld [vmem:[%s2368_s4] sm:$0xff]  ;;  %v537_v21 = vld [vmem:[%s2369_s5 + $0x78] sm:$0xff]  ;;  %s401_s21 = scalar_lea.vmem %s2372_s8, %s2468_s7 }
  0x29   : > { %1531 = vmatpush3.msra.mxu0 %v405_v8  ;;  %v527_v16 = vld [vmem:[%s2369_s5 + $0x28] sm:$0xff]  ;;  %1541 = vmatprep.mubr.msk.f32.mxu1 %vm406_vm0, %v506_v20  ;;  %v536_v22 = vld [vmem:[%s2369_s5 + $0x70] sm:$0xff]  ;;  %v534_v23 = vld [vmem:[%s2369_s5 + $0x60] sm:$0xff] }
  0x2a   : > { %1532 = vmatprep.subr.mxu0 %v404_v9  ;;  %496 = vperm.xlu0 %1627, %v492_v10   ;;  %v523_v18 = vld [vmem:[%s2369_s5 + $0x8] sm:$0xff]  ;;  %v532_v24 = vld [vmem:[%s2369_s5 + $0x50] sm:$0xff]  ;;  %v530_v25 = vld [vmem:[%s2369_s5 + $0x40] sm:$0xff] }
  0x2b   : > { %1533 = vmatpush3.msra.mxu0 %v404_v9  ;;  %615 = vperm.xlu1 %1628, %v537_v21   ;;  %v528_v26 = vld [vmem:[%s2369_s5 + $0x30] sm:$0xff]  ;;  %v526_v27 = vld [vmem:[%s2369_s5 + $0x20] sm:$0xff]  ;;  %v507_v40 = vld [vmem:[%s2368_s4 + $0x8] sm:$0xff] }
  0x2c   : > { %1535 = vmatmul.mubr.msk.f32.vlgmr.msra.gmra.mxu0 %vm406_vm0, %v403_v11  ;;  %v524_v28 = vld [vmem:[%s2369_s5 + $0x10] sm:$0xff]  ;;  %v522_v29 = vld [vmem:[%s2369_s5] sm:$0xff]  ;;  %v509_v42 = vld [vmem:[%s2368_s4 + $0x18] sm:$0xff] }
  0x2d   : > { %v489_v31 = vld [vmem:[%s359_s22 + $0x8] sm:$0xff]  ;;  %v488_v33 = vld [vmem:[%s359_s22] sm:$0xff] }
  0x2e   : > { %605 = vperm.xlu0 %1627, %v535_v12   ;;  %v508_v41 = vld [vmem:[%s2368_s4 + $0x10] sm:$0xff]  ;;  %v510_v43 = vld [vmem:[%s2368_s4 + $0x20] sm:$0xff]  ;;  %v511_v44 = vld [vmem:[%s2368_s4 + $0x28] sm:$0xff] }
  0x2f   : > { %610 = vperm.xlu1 %1628, %v536_v22   ;;  %v512_v45 = vld [vmem:[%s2368_s4 + $0x30] sm:$0xff]  ;;  %v513_v46 = vld [vmem:[%s2368_s4 + $0x38] sm:$0xff]  ;;  %v514_v47 = vld [vmem:[%s2368_s4 + $0x40] sm:$0xff] }
  0x30   : > { %v515_v48 = vld [vmem:[%s2368_s4 + $0x48] sm:$0xff]  ;;  %v516_v49 = vld [vmem:[%s2368_s4 + $0x50] sm:$0xff]  ;;  %v517_v50 = vld [vmem:[%s2368_s4 + $0x58] sm:$0xff] }
  0x31   : > { %v518_v51 = vld [vmem:[%s2368_s4 + $0x60] sm:$0xff]  ;;  %v519_v52 = vld [vmem:[%s2368_s4 + $0x68] sm:$0xff]  ;;  %v520_v53 = vld [vmem:[%s2368_s4 + $0x70] sm:$0xff] }
  0x32   : > { %595 = vperm.xlu0 %1627, %v533_v13   ;;  %v521_v54 = vld [vmem:[%s2368_s4 + $0x78] sm:$0xff] }
  0x33   : > { %600 = vperm.xlu1 %1628, %v534_v23  }
  0x36   : > { %585 = vperm.xlu0 %1627, %v531_v14  }
  0x37   : > { %590 = vperm.xlu1 %1628, %v532_v24  }
  0x3a   : > { %575 = vperm.xlu0 %1627, %v529_v15  }
  0x3b   : > { %580 = vperm.xlu1 %1628, %v530_v25  }
  0x3e   : > { %565 = vperm.xlu0 %1627, %v527_v16  }
  0x3f   : > { %570 = vperm.xlu1 %1628, %v528_v26  }
  0x42   : > { %555 = vperm.xlu0 %1627, %v525_v17  }
  0x43   : > { %560 = vperm.xlu1 %1628, %v526_v27  }
  0x46   : > { %545 = vperm.xlu0 %1627, %v523_v18  }
  0x47   : > { %550 = vperm.xlu1 %1628, %v524_v28  }
  0x4a   : > { %1295 = vperm.xlu0 %1627, %v1292_v19  }
  0x4b   : > { %540 = vperm.xlu1 %1628, %v522_v29  }
  0xa1   : > { %v502_v30 = vpop.permute.xlu0 %501 }
  0xa5   : > { %v497_v38 = vpop.permute.xlu0 %496 }
  0xa6   : > { %v1916_v55 = vpop.permute.xlu1 %615 }
  0xa9   : > { %v1920_v57 = vpop.permute.xlu0 %605 }
  0xaa   : > { %v1918_v56 = vpop.permute.xlu1 %610 }
  0xad   : > { %v1924_v59 = vpop.permute.xlu0 %595 }
  0xae   : > { %v1922_v58 = vpop.permute.xlu1 %600 }
  0xb1   : > { %v1928_v61 = vpop.permute.xlu0 %585 }
  0xb2   : > { %v1926_v60 = vpop.permute.xlu1 %590 }
  0xb5   : > { %v576_v63 = vpop.permute.xlu0 %575 }
  0xb6   : > { %v1930_v62 = vpop.permute.xlu1 %580 }
  0xb9   : > { %v566_v1 = vpop.permute.xlu0 %565 }
  0xba   : > { %v1932_v0 = vpop.permute.xlu1 %570 }
  0xbd   : > { %v556_v3 = vpop.permute.xlu0 %555 }
  0xbe   : > { %v561_v2 = vpop.permute.xlu1 %560 }
  0xc1   : > { %v546_v6 = vpop.permute.xlu0 %545 }
  0xc2   : > { %v551_v4 = vpop.permute.xlu1 %550 }
  0xc6   : > { %v541_v8 = vpop.permute.xlu1 %540 }
  0xec   : > { %v1536_v32 = vpop.f32.mrf.mxu0 }
  0xed   : > { %v491_v34 = vadd.f32 %v1536_v32, %v489_v31 }
  0xee   : > { %v479_v35 = vpop.f32.mrf.mxu0 }
  0xef   : > { %v490_v36 = vadd.f32 %v488_v33, %v479_v35  ;;  %v505_v37 = vadd.f32 %v502_v30, %v491_v34 }
  0xf1   : > { %v504_v39 = vadd.f32 %v497_v38, %v490_v36  ;;  %1537 = vmatprep.subr.mxu1 %v505_v37 }
  0xf2   : > { %1538 = vmatpush3.msra.mxu1 %v505_v37 }
  0xf3   : > { %1539 = vmatprep.subr.mxu1 %v504_v39 }
  0xf4   : > { %1540 = vmatpush3.msra.mxu1 %v504_v39 }
  0xf5   : > { %1542 = vmatmul.mubr.msk.f32.vlgmr.msra.gmra.mxu1 %vm406_vm0, %v507_v40 }
  0xf6   : > { %1544 = vmatprep.mubr.msk.f32.mxu1 %vm406_vm0, %v508_v41 }
  0xf9   : > { %1545 = vmatmul.mubr.msk.f32.gmra.mxu1 %vm406_vm0, %v509_v42 }
  0xfa   : > { %1547 = vmatprep.mubr.msk.f32.mxu1 %vm406_vm0, %v510_v43 }
  0xfd   : > { %1548 = vmatmul.mubr.msk.f32.gmra.mxu1 %vm406_vm0, %v511_v44 }
  0xfe   : > { %1550 = vmatprep.mubr.msk.f32.mxu1 %vm406_vm0, %v512_v45 }
 0x101   : > { %1551 = vmatmul.mubr.msk.f32.gmra.mxu1 %vm406_vm0, %v513_v46 }
 0x102   : > { %1553 = vmatprep.mubr.msk.f32.mxu1 %vm406_vm0, %v514_v47 }
 0x105   : > { %1554 = vmatmul.mubr.msk.f32.gmra.mxu1 %vm406_vm0, %v515_v48 }
 0x106   : > { %1556 = vmatprep.mubr.msk.f32.mxu1 %vm406_vm0, %v516_v49 }
 0x109   : > { %1557 = vmatmul.mubr.msk.f32.gmra.mxu1 %vm406_vm0, %v517_v50 }
 0x10a   : > { %1559 = vmatprep.mubr.msk.f32.mxu1 %vm406_vm0, %v518_v51 }
 0x10d   : > { %1560 = vmatmul.mubr.msk.f32.gmra.mxu1 %vm406_vm0, %v519_v52 }
 0x10e   : > { %1562 = vmatprep.mubr.msk.f32.mxu1 %vm406_vm0, %v520_v53 }
 0x111   : > { %1563 = vmatmul.mubr.msk.f32.gmra.mxu1 %vm406_vm0, %v521_v54 }
 0x1b5   : > { %v1543_v5 = vpop.f32.mrf.mxu1 }
 0x1b6   : > { %v1934_v7 = vadd.f32 %v1543_v5, %v546_v6 }
 0x1b7   : > { %v732_v9 = vpop.f32.mrf.mxu1 }
 0x1b8   : > { %2401 = vst [vmem:[#allocation5_spill] sm:$0xff] %v1934_v7  ;;  %v828_v10 = vmul.f32 0.70710677, %v1934_v7  ;;  %v1937_v11 = vadd.f32 %v732_v9, %v541_v8 }
 0x1b9   : > { %v1546_v12 = vpop.f32.mrf.mxu1 }
 0x1ba   : > { %2402 = vst [vmem:[#allocation6_spill] sm:$0xff] %v1937_v11  ;;  %v1939_v13 = vclamps-f32 %v828_v10, 4.0  ;;  %v827_v14 = vmul.f32 0.70710677, %v1937_v11  ;;  %v1942_v15 = vadd.f32 %v1546_v12, %v556_v3 }
 0x1bb   : > { %v742_v17 = vpop.f32.mrf.mxu1 }
 0x1bc   : > { %2403 = vst [vmem:[#allocation7_spill] sm:$0xff] %v1939_v13  ;;  %2404 = vst [vmem:[#allocation8_spill] sm:$0xff] %v1942_v15  ;;  %v1946_v16 = vmul.f32 %v1939_v13, %v1939_v13  ;;  %v1948_v18 = vclamps-f32 %v827_v14, 4.0  ;;  %v830_v19 = vmul.f32 0.70710677, %v1942_v15  ;;  %v1951_v20 = vadd.f32 %v742_v17, %v551_v4 }
 0x1bd   : > { %v1549_v22 = vpop.f32.mrf.mxu1 }
 0x1be   : > { %2405 = vst [vmem:[#allocation9_spill] sm:$0xff] %v1946_v16  ;;  %2406 = vst [vmem:[#allocation10_spill] sm:$0xff] %v1948_v18  ;;  %v1020_v21 = vmul.f32 -1.1791603e-07, %v1946_v16  ;;  %v1956_v23 = vmul.f32 %v1948_v18, %v1948_v18  ;;  %v1958_v24 = vclamps-f32 %v830_v19, 4.0  ;;  %v1961_v27 = vadd.f32 %v1549_v22, %v566_v1 }
 0x1bf   : > { %2407 = vst [vmem:[#allocation11_spill] sm:$0xff] %v1951_v20  ;;  %v829_v25 = vmul.f32 0.70710677, %v1951_v20  ;;  %v752_v28 = vpop.f32.mrf.mxu1  ;;  %v892_v43 = vmul.f32 0.00022905065, %v1946_v16 }
 0x1c0   : > { %2408 = vst [vmem:[#allocation12_spill] sm:$0xff] %v1956_v23  ;;  %2409 = vst [vmem:[#allocation13_spill] sm:$0xff] %v1958_v24  ;;  %v1036_v26 = vadd.f32 2.3547966e-05, %v1020_v21  ;;  %v1019_v29 = vmul.f32 -1.1791603e-07, %v1956_v23  ;;  %v1966_v30 = vmul.f32 %v1958_v24, %v1958_v24  ;;  %v1995_v8 = vadd.f32 %v752_v28, %v561_v2 }
 0x1c1   : > { %2410 = vst [vmem:[#allocation14_spill] sm:$0xff] %v1961_v27  ;;  %v1968_v31 = vclamps-f32 %v829_v25, 4.0  ;;  %v832_v33 = vmul.f32 0.70710677, %v1961_v27  ;;  %v1552_v34 = vpop.f32.mrf.mxu1  ;;  %v908_v53 = vadd.f32 0.003408291, %v892_v43 }
 0x1c2   : > { %2411 = vst [vmem:[#allocation15_spill] sm:$0xff] %v1966_v30  ;;  %v1052_v32 = vmul.f32 %v1036_v26, %v1946_v16  ;;  %v1035_v35 = vadd.f32 2.3547966e-05, %v1019_v29  ;;  %v1022_v36 = vmul.f32 -1.1791603e-07, %v1966_v30  ;;  %v1992_v52 = vadd.f32 %v1552_v34, %v576_v63  ;;  %2415 = vst [vmem:[#allocation19_spill] sm:$0xff] %v1995_v8 }
 0x1c3   : > { %2412 = vst [vmem:[#allocation16_spill] sm:$0xff] %v1968_v31  ;;  %v1975_v37 = vmul.f32 %v1968_v31, %v1968_v31  ;;  %v1977_v39 = vclamps-f32 %v832_v33, 4.0  ;;  %v762_v40 = vpop.f32.mrf.mxu1  ;;  %v894_v46 = vmul.f32 0.00022905065, %v1966_v30  ;;  %v891_v14 = vmul.f32 0.00022905065, %v1956_v23 }
 0x1c4   : > { %v1068_v38 = vadd.f32 0.0010179626, %v1052_v32  ;;  %v1051_v41 = vmul.f32 %v1035_v35, %v1956_v23  ;;  %v1038_v42 = vadd.f32 2.3547966e-05, %v1022_v36  ;;  %2414 = vst [vmem:[#allocation18_spill] sm:$0xff] %v1992_v52  ;;  %v924_v17 = vmul.f32 %v908_v53, %v1946_v16 }
 0x1c5   : > { %2413 = vst [vmem:[#allocation17_spill] sm:$0xff] %v1977_v39  ;;  %v1021_v44 = vmul.f32 -1.1791603e-07, %v1975_v37  ;;  %v1986_v47 = vmul.f32 %v1977_v39, %v1977_v39  ;;  %v1988_v48 = vpop.f32.mrf.mxu1  ;;  %v893_v49 = vmul.f32 0.00022905065, %v1975_v37 }
 0x1c6   : > { %v1084_v45 = vmul.f32 %v1068_v38, %v1946_v16  ;;  %v1067_v50 = vadd.f32 0.0010179626, %v1051_v41  ;;  %v1054_v51 = vmul.f32 %v1038_v42, %v1966_v30  ;;  %v910_v3 = vadd.f32 0.003408291, %v894_v46 }
 0x1c7   : > { %v1037_v54 = vadd.f32 2.3547966e-05, %v1021_v44  ;;  %v1024_v4 = vmul.f32 -1.1791603e-07, %v1986_v47  ;;  %v772_v5 = vpop.f32.mrf.mxu1  ;;  %v909_v6 = vadd.f32 0.003408291, %v893_v49 }
 0x1c8   : > { %v1100_v1 = vadd.f32 0.01407047, %v1084_v45  ;;  %v1083_v9 = vmul.f32 %v1067_v50, %v1956_v23  ;;  %v1070_v10 = vadd.f32 0.0010179626, %v1054_v51  ;;  %v834_v12 = vmul.f32 0.70710677, %v1992_v52 }
 0x1c9   : > { %v1053_v63 = vmul.f32 %v1037_v54, %v1975_v37  ;;  %v926_v21 = vmul.f32 %v910_v3, %v1966_v30  ;;  %v1040_v22 = vadd.f32 2.3547966e-05, %v1024_v4  ;;  %v1558_v25 = vpop.f32.mrf.mxu1  ;;  %v925_v2 = vmul.f32 %v909_v6, %v1975_v37 }
 0x1ca   : > { %v1116_v19 = vmul.f32 %v1100_v1, %v1946_v16  ;;  %v831_v26 = vmul.f32 0.70710677, %v1995_v8  ;;  %v1099_v28 = vadd.f32 0.01407047, %v1083_v9  ;;  %v1086_v29 = vmul.f32 %v1070_v10, %v1966_v30 }
 0x1cb   : > { %v2007_v32 = vclamps-f32 %v834_v12, 4.0  ;;  %v907_v33 = vadd.f32 0.003408291, %v891_v14  ;;  %v1069_v34 = vadd.f32 0.0010179626, %v1053_v63  ;;  %v1056_v41 = vmul.f32 %v1040_v22, %v1986_v47  ;;  %v782_v42 = vpop.f32.mrf.mxu1 }
 0x1cc   : > { %v940_v35 = vadd.f32 0.050955694, %v924_v17  ;;  %v1132_v36 = vadd.f32 0.11098505, %v1116_v19  ;;  %v942_v38 = vadd.f32 0.050955694, %v926_v21  ;;  %v1115_v45 = vmul.f32 %v1099_v28, %v1956_v23 }
 0x1cd   : > { %2416 = vst [vmem:[#allocation20_spill] sm:$0xff] %v2007_v32  ;;  %v941_v43 = vadd.f32 0.050955694, %v925_v2  ;;  %v2010_v44 = vclamps-f32 %v831_v26, 4.0  ;;  %v1102_v46 = vadd.f32 0.01407047, %v1086_v29  ;;  %v2015_v49 = vmul.f32 %v2007_v32, %v2007_v32  ;;  %v1561_v4 = vpop.f32.mrf.mxu1 }
 0x1ce   : > { %v923_v50 = vmul.f32 %v907_v33, %v1956_v23  ;;  %v1085_v51 = vmul.f32 %v1069_v34, %v1975_v37  ;;  %v956_v53 = vmul.f32 %v940_v35, %v1946_v16  ;;  %v1148_v54 = vmul.f32 %v1132_v36, %v1946_v16 }
 0x1cf   : > { %2417 = vst [vmem:[#allocation21_spill] sm:$0xff] %v2010_v44  ;;  %v958_v1 = vmul.f32 %v942_v38, %v1966_v30  ;;  %v1072_v3 = vadd.f32 0.0010179626, %v1056_v41  ;;  %v957_v6 = vmul.f32 %v941_v43, %v1975_v37  ;;  %v2025_v9 = vmul.f32 %v2010_v44, %v2010_v44 }
 0x1d0   : > { %v2028_v10 = vadd.f32 %v1558_v25, %v1924_v59  ;;  %v1131_v12 = vadd.f32 0.11098505, %v1115_v45  ;;  %v1118_v14 = vmul.f32 %v1102_v46, %v1966_v30  ;;  %v1026_v63 = vmul.f32 -1.1791603e-07, %v2015_v49  ;;  %v792_v25 = vpop.f32.mrf.mxu1 }
 0x1d1   : > { %v2033_v17 = vadd.f32 %v762_v40, %v1932_v0  ;;  %v939_v19 = vadd.f32 0.050955694, %v923_v50  ;;  %v1101_v21 = vadd.f32 0.01407047, %v1085_v51  ;;  %v2036_v22 = vadd.f32 %v782_v42, %v1926_v60 }
 0x1d2   : > { %2418 = vst [vmem:[#allocation22_spill] sm:$0xff] %v2028_v10  ;;  %v2038_v2 = vadd.f32 0.18520832, %v956_v53  ;;  %v1164_v26 = vadd.f32 0.49746925, %v1148_v54  ;;  %v1088_v59 = vmul.f32 %v1072_v3, %v1986_v47  ;;  %v2048_v0 = vadd.f32 %v1988_v48, %v1928_v61  ;;  %v1564_v50 = vpop.f32.mrf.mxu1 }
 0x1d3   : > { %2419 = vst [vmem:[#allocation23_spill] sm:$0xff] %v2033_v17  ;;  %2420 = vst [vmem:[#allocation24_spill] sm:$0xff] %v2036_v22  ;;  %v2040_v28 = vadd.f32 0.18520832, %v958_v1  ;;  %v2043_v29 = vadd.f32 0.18520832, %v957_v6  ;;  %v1147_v60 = vmul.f32 %v1131_v12, %v1956_v23  ;;  %v1117_v38 = vmul.f32 %v1101_v21, %v1975_v37 }
 0x1d4   : > { %2421 = vst [vmem:[#allocation25_spill] sm:$0xff] %v2038_v2  ;;  %v1023_v33 = vmul.f32 -1.1791603e-07, %v2025_v9  ;;  %2424 = vst [vmem:[#allocation28_spill] sm:$0xff] %v2048_v0  ;;  %v838_v40 = vmul.f32 0.70710677, %v2028_v10  ;;  %v2055_v41 = vadd.f32 %v772_v5, %v1930_v62  ;;  %v2059_v43 = vadd.f32 %v1561_v4, %v1920_v57 }
 0x1d5   : > { %2422 = vst [vmem:[#allocation26_spill] sm:$0xff] %v2040_v28  ;;  %2423 = vst [vmem:[#allocation27_spill] sm:$0xff] %v2043_v29  ;;  %v1134_v34 = vadd.f32 0.11098505, %v1118_v14  ;;  %v1042_v35 = vadd.f32 2.3547966e-05, %v1026_v63  ;;  %v1180_v61 = vmul.f32 %v1164_v26, %v1946_v16  ;;  %v2064_v46 = vadd.f32 %v792_v25, %v1922_v58 }
 0x1d6   : > { %v833_v36 = vmul.f32 0.70710677, %v2033_v17  ;;  %2425 = vst [vmem:[#allocation29_spill] sm:$0xff] %v2055_v41  ;;  %v837_v42 = vmul.f32 0.70710677, %v2036_v22  ;;  %v2067_v51 = vmul.f32 %v939_v19, %v1956_v23  ;;  %v2070_v5 = vclamps-f32 %v838_v40, 4.0 }
 0x1d7   : > { %v896_v48 = vmul.f32 0.00022905065, %v1986_v47  ;;  %v1104_v45 = vadd.f32 0.01407047, %v1088_v59  ;;  %2426 = vst [vmem:[#allocation30_spill] sm:$0xff] %v2064_v46  ;;  %v1150_v57 = vmul.f32 %v1134_v34, %v1966_v30  ;;  %v1058_v1 = vmul.f32 %v1042_v35, %v2015_v49 }
 0x1d8   : > { %2427 = vst [vmem:[#allocation31_spill] sm:$0xff] %v2067_v51  ;;  %v1039_v53 = vadd.f32 2.3547966e-05, %v1023_v33  ;;  %v836_v62 = vmul.f32 0.70710677, %v2048_v0  ;;  %v2074_v3 = vclamps-f32 %v833_v36, 4.0  ;;  %v2081_v12 = vadd.f32 %v1564_v50, %v1916_v55 }
 0x1d9   : > { %v1163_v54 = vadd.f32 0.49746925, %v1147_v60  ;;  %v835_v4 = vmul.f32 0.70710677, %v2055_v41  ;;  %v2077_v58 = vclamps-f32 %v837_v42, 4.0  ;;  %v2083_v14 = vadd.f32 1.0, %v1180_v61 }
 0x1da   : > { %2428 = vst [vmem:[#allocation32_spill] sm:$0xff] %v2074_v3  ;;  %v840_v6 = vmul.f32 0.70710677, %v2059_v43  ;;  %v1133_v63 = vadd.f32 0.11098505, %v1117_v38  ;;  %v1120_v19 = vmul.f32 %v1104_v45, %v1986_v47  ;;  %v1055_v26 = vmul.f32 %v1039_v53, %v2025_v9 }
 0x1db   : > { %2429 = vst [vmem:[#allocation33_spill] sm:$0xff] %v2083_v14  ;;  %v839_v21 = vmul.f32 0.70710677, %v2064_v46  ;;  %v2088_v59 = vclamps-f32 %v836_v62, 4.0  ;;  %v2092_v25 = vmul.f32 %v2070_v5, %v2070_v5  ;;  %v1179_v55 = vmul.f32 %v1163_v54, %v1956_v23 }
 0x1dc   : > { %v2094_v33 = vclamps-f32 %v840_v6, 4.0  ;;  %v1074_v40 = vadd.f32 0.0010179626, %v1058_v1  ;;  %v2099_v60 = vmul.f32 %v2074_v3, %v2074_v3  ;;  %v2103_v35 = vclamps-f32 %v835_v4, 4.0 }
 0x1dd   : > { %v2101_v34 = vclamps-f32 %v839_v21, 4.0  ;;  %v2107_v36 = vmul.f32 %v2077_v58, %v2077_v58  ;;  %v842_v42 = vmul.f32 0.70710677, %v2081_v12  ;;  %v1166_v61 = vadd.f32 0.49746925, %v1150_v57 }
 0x1de   : > { %2430 = vst [vmem:[#allocation34_spill] sm:$0xff] %v2103_v35  ;;  %v2111_v38 = vmul.f32 %v2094_v33, %v2094_v33  ;;  %v1149_v45 = vmul.f32 %v1133_v63, %v1975_v37  ;;  %v912_v50 = vadd.f32 0.003408291, %v896_v48  ;;  %v1136_v62 = vadd.f32 0.11098505, %v1120_v19 }
 0x1df   : > { %v2117_v53 = vmul.f32 %v2101_v34, %v2101_v34  ;;  %v1071_v54 = vadd.f32 0.0010179626, %v1055_v26  ;;  %v2121_v1 = vmul.f32 %v2088_v59, %v2088_v59  ;;  %v1030_v4 = vmul.f32 -1.1791603e-07, %v2092_v25 }
 0x1e0   : > { %v1090_v6 = vmul.f32 %v1074_v40, %v2015_v49  ;;  %v1025_v21 = vmul.f32 -1.1791603e-07, %v2099_v60  ;;  %v1032_v57 = vmul.f32 -1.1791603e-07, %v2111_v38  ;;  %v2128_v63 = vadd.f32 1.0, %v1179_v55 }
 0x1e1   : > { %v1031_v48 = vmul.f32 -1.1791603e-07, %v2117_v53  ;;  %v2132_v19 = vmul.f32 %v2103_v35, %v2103_v35  ;;  %v1029_v26 = vmul.f32 -1.1791603e-07, %v2107_v36  ;;  %v2135_v11 = vclamps-f32 %v842_v42, 4.0 }
 0x1e2   : > { %2431 = vst [vmem:[#allocation35_spill] sm:$0xff] %v2128_v63  ;;  %v928_v7 = vmul.f32 %v912_v50, %v1986_v47  ;;  %v895_v40 = vmul.f32 0.00022905065, %v2025_v9  ;;  %v898_v20 = vmul.f32 0.00022905065, %v2015_v49  ;;  %v1152_v8 = vmul.f32 %v1136_v62, %v1986_v47 }
 0x1e3   : > { %v1048_v15 = vadd.f32 2.3547966e-05, %v1032_v57  ;;  %v1087_v55 = vmul.f32 %v1071_v54, %v2025_v9  ;;  %v1028_v18 = vmul.f32 -1.1791603e-07, %v2121_v1  ;;  %v1046_v13 = vadd.f32 2.3547966e-05, %v1030_v4 }
 0x1e4   : > { %v1106_v27 = vadd.f32 0.01407047, %v1090_v6  ;;  %v1041_v17 = vadd.f32 2.3547966e-05, %v1025_v21  ;;  %v1047_v42 = vadd.f32 2.3547966e-05, %v1031_v48  ;;  %v1182_v52 = vmul.f32 %v1166_v61, %v1966_v30 }
 0x1e5   : > { %v1064_v31 = vmul.f32 %v1048_v15, %v2111_v38  ;;  %v1027_v50 = vmul.f32 -1.1791603e-07, %v2132_v19  ;;  %v1045_v24 = vadd.f32 2.3547966e-05, %v1029_v26  ;;  %v2148_v57 = vmul.f32 %v2135_v11, %v2135_v11 }
 0x1e6   : > { %v2150_v62 = vadd.f32 0.49746925, %v1149_v45  ;;  %v911_v54 = vadd.f32 0.003408291, %v895_v40  ;;  %v914_v41 = vadd.f32 0.003408291, %v898_v20  ;;  %v1063_v4 = vmul.f32 %v1047_v42, %v2117_v53 }
 0x1e7   : > { %v2153_v6 = vadd.f32 0.050955694, %v928_v7  ;;  %v1103_v21 = vadd.f32 0.01407047, %v1087_v55  ;;  %v1044_v15 = vadd.f32 2.3547966e-05, %v1028_v18  ;;  %v1062_v48 = vmul.f32 %v1046_v13, %v2092_v25  ;;  %v802_v55 = vpop.f32.mrf.mxu1 }
 0x1e8   : > { %v1168_v61 = vadd.f32 0.49746925, %v1152_v8  ;;  %v1122_v44 = vmul.f32 %v1106_v27, %v2015_v49  ;;  %v1057_v26 = vmul.f32 %v1041_v17, %v2099_v60  ;;  %v1080_v23 = vadd.f32 0.0010179626, %v1064_v31 }
 0x1e9   : > { %v2158_v39 = vadd.f32 1.0, %v1182_v52  ;;  %v1043_v45 = vadd.f32 2.3547966e-05, %v1027_v50  ;;  %v1061_v40 = vmul.f32 %v1045_v24, %v2107_v36  ;;  %v1034_v20 = vmul.f32 -1.1791603e-07, %v2148_v57 }
 0x1ea   : > { %v2163_v7 = vmul.f32 %v911_v54, %v2025_v9  ;;  %v930_v18 = vmul.f32 %v914_v41, %v2015_v49  ;;  %v897_v13 = vmul.f32 0.00022905065, %v2099_v60  ;;  %v1079_v8 = vadd.f32 0.0010179626, %v1063_v4 }
 0x1eb   : > { %v1119_v27 = vmul.f32 %v1103_v21, %v2025_v9  ;;  %v1060_v17 = vmul.f32 %v1044_v15, %v2121_v1  ;;  %v1078_v31 = vadd.f32 0.0010179626, %v1062_v48  ;;  %v1050_v52 = vadd.f32 2.3547966e-05, %v1034_v20 }
 0x1ec   : > { %v2170_v42 = vmul.f32 %v1168_v61, %v1986_v47  ;;  %v1138_v24 = vadd.f32 0.11098505, %v1122_v44  ;;  %v1073_v50 = vadd.f32 0.0010179626, %v1057_v26  ;;  %v1096_v54 = vmul.f32 %v1080_v23, %v2111_v38 }
 0x1ed   : > { %v1059_v0 = vmul.f32 %v1043_v45, %v2132_v19  ;;  %v1077_v41 = vadd.f32 0.0010179626, %v1061_v40  ;;  %v906_v2 = vmul.f32 0.00022905065, %v2148_v57  ;;  %v1066_v4 = vmul.f32 %v1050_v52, %v2148_v57 }
 0x1ee   : > { %v2176_v21 = vadd.f32 0.050955694, %v930_v18  ;;  %v913_v15 = vadd.f32 0.003408291, %v897_v13  ;;  %v1095_v48 = vmul.f32 %v1079_v8, %v2117_v53  ;;  %v2180_v20 = vadd.f32 %v802_v55, %v1918_v56 }
 0x1ef   : > { %v1135_v61 = vadd.f32 0.11098505, %v1119_v27  ;;  %v1076_v44 = vadd.f32 0.0010179626, %v1060_v17  ;;  %v1094_v26 = vmul.f32 %v1078_v31, %v2092_v25  ;;  %v1082_v23 = vadd.f32 0.0010179626, %v1066_v4 }
 0x1f0   : > { %v1154_v45 = vmul.f32 %v1138_v24, %v2015_v49  ;;  %v1089_v40 = vmul.f32 %v1073_v50, %v2099_v60  ;;  %v900_v16 = vmul.f32 0.00022905065, %v2121_v1  ;;  %v1112_v52 = vadd.f32 0.01407047, %v1096_v54 }
 0x1f1   : > { %v1075_v18 = vadd.f32 0.0010179626, %v1059_v0  ;;  %v1093_v13 = vmul.f32 %v1077_v41, %v2107_v36  ;;  %v922_v22 = vadd.f32 0.003408291, %v906_v2  ;;  %v1098_v8 = vmul.f32 %v1082_v23, %v2148_v57 }
 0x1f2   : > { %v1111_v56 = vadd.f32 0.01407047, %v1095_v48  ;;  %v841_v27 = vmul.f32 0.70710677, %v2180_v20  ;;  %v1151_v17 = vmul.f32 %v1135_v61, %v2025_v9  ;;  %v1092_v31 = vmul.f32 %v1076_v44, %v2121_v1 }
 0x1f3   : > { %v1110_v55 = vadd.f32 0.01407047, %v1094_v26  ;;  %v1114_v24 = vadd.f32 0.01407047, %v1098_v8  ;;  %v2392_v4 = vmov 0.0   ;;  %v1128_v2 = vmul.f32 %v1112_v52, %v2111_v38 }
 0x1f4   : > { %1565 = vmatprep.subr.mxu0 %v2392_v4  ;;  %1597 = vmatprep.mubr.msk.f32.mxu0 %vm1687_vm1, %v2392_v4  ;;  %v1170_v0 = vadd.f32 0.49746925, %v1154_v45  ;;  %v1105_v50 = vadd.f32 0.01407047, %v1089_v40  ;;  %v2194_v54 = vclamps-f32 %v841_v27, 4.0  ;;  %v1091_v48 = vmul.f32 %v1075_v18, %v2132_v19 }
 0x1f5   : > { %v916_v41 = vadd.f32 0.003408291, %v900_v16  ;;  %v938_v61 = vmul.f32 %v922_v22, %v2148_v57  ;;  %v1130_v44 = vmul.f32 %v1114_v24, %v2148_v57  ;;  %v2200_v26 = vmul.f32 %v913_v15, %v2099_v60 }
 0x1f6   : > { %v1109_v23 = vadd.f32 0.01407047, %v1093_v13  ;;  %v1127_v8 = vmul.f32 %v1111_v56, %v2117_v53  ;;  %v2205_v45 = vmul.f32 %v2194_v54, %v2194_v54  ;;  %v2207_v40 = vadd.f32 0.49746925, %v1151_v17 }
 0x1f7   : > { %v1108_v52 = vadd.f32 0.01407047, %v1092_v31  ;;  %v1126_v16 = vmul.f32 %v1110_v55, %v2092_v25  ;;  %v1146_v18 = vadd.f32 0.11098505, %v1130_v44  ;;  %v2211_v22 = vmul.f32 %v1170_v0, %v2015_v49 }
 0x1f8   : > { %v1121_v27 = vmul.f32 %v1105_v50, %v2099_v60  ;;  %v1144_v15 = vadd.f32 0.11098505, %v1128_v2  ;;  %v1033_v13 = vmul.f32 -1.1791603e-07, %v2205_v45  ;;  %v932_v56 = vmul.f32 %v916_v41, %v2121_v1 }
 0x1f9   : > { %v1107_v24 = vadd.f32 0.01407047, %v1091_v48  ;;  %v954_v4 = vadd.f32 0.050955694, %v938_v61  ;;  %v1162_v3 = vmul.f32 %v1146_v18, %v2148_v57  ;;  %v1125_v17 = vmul.f32 %v1109_v23, %v2107_v36 }
 0x1fa   : > { %v904_v31 = vmul.f32 0.00022905065, %v2111_v38  ;;  %v1143_v55 = vadd.f32 0.11098505, %v1127_v8  ;;  %v1049_v44 = vadd.f32 2.3547966e-05, %v1033_v13  ;;  %v1124_v0 = vmul.f32 %v1108_v52, %v2121_v1 }
 0x1fb   : > { %v899_v29 = vmul.f32 0.00022905065, %v2132_v19  ;;  %v1142_v50 = vadd.f32 0.11098505, %v1126_v16  ;;  %v1178_v2 = vadd.f32 0.49746925, %v1162_v3  ;;  %v1160_v51 = vmul.f32 %v1144_v15, %v2111_v38 }
 0x1fc   : > { %v903_v41 = vmul.f32 0.00022905065, %v2117_v53  ;;  %v905_v48 = vmul.f32 0.00022905065, %v2205_v45  ;;  %v1065_v61 = vmul.f32 %v1049_v44, %v2205_v45  ;;  %v1123_v23 = vmul.f32 %v1107_v24, %v2132_v19 }
 0x1fd   : > { %v902_v18 = vmul.f32 0.00022905065, %v2092_v25  ;;  %v970_v8 = vmul.f32 %v954_v4, %v2148_v57  ;;  %v1194_v52 = vmul.f32 %v1178_v2, %v2148_v57  ;;  %v1141_v13 = vadd.f32 0.11098505, %v1125_v17 }
 0x1fe   : > { %v920_v10 = vadd.f32 0.003408291, %v904_v31  ;;  %v1159_v3 = vmul.f32 %v1143_v55, %v2117_v53  ;;  %v1081_v16 = vadd.f32 0.0010179626, %v1065_v61  ;;  %v1140_v15 = vadd.f32 0.11098505, %v1124_v0 }
 0x1ff   : > { %v1158_v32 = vmul.f32 %v1142_v50, %v2092_v25  ;;  %v901_v28 = vmul.f32 0.00022905065, %v2107_v36  ;;  %v1210_v30 = vadd.f32 1.0, %v1194_v52  ;;  %v1176_v44 = vadd.f32 0.49746925, %v1160_v51 }
 0x200   : > { %v919_v63 = vadd.f32 0.003408291, %v903_v41  ;;  %v921_v24 = vadd.f32 0.003408291, %v905_v48  ;;  %v1097_v35 = vmul.f32 %v1081_v16, %v2205_v45  ;;  %v1139_v46 = vadd.f32 0.11098505, %v1123_v23 }
 0x201   : > { %v918_v4 = vadd.f32 0.003408291, %v902_v18  ;;  %v986_v14 = vadd.f32 0.18520832, %v970_v8  ;;  %1629 = vrcp.f32 %v1210_v30  ;;  %v1157_v17 = vmul.f32 %v1141_v13, %v2107_v36 }
 0x202   : > { %v936_v31 = vmul.f32 %v920_v10, %v2111_v38  ;;  %v1175_v55 = vadd.f32 0.49746925, %v1159_v3  ;;  %v1113_v0 = vadd.f32 0.01407047, %v1097_v35  ;;  %v1137_v2 = vadd.f32 0.11098505, %v1121_v27 }
 0x203   : > { %v1156_v50 = vmul.f32 %v1140_v15, %v2121_v1  ;;  %v1174_v61 = vadd.f32 0.49746925, %v1158_v32  ;;  %v917_v52 = vadd.f32 0.003408291, %v901_v28  ;;  %v1192_v51 = vmul.f32 %v1176_v44, %v2111_v38 }
 0x204   : > { %v935_v41 = vmul.f32 %v919_v63, %v2117_v53  ;;  %v937_v48 = vmul.f32 %v921_v24, %v2205_v45  ;;  %v1129_v23 = vmul.f32 %v1113_v0, %v2205_v45  ;;  %v948_v30 = vadd.f32 0.050955694, %v932_v56 }
 0x205   : > { %v1155_v18 = vmul.f32 %v1139_v46, %v2132_v19  ;;  %v934_v10 = vmul.f32 %v918_v4, %v2092_v25  ;;  %v1002_v35 = vmul.f32 %v986_v14, %v2148_v57  ;;  %v1173_v27 = vadd.f32 0.49746925, %v1157_v17 }
 0x206   : > { %v952_v8 = vadd.f32 0.050955694, %v936_v31  ;;  %v1191_v32 = vmul.f32 %v1175_v55, %v2117_v53  ;;  %v1145_v28 = vadd.f32 0.11098505, %v1129_v23  ;;  %v1172_v13 = vadd.f32 0.49746925, %v1156_v50 }
 0x207   : > { %v915_v3 = vadd.f32 0.003408291, %v899_v29  ;;  %v1190_v63 = vmul.f32 %v1174_v61, %v2092_v25  ;;  %v933_v16 = vmul.f32 %v917_v52, %v2107_v36  ;;  %v1208_v15 = vadd.f32 1.0, %v1192_v51 }
 0x208   : > { %v951_v44 = vadd.f32 0.050955694, %v935_v41  ;;  %v953_v56 = vadd.f32 0.050955694, %v937_v48  ;;  %v1161_v46 = vmul.f32 %v1145_v28, %v2205_v45  ;;  %v1153_v24 = vmul.f32 %v1137_v2, %v2099_v60 }
 0x209   : > { %v1171_v4 = vadd.f32 0.49746925, %v1155_v18  ;;  %v950_v14 = vadd.f32 0.050955694, %v934_v10  ;;  %v1018_v57 = vadd.f32 1.1283791, %v1002_v35  ;;  %v1189_v17 = vmul.f32 %v1173_v27, %v2107_v36 }
 0x20a   : > { %v968_v31 = vmul.f32 %v952_v8, %v2111_v38  ;;  %v1207_v55 = vadd.f32 1.0, %v1191_v32  ;;  %v1177_v29 = vadd.f32 0.49746925, %v1161_v46  ;;  %v1188_v0 = vmul.f32 %v1172_v13, %v2121_v1 }
 0x20b   : > { %v931_v50 = vmul.f32 %v915_v3, %v2132_v19  ;;  %v1206_v61 = vadd.f32 1.0, %v1190_v63  ;;  %v949_v52 = vadd.f32 0.050955694, %v933_v16  ;;  %1631 = vrcp.f32 %v1208_v15 }
 0x20c   : > { %v967_v51 = vmul.f32 %v951_v44, %v2117_v53  ;;  %v969_v2 = vmul.f32 %v953_v56, %v2205_v45  ;;  %v1193_v41 = vmul.f32 %v1177_v29, %v2205_v45  ;;  %v1169_v48 = vadd.f32 0.49746925, %v1153_v24 }
 0x20d   : > { %v1187_v23 = vmul.f32 %v1171_v4, %v2132_v19  ;;  %v966_v18 = vmul.f32 %v950_v14, %v2092_v25  ;;  %v1226_v10 = vmul.f32 %v2135_v11, %v1018_v57  ;;  %v1205_v27 = vadd.f32 1.0, %v1189_v17 }
 0x20e   : > { %v1630_v35 = vpop.eup %1629  ;;  %v984_v8 = vadd.f32 0.18520832, %v968_v31  ;;  %1633 = vrcp.f32 %v1207_v55  ;;  %v1209_v32 = vadd.f32 1.0, %v1193_v41  ;;  %v1204_v28 = vadd.f32 1.0, %v1188_v0 }
 0x20f   : > { %v947_v13 = vadd.f32 0.050955694, %v931_v50  ;;  %1635 = vrcp.f32 %v1206_v61  ;;  %v1258_v3 = vmul.f32 %v1630_v35, %v1226_v10  ;;  %v965_v63 = vmul.f32 %v949_v52, %v2107_v36 }
 0x210   : > { %v983_v16 = vadd.f32 0.18520832, %v967_v51  ;;  %v985_v15 = vadd.f32 0.18520832, %v969_v2  ;;  %1637 = vrcp.f32 %v1209_v32  ;;  %v1185_v44 = vmul.f32 %v1169_v48, %v2099_v60 }
 0x211   : > { %v964_v56 = vmul.f32 %v948_v30, %v2121_v1  ;;  %v826_v11 = vmul.f32 0.5, %v2081_v12  ;;  %v1274_v46 = vadd.f32 1.0, %v1258_v3  ;;  %v1203_v24 = vadd.f32 1.0, %v1187_v23 }
 0x212   : > { %v982_v4 = vadd.f32 0.18520832, %v966_v18  ;;  %1639 = vrcp.f32 %v1205_v27  ;;  %v1000_v14 = vmul.f32 %v984_v8, %v2111_v38  ;;  %v1202_v57 = vadd.f32 1.0, %v2211_v22 }
 0x213   : > { %v945_v17 = vadd.f32 0.050955694, %v2200_v26  ;;  %v963_v31 = vmul.f32 %v947_v13, %v2132_v19  ;;  %v1290_v55 = vmul.f32 %v1274_v46, %v826_v11  ;;  %1641 = vrcp.f32 %v1204_v28 }
 0x214   : > { %v981_v29 = vadd.f32 0.18520832, %v965_v63  ;;  %v999_v0 = vmul.f32 %v983_v16, %v2117_v53  ;;  %v1001_v30 = vmul.f32 %v985_v15, %v2205_v45  ;;  %v1181_v12 = vmul.f32 %v2150_v62, %v1975_v37 }
 0x215   : > { %v1183_v50 = vmul.f32 %v2207_v40, %v2025_v9  ;;  %v962_v38 = vmul.f32 %v2176_v21, %v2015_v49  ;;  %v980_v22 = vadd.f32 0.18520832, %v964_v56  ;;  %1566 = vmatpush3.msra.mxu0 %v1290_v55  ;;  %v1201_v26 = vadd.f32 1.0, %v1185_v44 }
 0x216   : > { %1643 = vrcp.f32 %v1203_v24  ;;  %v998_v61 = vmul.f32 %v982_v4, %v2092_v25  ;;  %v1016_v52 = vadd.f32 1.1283791, %v1000_v14  ;;  %v2432_v51 = vmov 0.0  }
 0x217   : > { %1567 = vmatprep.subr.mxu0 %v2432_v51  ;;  %v1200_v53 = vadd.f32 1.0, %v2170_v42  ;;  %v943_v45 = vadd.f32 0.050955694, %v2163_v7  ;;  %v961_v62 = vmul.f32 %v945_v17, %v2099_v60  ;;  %v979_v2 = vadd.f32 0.18520832, %v963_v31 }
 0x218   : > { %1645 = vrcp.f32 %v1202_v57  ;;  %v997_v40 = vmul.f32 %v981_v29, %v2107_v36  ;;  %v1015_v21 = vadd.f32 1.1283791, %v999_v0  ;;  %v1017_v41 = vadd.f32 1.1283791, %v1001_v30  ;;  %v1632_v48 = vpop.eup %1631 }
 0x219   : > { %1647 = vrcp.f32 %v2158_v39  ;;  %v960_v25 = vmul.f32 %v2153_v6, %v1986_v47  ;;  %v978_v23 = vadd.f32 0.18520832, %v962_v38  ;;  %v996_v18 = vmul.f32 %v980_v22, %v2121_v1 }
 0x21a   : > { %v1199_v42 = vadd.f32 1.0, %v1183_v50  ;;  %1649 = vrcp.f32 %v1201_v26  ;;  %v1014_v7 = vadd.f32 1.1283791, %v998_v61  ;;  %v1224_v10 = vmul.f32 %v2094_v33, %v1016_v52  ;;  %v2434_v50 = vld [vmem:[#allocation30_spill] sm:$0xff] }
 0x21b   : > { %v1634_v35 = vpop.eup %1633  ;;  %1651 = vrcp.f32 %v1200_v53  ;;  %v959_v36 = vmul.f32 %v943_v45, %v2025_v9  ;;  %v977_v27 = vadd.f32 0.18520832, %v961_v62  ;;  %v995_v8 = vmul.f32 %v979_v2, %v2132_v19  ;;  %v2435_v26 = vld [vmem:[#allocation34_spill] sm:$0xff]  ;;  %v2436_v53 = vld [vmem:[#allocation35_spill] sm:$0xff] }
 0x21c   : > { %v1636_v32 = vpop.eup %1635  ;;  %v1013_v39 = vadd.f32 1.1283791, %v997_v40  ;;  %v1254_v28 = vmul.f32 %v1632_v48, %v1224_v10  ;;  %v1223_v6 = vmul.f32 %v2101_v34, %v1015_v21  ;;  %v1225_v13 = vmul.f32 %v2194_v54, %v1017_v41  ;;  %v2438_v45 = vld [vmem:[#allocation26_spill] sm:$0xff]  ;;  %v2439_v40 = vld [vmem:[#allocation20_spill] sm:$0xff] }
 0x21d   : > { %v1638_v1 = vpop.eup %1637  ;;  %v1197_v3 = vadd.f32 1.0, %v1181_v12  ;;  %v976_v63 = vadd.f32 0.18520832, %v960_v25  ;;  %v994_v16 = vmul.f32 %v978_v23, %v2015_v49  ;;  %v1012_v33 = vadd.f32 1.1283791, %v996_v18  ;;  %v2433_v12 = vld [vmem:[#allocation33_spill] sm:$0xff] }
 0x21e   : > { %1653 = vrcp.f32 %v1199_v42  ;;  %v1222_v15 = vmul.f32 %v2070_v5, %v1014_v7  ;;  %v1252_v44 = vmul.f32 %v1634_v35, %v1223_v6  ;;  %v1256_v56 = vmul.f32 %v1638_v1, %v1225_v13  ;;  %v2440_v48 = vld [vmem:[#allocation22_spill] sm:$0xff]  ;;  %v2441_v7 = vld [vmem:[#allocation31_spill] sm:$0xff]  ;;  %v2444_v1 = vld [vmem:[#allocation24_spill] sm:$0xff] }
 0x21f   : > { %v1640_v11 = vpop.eup %1639  ;;  %v975_v19 = vadd.f32 0.18520832, %v959_v36  ;;  %v993_v46 = vmul.f32 %v977_v27, %v2099_v60  ;;  %v1011_v24 = vadd.f32 1.1283791, %v995_v8  ;;  %v825_v34 = vmul.f32 0.5, %v2180_v20  ;;  %v2442_v35 = vld [vmem:[#allocation27_spill] sm:$0xff] }
 0x220   : > { %v1250_v4 = vmul.f32 %v1636_v32, %v1222_v15  ;;  %v1221_v54 = vmul.f32 %v2077_v58, %v1013_v39  ;;  %v1272_v14 = vadd.f32 1.0, %v1254_v28  ;;  %v1273_v57 = vadd.f32 1.0, %v1256_v56  ;;  %v1642_v17 = vpop.eup %1641  ;;  %v2443_v8 = vld [vmem:[#allocation32_spill] sm:$0xff] }
 0x221   : > { %1655 = vrcp.f32 %v1197_v3  ;;  %v992_v49 = vmul.f32 %v976_v63, %v1986_v47  ;;  %v1010_v31 = vadd.f32 1.1283791, %v994_v16  ;;  %v1220_v5 = vmul.f32 %v2088_v59, %v1012_v33  ;;  %v2445_v63 = vld [vmem:[#allocation9_spill] sm:$0xff] }
 0x222   : > { %v1248_v55 = vmul.f32 %v1640_v11, %v1221_v54  ;;  %v824_v29 = vmul.f32 0.5, %v2059_v43  ;;  %v1271_v0 = vadd.f32 1.0, %v1252_v44  ;;  %v1289_v60 = vmul.f32 %v1273_v57, %v825_v34  ;;  %v2437_v43 = vld [vmem:[#allocation15_spill] sm:$0xff]  ;;  %v2446_v16 = vld [vmem:[#allocation25_spill] sm:$0xff]  ;;  %v2447_v44 = vld [vmem:[#allocation28_spill] sm:$0xff] }
 0x223   : > { %v1644_v30 = vpop.eup %1643  ;;  %1657 = vrcp.f32 %v2433_v12  ;;  %v991_v20 = vmul.f32 %v975_v19, %v2025_v9  ;;  %v1009_v58 = vadd.f32 1.1283791, %v993_v46  ;;  %v823_v38 = vmul.f32 0.5, %v2434_v50  ;;  %v2450_v57 = vld [vmem:[#allocation21_spill] sm:$0xff] }
 0x224   : > { %v1246_v22 = vmul.f32 %v1642_v17, %v1220_v5  ;;  %v1219_v61 = vmul.f32 %v2435_v26, %v1011_v24  ;;  %v1270_v47 = vadd.f32 1.0, %v1250_v4  ;;  %v1288_v52 = vmul.f32 %v1272_v14, %v824_v29  ;;  %1568 = vmatpush3.msra.mxu0 %v1289_v60  ;;  %v2449_v4 = vld [vmem:[#allocation12_spill] sm:$0xff]  ;;  %v2452_v60 = vld [vmem:[#allocation13_spill] sm:$0xff] }
 0x225   : > { %v1646_v59 = vpop.eup %1645  ;;  %1659 = vrcp.f32 %v2436_v53  ;;  %v990_v62 = vmul.f32 %v2438_v45, %v2437_v43  ;;  %v1008_v2 = vadd.f32 1.1283791, %v992_v49  ;;  %v1218_v21 = vmul.f32 %v2439_v40, %v1010_v31  ;;  %1569 = vmatprep.subr.mxu0 %v2432_v51  ;;  %v2455_v45 = vld [vmem:[#allocation23_spill] sm:$0xff] }
 0x226   : > { %v1648_v9 = vpop.eup %1647  ;;  %v1244_v41 = vmul.f32 %v1644_v30, %v1219_v61  ;;  %v822_v25 = vmul.f32 0.5, %v2440_v48  ;;  %v1269_v23 = vadd.f32 1.0, %v1248_v55  ;;  %v1287_v18 = vmul.f32 %v1271_v0, %v823_v38  ;;  %1570 = vmatpush3.msra.mxu0 %v1288_v52  ;;  %v2451_v55 = vld [vmem:[#allocation29_spill] sm:$0xff]  ;;  %v2454_v61 = vld [vmem:[#allocation16_spill] sm:$0xff] }
 0x227   : > { %v1650_v42 = vpop.eup %1649  ;;  %v971_v10 = vadd.f32 0.18520832, %v2441_v7  ;;  %v989_v36 = vmul.f32 %v2442_v35, %v1975_v37  ;;  %v1007_v27 = vadd.f32 1.1283791, %v991_v20  ;;  %v1217_v32 = vmul.f32 %v2443_v8, %v1009_v58  ;;  %1571 = vmatprep.subr.mxu0 %v2432_v51  ;;  %v2448_v37 = vld [vmem:[#allocation17_spill] sm:$0xff]  ;;  %v2453_v58 = vld [vmem:[#allocation18_spill] sm:$0xff] }
 0x228   : > { %v1652_v39 = vpop.eup %1651  ;;  %v1242_v28 = vmul.f32 %v1646_v59, %v1218_v21  ;;  %v1268_v6 = vadd.f32 1.0, %v1246_v22  ;;  %v1286_v13 = vmul.f32 %v1270_v47, %v822_v25  ;;  %v821_v3 = vmul.f32 0.5, %v2444_v1  ;;  %1572 = vmatpush3.msra.mxu0 %v1287_v18 }
 0x229   : > { %v988_v33 = vmul.f32 %v2446_v16, %v2445_v63  ;;  %v1006_v15 = vadd.f32 1.1283791, %v990_v62  ;;  %v820_v56 = vmul.f32 0.5, %v2447_v44  ;;  %1573 = vmatprep.subr.mxu0 %v2432_v51  ;;  %v1216_v11 = vmul.f32 %v2448_v37, %v1008_v2  ;;  %v2456_v2 = vld [vmem:[#allocation14_spill] sm:$0xff]  ;;  %v2462_v16 = vld [vmem:[#allocation5_spill] sm:$0xff] }
 0x22a   : > { %v1240_v19 = vmul.f32 %v1650_v42, %v1217_v32  ;;  %v1267_v46 = vadd.f32 1.0, %v1244_v41  ;;  %v1285_v24 = vmul.f32 %v1269_v23, %v821_v3  ;;  %1574 = vmatpush3.msra.mxu0 %v1286_v13  ;;  %v987_v54 = vmul.f32 %v971_v10, %v2449_v4  ;;  %v2457_v41 = vld [vmem:[#allocation7_spill] sm:$0xff]  ;;  %v2458_v42 = vld [vmem:[#allocation10_spill] sm:$0xff]  ;;  %v2460_v32 = vld [vmem:[#allocation8_spill] sm:$0xff] }
 0x22b   : > { %v1654_v34 = vpop.eup %1653  ;;  %v1005_v14 = vadd.f32 1.1283791, %v989_v36  ;;  %v1215_v17 = vmul.f32 %v2450_v57, %v1007_v27  ;;  %1575 = vmatprep.subr.mxu0 %v2432_v51  ;;  %v1238_v49 = vmul.f32 %v1652_v39, %v1216_v11  ;;  %v1266_v31 = vadd.f32 1.0, %v1242_v28  ;;  %v2459_v36 = vld [vmem:[#allocation19_spill] sm:$0xff]  ;;  %v2463_v37 = vld [vmem:[#allocation6_spill] sm:$0xff] }
 0x22c   : > { %v1284_v5 = vmul.f32 %v1268_v6, %v820_v56  ;;  %v819_v29 = vmul.f32 0.5, %v2451_v55  ;;  %1576 = vmatpush3.msra.mxu0 %v1285_v24  ;;  %v1004_v0 = vadd.f32 1.1283791, %v988_v33  ;;  %v1214_v30 = vmul.f32 %v2452_v60, %v1006_v15  ;;  %v2461_v3 = vld [vmem:[#allocation11_spill] sm:$0xff] }
 0x22d   : > { %1577 = vmatprep.subr.mxu0 %v2432_v51  ;;  %v1236_v20 = vmul.f32 %v1654_v34, %v1215_v17  ;;  %v818_v50 = vmul.f32 0.5, %v2453_v58  ;;  %v1265_v38 = vadd.f32 1.0, %v1240_v19  ;;  %v1003_v26 = vadd.f32 1.1283791, %v987_v54  ;;  %v1296_v54 = vpop.permute.xlu0 %1295 }
 0x22e   : > { %v1656_v12 = vpop.eup %1655  ;;  %v1283_v22 = vmul.f32 %v1267_v46, %v819_v29  ;;  %1578 = vmatpush3.msra.mxu0 %v1284_v5  ;;  %v1213_v47 = vmul.f32 %v2454_v61, %v1005_v14  ;;  %v1234_v59 = vmul.f32 %v1648_v9, %v1214_v30  ;;  %v1264_v53 = vadd.f32 1.0, %v1238_v49  ;;  %v1291_v46 = vld [vmem:[%s2370_s6] sm:$0x1] }
 0x22f   : > { %1579 = vmatprep.subr.mxu0 %v2432_v51  ;;  %v1282_v43 = vmul.f32 %v1266_v31, %v818_v50  ;;  %v817_v62 = vmul.f32 0.5, %v2455_v45  ;;  %v816_v40 = vmul.f32 0.5, %v2456_v2  ;;  %v1212_v48 = vmul.f32 %v2457_v41, %v1004_v0 }
 0x230   : > { %v1658_v52 = vpop.eup %1657  ;;  %1580 = vmatpush3.msra.mxu0 %v1283_v22  ;;  %v1232_v25 = vmul.f32 %v1656_v12, %v1213_v47  ;;  %v1263_v23 = vadd.f32 1.0, %v1236_v20  ;;  %v1211_v7 = vmul.f32 %v2458_v42, %v1003_v26  ;;  %v1262_v10 = vadd.f32 1.0, %v1234_v59 }
 0x231   : > { %1581 = vmatprep.subr.mxu0 %v2432_v51  ;;  %v1281_v18 = vmul.f32 %v1265_v38, %v817_v62  ;;  %v1230_v9 = vmul.f32 %v1658_v52, %v1212_v48  ;;  %v1280_v35 = vmul.f32 %v1264_v53, %v816_v40  ;;  %v815_v27 = vmul.f32 0.5, %v2459_v36 }
 0x232   : > { %v1660_v21 = vpop.eup %1659  ;;  %1582 = vmatpush3.msra.mxu0 %v1282_v43  ;;  %v814_v39 = vmul.f32 0.5, %v2460_v32  ;;  %v1261_v28 = vadd.f32 1.0, %v1232_v25  ;;  %v813_v63 = vmul.f32 0.5, %v2461_v3  ;;  %v812_v33 = vmul.f32 0.5, %v2462_v16 }
 0x233   : > { %1583 = vmatprep.subr.mxu0 %v2432_v51  ;;  %v1228_v8 = vmul.f32 %v1660_v21, %v1211_v7  ;;  %v1279_v6 = vmul.f32 %v1263_v23, %v815_v27  ;;  %v1260_v13 = vadd.f32 1.0, %v1230_v9  ;;  %v811_v11 = vmul.f32 0.5, %v2463_v37 }
 0x234   : > { %1584 = vmatpush3.msra.mxu0 %v1281_v18  ;;  %v1278_v1 = vmul.f32 %v1262_v10, %v814_v39  ;;  %v1277_v44 = vmul.f32 %v1261_v28, %v813_v63  ;;  %v1298_v24 = vlaneseq }
 0x235   : > { %1585 = vmatprep.subr.mxu0 %v2432_v51  ;;  %v1259_v15 = vadd.f32 1.0, %v1228_v8  ;;  %v1276_v56 = vmul.f32 %v1260_v13, %v812_v33 }
 0x236   : > { %1586 = vmatpush3.msra.mxu0 %v1280_v35  ;;  %v1299_v34 = vshrl.u32 %v1298_v24, 7 }
 0x237   : > { %1587 = vmatprep.subr.mxu0 %v2432_v51  ;;  %v1275_v19 = vmul.f32 %v1259_v15, %v811_v11 }
 0x238   : > { %1588 = vmatpush3.msra.mxu0 %v1279_v6  ;;  %v1300_v4 = vsub.s32 0, %v1299_v34 }
 0x239   : > { %1589 = vmatprep.subr.mxu0 %v2432_v51 }
 0x23a   : > { %1590 = vmatpush3.msra.mxu0 %v1278_v1  ;;  %v1301_v14 = vrot.slane %v1296_v54, %v1300_v4 }
 0x23b   : > { %1591 = vmatprep.subr.mxu0 %v2432_v51 }
 0x23c   : > { %1592 = vmatpush3.msra.mxu0 %v1277_v44 }
 0x23d   : > { %1593 = vmatprep.subr.mxu0 %v2432_v51 }
 0x23e   : > { %1594 = vmatpush3.msra.mxu0 %v1276_v56 }
 0x23f   : > { %1595 = vmatprep.subr.mxu0 %v2432_v51 }
 0x240   : > { %1596 = vmatpush3.msra.mxu0 %v1275_v19 }
 0x241   : > { %1598 = vmatmul.mubr.f32.vlgmr.msra.gmra.mxu0 %v1291_v46 }
 0x301   : > { %v1368_v57 = vpop.f32.mrf.mxu0 }
 0x302   : > { %v1369_v17 = vadd.f32 %v1368_v57, %v1301_v14 }
 0x303   : > { %v1599_v49 = vpop.f32.mrf.mxu0 }
 0x304   : > { %1372 = vst [vmem:[%s401_s21] sm:$0x1] %v1369_v17 }
 0x305 PF: > { %p17_p9 = scmp.ge.s32.totalorder %s1753_s10, 6   ;;  %s2464_s29 = smov %s1679_s30 }
 0x306   : > { %s2465_s30 = smov %s1762_s13  ;;  %s2466_s9 = smov %s1753_s10 }
 0x307   :  { %19 = sbr.rel (!%p17_p9) target bundleno = 5 (0x5), region = 171 }

</bundles_post_ra>
